<compile_context>
chip_gen: v5e
topology: v5e:2x2
jax: 0.10.0
libtpu: 0.0.40
codegen_flags: <defaults>
</compile_context>

<pallas_src>
import functools

import jax
import jax.numpy as jnp
from jax.experimental import pallas as pl
from jax.experimental.pallas import tpu as pltpu


def _round_up(x, m):
    return (x + m - 1) // m * m


def _pick_lane_tile(mp, cap=1024):
    """Largest lane tile <= cap dividing mp (a multiple of 128), grid >= 2."""
    for t in (1024, 512, 256, 128):
        if t <= cap and mp % t == 0 and mp // t >= 2:
            return t
    return mp


def _pick_sublane_tile(mp, cap=512):
    """Largest sublane tile <= cap dividing mp (a multiple of 8), grid >= 2."""
    for t in (512, 256, 128, 64, 32, 16, 8):
        if t <= cap and mp % t == 0 and mp // t >= 2:
            return t
    return mp


# ---------------------------------------------------------------------------
# Pallas kernel 1: transposed matmul + bias (+ReLU) for the backbone convs.
# out(Cout, TM) = W(Cout, K) @ patches(K, TM) + b(Cout, 1); lane-dense stores.
# ---------------------------------------------------------------------------
def _matmul_bias_cm_kernel(w_ref, x_ref, b_ref, o_ref, *, relu):
    acc = jnp.dot(w_ref[...], x_ref[...], preferred_element_type=jnp.float32)
    acc = acc + b_ref[...]                       # (Cout, 1) lane-broadcast
    if relu:
        acc = jnp.maximum(acc, 0.0)
    o_ref[...] = acc.astype(o_ref.dtype)


def matmul_bias_cm(patches, wmat, b, relu, out_dtype=jnp.bfloat16):
    """patches: (K, M), wmat: (Cout, K), b: (Cout,) -> (Cout, Mp) lane-padded."""
    K, M = patches.shape
    Cout = wmat.shape[0]
    Kp = _round_up(K, 8)
    Mp = _round_up(M, 128)                       # lane-dense output stores
    patches = jnp.pad(patches, ((0, Kp - K), (0, Mp - M)))
    wmat = jnp.pad(wmat, ((0, 0), (0, Kp - K)))
    TM = _pick_lane_tile(Mp)
    out = pl.pallas_call(
        functools.partial(_matmul_bias_cm_kernel, relu=relu),
        out_shape=jax.ShapeDtypeStruct((Cout, Mp), out_dtype),
        grid=(Mp // TM,),
        in_specs=[
            pl.BlockSpec((Cout, Kp), lambda i: (0, 0)),
            pl.BlockSpec((Kp, TM), lambda i: (0, i)),
            pl.BlockSpec((Cout, 1), lambda i: (0, 0)),
        ],
        out_specs=pl.BlockSpec((Cout, TM), lambda i: (0, i)),
        compiler_params=pltpu.CompilerParams(
            dimension_semantics=("parallel",)),
    )(wmat.astype(jnp.bfloat16), patches.astype(jnp.bfloat16),
      b.reshape(Cout, 1).astype(jnp.float32))
    return out


def conv2d_cm(act_cm, spatial, w_oihw, b, *, stride=2, padding=1, relu=True):
    """Conv on channel-major activations: act_cm (Cin, >=N*H*W), valid cols N*H*W."""
    N, H, W = spatial
    Cin = act_cm.shape[0]
    Cout, _, k, _ = w_oihw.shape
    x = act_cm[:, :N * H * W].reshape(Cin, N, H, W)
    if padding:
        x = jnp.pad(x, ((0, 0), (0, 0), (padding, padding), (padding, padding)))
    Hp, Wp = x.shape[2], x.shape[3]
    Ho = (Hp - k) // stride + 1
    Wo = (Wp - k) // stride + 1
    # TODO(synk): im2col patches are still materialized in HBM by XLA (k*k = 9x
    # input bytes); a halo-aware in-kernel gather would remove this round trip.
    cols = [x[:, :, dh:dh + stride * Ho:stride, dw:dw + stride * Wo:stride]
            for dh in range(k) for dw in range(k)]
    patches = jnp.concatenate(cols, axis=0).reshape(k * k * Cin, N * Ho * Wo)
    # PyTorch weight (Cout, Cin, kh, kw) -> (Cout, kh*kw*Cin), matching rows.
    wmat = jnp.transpose(w_oihw, (0, 2, 3, 1)).reshape(Cout, k * k * Cin)
    out = matmul_bias_cm(patches, wmat, b, relu)
    return out, (N, Ho, Wo)


# ---------------------------------------------------------------------------
# Pallas kernel 2: fused head  fc6(1x1)+ReLU -> fc7(1x1)+ReLU -> conv_score,
# with the 4096-wide fc7 dimension chunked over a grid axis (bounded VMEM).
# ---------------------------------------------------------------------------
def _head_kernel(x_ref, w6_ref, b6_ref, w7_ref, b7_ref, ws_ref, bs_ref, o_ref,
                 h6_ref, acc_ref):
    c = pl.program_id(1)

    @pl.when(c == 0)
    def _():
        h6 = jnp.dot(x_ref[...], w6_ref[...], preferred_element_type=jnp.float32)
        h6 = jnp.maximum(h6 + b6_ref[...], 0.0)          # layers[5] + ReLU
        # TODO(synk): Dropout2d -> identity (eval semantics).
        h6_ref[...] = h6.astype(jnp.bfloat16)
        acc_ref[...] = jnp.zeros_like(acc_ref)

    # fc7 chunk: only a (TM, CK) slice of the 4096-wide activation is live.
    h7 = jnp.dot(h6_ref[...], w7_ref[...], preferred_element_type=jnp.float32)
    h7 = jnp.maximum(h7 + b7_ref[...], 0.0)              # layers[6] + ReLU
    acc_ref[...] += jnp.dot(h7.astype(jnp.bfloat16), ws_ref[...],
                            preferred_element_type=jnp.float32)

    @pl.when(c == pl.num_programs(1) - 1)
    def _():
        o_ref[...] = (acc_ref[...] + bs_ref[...]).astype(o_ref.dtype)


def head_scores(h_cm, spatial, w6, b6, w7, b7, ws_pad, bs_pad, *, chunk=512):
    """Returns the score as (M, Cs_pad) bf16 (128-lane padded, lane-dense)."""
    N, Hs, Ws = spatial
    C5 = h_cm.shape[0]
    C6, C7, Cs = w6.shape[1], w7.shape[1], ws_pad.shape[1]
    M = N * Hs * Ws
    x = jnp.transpose(h_cm[:, :M], (1, 0))               # (M, C5) -- tiny
    Mp = _round_up(M, 8)
    if Mp != M:
        x = jnp.pad(x, ((0, Mp - M), (0, 0)))
    TM = _pick_sublane_tile(Mp, cap=512)
    CK = chunk
    while C7 % CK:
        CK //= 2
    out = pl.pallas_call(
        _head_kernel,
        out_shape=jax.ShapeDtypeStruct((Mp, Cs), jnp.bfloat16),
        grid=(Mp // TM, C7 // CK),
        in_specs=[
            pl.BlockSpec((TM, C5), lambda i, c: (i, 0)),
            pl.BlockSpec((C5, C6), lambda i, c: (0, 0)),
            pl.BlockSpec((1, C6), lambda i, c: (0, 0)),
            pl.BlockSpec((C6, CK), lambda i, c: (0, c)),
            pl.BlockSpec((1, CK), lambda i, c: (0, c)),
            pl.BlockSpec((CK, Cs), lambda i, c: (c, 0)),
            pl.BlockSpec((1, Cs), lambda i, c: (0, 0)),
        ],
        out_specs=pl.BlockSpec((TM, Cs), lambda i, c: (i, 0)),
        scratch_shapes=[pltpu.VMEM((TM, C6), jnp.bfloat16),
                        pltpu.VMEM((TM, Cs), jnp.float32)],
        compiler_params=pltpu.CompilerParams(
            dimension_semantics=("parallel", "arbitrary")),
    )(x.astype(jnp.bfloat16),
      w6.astype(jnp.bfloat16), b6.reshape(1, C6).astype(jnp.float32),
      w7.astype(jnp.bfloat16), b7.reshape(1, C7).astype(jnp.float32),
      ws_pad.astype(jnp.bfloat16), bs_pad.reshape(1, Cs).astype(jnp.float32))
    if Mp != M:
        out = out[:M]
    return out


# ---------------------------------------------------------------------------
# Pallas kernel 3: ConvTranspose2d(C, C, k=64, stride=32, bias=False) as a
# single fused matmul with lane-dense output (minor dim = C*1024).
# ---------------------------------------------------------------------------
def _deconv_kernel(x_ref, w_ref, o_ref):
    o_ref[...] = jnp.dot(x_ref[...], w_ref[...],
                         preferred_element_type=jnp.float32)


def upsample_32x(score_nhwc, w_up, *, stride=32):
    """score_nhwc: (N, Hs, Ws, Cp) bf16, lane-padded channels (padding == 0).

    Returns NCHW f32 (N, Cout, (Hs+1)*S, (Ws+1)*S).
    """
    N, Hs, Ws, Cp = score_nhwc.shape
    Cin, Cout, K, _ = w_up.shape
    S = stride
    assert K == 2 * S and Cp >= Cin

    # LHS: for each output 32x32 site (n, r, o) stack the 4 contributing score
    # pixels (r,o), (r,o-1), (r-1,o), (r-1,o-1) along K (zeros off the edge).
    pads = (((0, 0), (0, 1), (0, 1), (0, 0)),   # (r,   o  ) -> top-left taps
            ((0, 0), (0, 1), (1, 0), (0, 0)),   # (r,   o-1) -> top-right taps
            ((0, 0), (1, 0), (0, 1), (0, 0)),   # (r-1, o  ) -> bottom-left
            ((0, 0), (1, 0), (1, 0), (0, 0)))   # (r-1, o-1) -> bottom-right
    lhs = jnp.concatenate([jnp.pad(score_nhwc, p) for p in pads], axis=-1)
    M = N * (Hs + 1) * (Ws + 1)
    lhs = lhs.reshape(M, 4 * Cp).astype(jnp.bfloat16)
    Mp = _round_up(M, 8)
    if Mp != M:
        lhs = jnp.pad(lhs, ((0, Mp - M), (0, 0)))

    # RHS: kernel quadrants; rows = (quadrant, ci zero-padded to Cp),
    # columns = (co, p, q) so the minor dim Cout*S*S is a multiple of 128.
    quads = []
    for a in (0, 1):
        for c in (0, 1):
            wq = w_up[:, :, a * S:(a + 1) * S, c * S:(c + 1) * S]
            wq = wq.reshape(Cin, Cout * S * S)
            quads.append(jnp.pad(wq, ((0, Cp - Cin), (0, 0))))
    rhs = jnp.concatenate(quads, axis=0).astype(jnp.bfloat16)

    Ncol = Cout * S * S
    TN = S * S                                   # one class per column block
    TMu = Mp if Mp <= 512 else _pick_sublane_tile(Mp, cap=512)
    out = pl.pallas_call(
        _deconv_kernel,
        out_shape=jax.ShapeDtypeStruct((Mp, Ncol), jnp.float32),
        grid=(Mp // TMu, Ncol // TN),
        in_specs=[
            pl.BlockSpec((TMu, 4 * Cp), lambda i, j: (i, 0)),
            pl.BlockSpec((4 * Cp, TN), lambda i, j: (0, j)),
        ],
        out_specs=pl.BlockSpec((TMu, TN), lambda i, j: (i, j)),
        compiler_params=pltpu.CompilerParams(
            dimension_semantics=("parallel", "parallel")),
    )(lhs, rhs)

    # Layout plumbing in the wrapper: (n, r, o, co, p, q) -> NCHW.
    out = out[:M].reshape(N, Hs + 1, Ws + 1, Cout, S, S)
    out = jnp.transpose(out, (0, 3, 1, 4, 2, 5))
    return out.reshape(N, Cout, (Hs + 1) * S, (Ws + 1) * S)


# ---------------------------------------------------------------------------
# Deterministic parameter construction (mirrors the module's __init__).
# ---------------------------------------------------------------------------
def init_upsampling(in_channels, out_channels, kernel_size):
    factor = kernel_size // 2
    center = factor - 0.5 * (1 + kernel_size % 2)
    r = 1.0 - jnp.abs(
        jnp.arange(kernel_size, dtype=jnp.float32) - center) / factor
    mat = r[:, None] * r[None, :]
    return jnp.tile(mat[None, None], (in_channels, out_channels, 1, 1))


def make_params(key, num_classes):
    keys = jax.random.split(key, 16)

    def conv_w(k, cout, cin, ksz):
        # kaiming_normal, mode='fan_out', nonlinearity='relu'
        fan_out = cout * ksz * ksz
        std = (2.0 / fan_out) ** 0.5
        return std * jax.random.normal(k, (cout, cin, ksz, ksz), jnp.float32)

    def bias(k, c):
        return 0.02 * jax.random.normal(k, (c,), jnp.float32)

    # Synthetic `layers[0..4]`: 3x3 stride-2 conv (+ReLU) blocks, 32x total.
    backbone_dims = [(3, 8), (8, 8), (8, 16), (16, 16), (16, 32)]
    backbone = []
    for i, (cin, cout) in enumerate(backbone_dims):
        backbone.append((conv_w(keys[2 * i], cout, cin, 3),
                         bias(keys[2 * i + 1], cout)))

    return {
        "backbone": backbone,
        # layers[5]: 1x1 conv (ReLU + Dropout2d follow in the Sequential)
        "fc6_w": conv_w(keys[10], 64, 32, 1),
        "fc6_b": bias(keys[11], 64),
        # layers[6]: 1x1 conv -> 4096 (hard-coded by conv_score's in_channels)
        "fc7_w": conv_w(keys[12], 4096, 64, 1),
        "fc7_b": bias(keys[13], 4096),
        # conv_score: 1x1, kaiming_normal(fan_out), zero bias
        "score_w": conv_w(keys[14], num_classes, 4096, 1),
        "score_b": jnp.zeros((num_classes,), jnp.float32),
        # up_32x: ConvTranspose2d bilinear init, no bias
        "up_w": init_upsampling(num_classes, num_classes, 64),
    }


def _w1x1(w_oi11):
    """1x1 conv weight (Cout, Cin, 1, 1) -> matmul weight (Cin, Cout)."""
    return jnp.transpose(w_oi11[:, :, 0, 0], (1, 0))


# ---------------------------------------------------------------------------
# FCN_32s.forward
# ---------------------------------------------------------------------------
def fcn32s_forward(x_nchw, params):
    original_shape = x_nchw.shape
    num_classes = params["score_w"].shape[0]
    N, Cin0, H, W = x_nchw.shape

    # NCHW -> channel-major "CM" layout (C, N*H*W), bf16 activations.
    act = jnp.transpose(x_nchw, (1, 0, 2, 3)).reshape(Cin0, N * H * W)
    act = act.astype(jnp.bfloat16)
    spatial = (N, H, W)

    # self.conv: layers[0..4]  (synthetic conv+ReLU backbone, /32 downsample)
    for (w, b) in params["backbone"]:
        act, spatial = conv2d_cm(act, spatial, w, b,
                                 stride=2, padding=1, relu=True)

    # Fused layers[5]+ReLU -> layers[6]+ReLU -> conv_score (Dropout2d = id).
    # Score channels are zero-padded to 128 lanes and carried through the
    # upsampling stage (never sliced on the hot path).
    cs_pad = _round_up(num_classes, 128)
    ws_pad = jnp.zeros((params["fc7_w"].shape[0], cs_pad), jnp.float32)
    ws_pad = ws_pad.at[:, :num_classes].set(_w1x1(params["score_w"]))
    bs_pad = jnp.zeros((cs_pad,), jnp.float32)
    bs_pad = bs_pad.at[:num_classes].set(params["score_b"])
    score = head_scores(act, spatial,
                        _w1x1(params["fc6_w"]), params["fc6_b"],
                        _w1x1(params["fc7_w"]), params["fc7_b"],
                        ws_pad, bs_pad)
    Ns, Hs, Ws = spatial
    score = score.reshape(Ns, Hs, Ws, cs_pad)

    # self.up_32x: ConvTranspose2d(k=64, stride=32, bias=False) -> NCHW f32
    out = upsample_32x(score, params["up_w"], stride=32)

    # Center crop to the original spatial size (reference semantics).
    if out.shape != original_shape:
        _, _, outh, outw = out.shape
        _, _, orih, oriw = original_shape
        hh, ww = (outh - orih) // 2, (outw - oriw) // 2
        out = out[:, :, hh:hh + orih, ww:ww + oriw]
    return out


# ---------------------------------------------------------------------------
# Pure-JAX f32 reference for the self-test.
# ---------------------------------------------------------------------------
def _reference_forward(x, params):
    def conv(h, w, b, stride, pad):
        y = jax.lax.conv_general_dilated(
            h, w, window_strides=(stride, stride),
            padding=((pad, pad), (pad, pad)),
            dimension_numbers=("NCHW", "OIHW", "NCHW"))
        return y + b.reshape(1, -1, 1, 1)

    h = x
    for (w, b) in params["backbone"]:
        h = jax.nn.relu(conv(h, w, b, 2, 1))
    h = jax.nn.relu(conv(h, params["fc6_w"], params["fc6_b"], 1, 0))
    h = jax.nn.relu(conv(h, params["fc7_w"], params["fc7_b"], 1, 0))
    score = conv(h, params["score_w"], params["score_b"], 1, 0)
    wt = params["up_w"]                                    # (Cin, Cout, 64, 64)
    out = jax.lax.conv_general_dilated(
        score, jnp.flip(wt, (2, 3)).transpose(1, 0, 2, 3),
        window_strides=(1, 1), padding=((63, 63), (63, 63)),
        lhs_dilation=(32, 32),
        dimension_numbers=("NCHW", "OIHW", "NCHW"))
    if out.shape != x.shape:
        _, _, oh, ow = out.shape
        _, _, ih, iw = x.shape
        a, b2 = (oh - ih) // 2, (ow - iw) // 2
        out = out[:, :, a:a + ih, b2:b2 + iw]
    return out


if __name__ == "__main__":
    N, Cin, H, W = 2, 3, 64, 64
    num_classes = 6

    x = jax.random.normal(jax.random.PRNGKey(0), (N, Cin, H, W), jnp.float32)
    params = make_params(jax.random.PRNGKey(1), num_classes)

    fwd = jax.jit(fcn32s_forward)
    out = jax.block_until_ready(fwd(x, params))

    assert out.shape == (N, num_classes, H, W), out.shape
    assert bool(jnp.all(jnp.isfinite(out)))

    # Validate against a pure-JAX f32 reference (tolerance for bf16 MXU path).
    ref = jax.block_until_ready(jax.jit(_reference_forward)(x, params))
    err = float(jnp.abs(out - ref).max() / (jnp.abs(ref).max() + 1e-6))
    assert err < 0.1, err

    print("KERNEL_OK")
</pallas_src>

<mosaic_0001>
module attributes {stable_mosaic.version = 11 : i64} {
  func.func @_matmul_bias_cm_kernel(%arg0: i32, %arg1: memref<8x32xbf16, #tpu.memory_space<vmem>>, %arg2: memref<32x1024xbf16, #tpu.memory_space<vmem>>, %arg3: memref<8x1xf32, #tpu.memory_space<vmem>>, %arg4: memref<8x1024xbf16, #tpu.memory_space<vmem>>) attributes {dimension_semantics = [#tpu.dimension_semantics<parallel>], iteration_bounds = array<i64: 2>, scalar_prefetch = 0 : i64, scratch_operands = 0 : i64, tpu.core_type = #tpu.core_type<tc>, window_params = [{pipeline_mode = #tpu.pipeline_mode<synchronous>, transform_indices = @transform_0, window_bounds = array<i64: 8, 32>}, {transform_indices = @transform_1, window_bounds = array<i64: 32, 1024>}, {pipeline_mode = #tpu.pipeline_mode<synchronous>, transform_indices = @transform_2, window_bounds = array<i64: 8, 1>}, {transform_indices = @transform_3, window_bounds = array<i64: 8, 1024>}]} {
    %c0 = arith.constant 0 : index
    %c0_0 = arith.constant 0 : index
    %0 = vector.load %arg1[%c0, %c0_0] : memref<8x32xbf16, #tpu.memory_space<vmem>>, vector<8x32xbf16>
    %c0_1 = arith.constant 0 : index
    %c0_2 = arith.constant 0 : index
    %1 = vector.load %arg2[%c0_1, %c0_2] : memref<32x1024xbf16, #tpu.memory_space<vmem>>, vector<32x1024xbf16>
    %cst = arith.constant dense<0.000000e+00> : vector<8x1024xf32>
    %2 = tpu.matmul %0, %1, %cst {dimension_numbers = #tpu.dot_dimension_numbers<[1], [0], [0], [1], [0, 0, 1, 1], [], []>} : vector<8x32xbf16>, vector<32x1024xbf16>, vector<8x1024xf32> -> vector<8x1024xf32>
    %c0_3 = arith.constant 0 : index
    %c0_4 = arith.constant 0 : index
    %3 = vector.load %arg3[%c0_3, %c0_4] : memref<8x1xf32, #tpu.memory_space<vmem>>, vector<8x1xf32>
    %4 = vector.broadcast %3 : vector<8x1xf32> to vector<8x1024xf32>
    %5 = arith.addf %2, %4 : vector<8x1024xf32>
    %cst_5 = arith.constant 0.000000e+00 : f32
    %6 = vector.broadcast %cst_5 : f32 to vector<8x1024xf32>
    %7 = arith.maximumf %5, %6 : vector<8x1024xf32>
    %8 = arith.truncf %7 : vector<8x1024xf32> to vector<8x1024xbf16>
    %c0_6 = arith.constant 0 : index
    %c0_7 = arith.constant 0 : index
    %9 = vector.load %arg4[%c0_6, %c0_7] : memref<8x1024xbf16, #tpu.memory_space<vmem>>, vector<8x1024xbf16>
    tpu.vector_store %arg4[%c0_6, %c0_7], %8 {strides = array<i32>} : memref<8x1024xbf16, #tpu.memory_space<vmem>>, vector<8x1024xbf16>,
    return
  }
  func.func @transform_0(%arg0: i32) -> (i32, i32) {
    %c0_i32 = arith.constant 0 : i32
    %c0_i32_0 = arith.constant 0 : i32
    %c0_i32_1 = arith.constant 0 : i32
    return %c0_i32, %c0_i32_0 : i32, i32
  }
  func.func @transform_1(%arg0: i32) -> (i32, i32) {
    %c0_i32 = arith.constant 0 : i32
    %c0_i32_0 = arith.constant 0 : i32
    return %c0_i32, %arg0 : i32, i32
  }
  func.func @transform_2(%arg0: i32) -> (i32, i32) {
    %c0_i32 = arith.constant 0 : i32
    %c0_i32_0 = arith.constant 0 : i32
    %c0_i32_1 = arith.constant 0 : i32
    return %c0_i32, %c0_i32_0 : i32, i32
  }
  func.func @transform_3(%arg0: i32) -> (i32, i32) {
    %c0_i32 = arith.constant 0 : i32
    %c0_i32_0 = arith.constant 0 : i32
    return %c0_i32, %arg0 : i32, i32
  }
}

module attributes {stable_mosaic.version = 11 : i64} {
  func.func @_matmul_bias_cm_kernel(%arg0: i32, %arg1: memref<8x72xbf16, #tpu.memory_space<vmem>>, %arg2: memref<72x256xbf16, #tpu.memory_space<vmem>>, %arg3: memref<8x1xf32, #tpu.memory_space<vmem>>, %arg4: memref<8x256xbf16, #tpu.memory_space<vmem>>) attributes {dimension_semantics = [#tpu.dimension_semantics<parallel>], iteration_bounds = array<i64: 2>, scalar_prefetch = 0 : i64, scratch_operands = 0 : i64, tpu.core_type = #tpu.core_type<tc>, window_params = [{pipeline_mode = #tpu.pipeline_mode<synchronous>, transform_indices = @transform_0, window_bounds = array<i64: 8, 72>}, {transform_indices = @transform_1, window_bounds = array<i64: 72, 256>}, {pipeline_mode = #tpu.pipeline_mode<synchronous>, transform_indices = @transform_2, window_bounds = array<i64: 8, 1>}, {transform_indices = @transform_3, window_bounds = array<i64: 8, 256>}]} {
    %c0 = arith.constant 0 : index
    %c0_0 = arith.constant 0 : index
    %0 = vector.load %arg1[%c0, %c0_0] : memref<8x72xbf16, #tpu.memory_space<vmem>>, vector<8x72xbf16>
    %c0_1 = arith.constant 0 : index
    %c0_2 = arith.constant 0 : index
    %1 = vector.load %arg2[%c0_1, %c0_2] : memref<72x256xbf16, #tpu.memory_space<vmem>>, vector<72x256xbf16>
    %cst = arith.constant dense<0.000000e+00> : vector<8x256xf32>
    %2 = tpu.matmul %0, %1, %cst {dimension_numbers = #tpu.dot_dimension_numbers<[1], [0], [0], [1], [0, 0, 1, 1], [], []>} : vector<8x72xbf16>, vector<72x256xbf16>, vector<8x256xf32> -> vector<8x256xf32>
    %c0_3 = arith.constant 0 : index
    %c0_4 = arith.constant 0 : index
    %3 = vector.load %arg3[%c0_3, %c0_4] : memref<8x1xf32, #tpu.memory_space<vmem>>, vector<8x1xf32>
    %4 = vector.broadcast %3 : vector<8x1xf32> to vector<8x256xf32>
    %5 = arith.addf %2, %4 : vector<8x256xf32>
    %cst_5 = arith.constant 0.000000e+00 : f32
    %6 = vector.broadcast %cst_5 : f32 to vector<8x256xf32>
    %7 = arith.maximumf %5, %6 : vector<8x256xf32>
    %8 = arith.truncf %7 : vector<8x256xf32> to vector<8x256xbf16>
    %c0_6 = arith.constant 0 : index
    %c0_7 = arith.constant 0 : index
    %9 = vector.load %arg4[%c0_6, %c0_7] : memref<8x256xbf16, #tpu.memory_space<vmem>>, vector<8x256xbf16>
    tpu.vector_store %arg4[%c0_6, %c0_7], %8 {strides = array<i32>} : memref<8x256xbf16, #tpu.memory_space<vmem>>, vector<8x256xbf16>,
    return
  }
  func.func @transform_0(%arg0: i32) -> (i32, i32) {
    %c0_i32 = arith.constant 0 : i32
    %c0_i32_0 = arith.constant 0 : i32
    %c0_i32_1 = arith.constant 0 : i32
    return %c0_i32, %c0_i32_0 : i32, i32
  }
  func.func @transform_1(%arg0: i32) -> (i32, i32) {
    %c0_i32 = arith.constant 0 : i32
    %c0_i32_0 = arith.constant 0 : i32
    return %c0_i32, %arg0 : i32, i32
  }
  func.func @transform_2(%arg0: i32) -> (i32, i32) {
    %c0_i32 = arith.constant 0 : i32
    %c0_i32_0 = arith.constant 0 : i32
    %c0_i32_1 = arith.constant 0 : i32
    return %c0_i32, %c0_i32_0 : i32, i32
  }
  func.func @transform_3(%arg0: i32) -> (i32, i32) {
    %c0_i32 = arith.constant 0 : i32
    %c0_i32_0 = arith.constant 0 : i32
    return %c0_i32, %arg0 : i32, i32
  }
}

module attributes {stable_mosaic.version = 11 : i64} {
  func.func @_matmul_bias_cm_kernel(%arg0: i32, %arg1: memref<16x72xbf16, #tpu.memory_space<vmem>>, %arg2: memref<72x128xbf16, #tpu.memory_space<vmem>>, %arg3: memref<16x1xf32, #tpu.memory_space<vmem>>, %arg4: memref<16x128xbf16, #tpu.memory_space<vmem>>) attributes {dimension_semantics = [#tpu.dimension_semantics<parallel>], iteration_bounds = array<i64: 1>, scalar_prefetch = 0 : i64, scratch_operands = 0 : i64, tpu.core_type = #tpu.core_type<tc>, window_params = [{pipeline_mode = #tpu.pipeline_mode<synchronous>, transform_indices = @transform_0, window_bounds = array<i64: 16, 72>}, {transform_indices = @transform_1, window_bounds = array<i64: 72, 128>}, {pipeline_mode = #tpu.pipeline_mode<synchronous>, transform_indices = @transform_2, window_bounds = array<i64: 16, 1>}, {transform_indices = @transform_3, window_bounds = array<i64: 16, 128>}]} {
    %c0 = arith.constant 0 : index
    %c0_0 = arith.constant 0 : index
    %0 = vector.load %arg1[%c0, %c0_0] : memref<16x72xbf16, #tpu.memory_space<vmem>>, vector<16x72xbf16>
    %c0_1 = arith.constant 0 : index
    %c0_2 = arith.constant 0 : index
    %1 = vector.load %arg2[%c0_1, %c0_2] : memref<72x128xbf16, #tpu.memory_space<vmem>>, vector<72x128xbf16>
    %cst = arith.constant dense<0.000000e+00> : vector<16x128xf32>
    %2 = tpu.matmul %0, %1, %cst {dimension_numbers = #tpu.dot_dimension_numbers<[1], [0], [0], [1], [0, 0, 1, 1], [], []>} : vector<16x72xbf16>, vector<72x128xbf16>, vector<16x128xf32> -> vector<16x128xf32>
    %c0_3 = arith.constant 0 : index
    %c0_4 = arith.constant 0 : index
    %3 = vector.load %arg3[%c0_3, %c0_4] : memref<16x1xf32, #tpu.memory_space<vmem>>, vector<16x1xf32>
    %4 = vector.broadcast %3 : vector<16x1xf32> to vector<16x128xf32>
    %5 = arith.addf %2, %4 : vector<16x128xf32>
    %cst_5 = arith.constant 0.000000e+00 : f32
    %6 = vector.broadcast %cst_5 : f32 to vector<16x128xf32>
    %7 = arith.maximumf %5, %6 : vector<16x128xf32>
    %8 = arith.truncf %7 : vector<16x128xf32> to vector<16x128xbf16>
    %c0_6 = arith.constant 0 : index
    %c0_7 = arith.constant 0 : index
    %9 = vector.load %arg4[%c0_6, %c0_7] : memref<16x128xbf16, #tpu.memory_space<vmem>>, vector<16x128xbf16>
    tpu.vector_store %arg4[%c0_6, %c0_7], %8 {strides = array<i32>} : memref<16x128xbf16, #tpu.memory_space<vmem>>, vector<16x128xbf16>,
    return
  }
  func.func @transform_0(%arg0: i32) -> (i32, i32) {
    %c0_i32 = arith.constant 0 : i32
    %c0_i32_0 = arith.constant 0 : i32
    %c0_i32_1 = arith.constant 0 : i32
    return %c0_i32, %c0_i32_0 : i32, i32
  }
  func.func @transform_1(%arg0: i32) -> (i32, i32) {
    %c0_i32 = arith.constant 0 : i32
    %c0_i32_0 = arith.constant 0 : i32
    return %c0_i32, %arg0 : i32, i32
  }
  func.func @transform_2(%arg0: i32) -> (i32, i32) {
    %c0_i32 = arith.constant 0 : i32
    %c0_i32_0 = arith.constant 0 : i32
    %c0_i32_1 = arith.constant 0 : i32
    return %c0_i32, %c0_i32_0 : i32, i32
  }
  func.func @transform_3(%arg0: i32) -> (i32, i32) {
    %c0_i32 = arith.constant 0 : i32
    %c0_i32_0 = arith.constant 0 : i32
    return %c0_i32, %arg0 : i32, i32
  }
}

module attributes {stable_mosaic.version = 11 : i64} {
  func.func @_matmul_bias_cm_kernel(%arg0: i32, %arg1: memref<16x144xbf16, #tpu.memory_space<vmem>>, %arg2: memref<144x128xbf16, #tpu.memory_space<vmem>>, %arg3: memref<16x1xf32, #tpu.memory_space<vmem>>, %arg4: memref<16x128xbf16, #tpu.memory_space<vmem>>) attributes {dimension_semantics = [#tpu.dimension_semantics<parallel>], iteration_bounds = array<i64: 1>, scalar_prefetch = 0 : i64, scratch_operands = 0 : i64, tpu.core_type = #tpu.core_type<tc>, window_params = [{pipeline_mode = #tpu.pipeline_mode<synchronous>, transform_indices = @transform_0, window_bounds = array<i64: 16, 144>}, {transform_indices = @transform_1, window_bounds = array<i64: 144, 128>}, {pipeline_mode = #tpu.pipeline_mode<synchronous>, transform_indices = @transform_2, window_bounds = array<i64: 16, 1>}, {transform_indices = @transform_3, window_bounds = array<i64: 16, 128>}]} {
    %c0 = arith.constant 0 : index
    %c0_0 = arith.constant 0 : index
    %0 = vector.load %arg1[%c0, %c0_0] : memref<16x144xbf16, #tpu.memory_space<vmem>>, vector<16x144xbf16>
    %c0_1 = arith.constant 0 : index
    %c0_2 = arith.constant 0 : index
    %1 = vector.load %arg2[%c0_1, %c0_2] : memref<144x128xbf16, #tpu.memory_space<vmem>>, vector<144x128xbf16>
    %cst = arith.constant dense<0.000000e+00> : vector<16x128xf32>
    %2 = tpu.matmul %0, %1, %cst {dimension_numbers = #tpu.dot_dimension_numbers<[1], [0], [0], [1], [0, 0, 1, 1], [], []>} : vector<16x144xbf16>, vector<144x128xbf16>, vector<16x128xf32> -> vector<16x128xf32>
    %c0_3 = arith.constant 0 : index
    %c0_4 = arith.constant 0 : index
    %3 = vector.load %arg3[%c0_3, %c0_4] : memref<16x1xf32, #tpu.memory_space<vmem>>, vector<16x1xf32>
    %4 = vector.broadcast %3 : vector<16x1xf32> to vector<16x128xf32>
    %5 = arith.addf %2, %4 : vector<16x128xf32>
    %cst_5 = arith.constant 0.000000e+00 : f32
    %6 = vector.broadcast %cst_5 : f32 to vector<16x128xf32>
    %7 = arith.maximumf %5, %6 : vector<16x128xf32>
    %8 = arith.truncf %7 : vector<16x128xf32> to vector<16x128xbf16>
    %c0_6 = arith.constant 0 : index
    %c0_7 = arith.constant 0 : index
    %9 = vector.load %arg4[%c0_6, %c0_7] : memref<16x128xbf16, #tpu.memory_space<vmem>>, vector<16x128xbf16>
    tpu.vector_store %arg4[%c0_6, %c0_7], %8 {strides = array<i32>} : memref<16x128xbf16, #tpu.memory_space<vmem>>, vector<16x128xbf16>,
    return
  }
  func.func @transform_0(%arg0: i32) -> (i32, i32) {
    %c0_i32 = arith.constant 0 : i32
    %c0_i32_0 = arith.constant 0 : i32
    %c0_i32_1 = arith.constant 0 : i32
    return %c0_i32, %c0_i32_0 : i32, i32
  }
  func.func @transform_1(%arg0: i32) -> (i32, i32) {
    %c0_i32 = arith.constant 0 : i32
    %c0_i32_0 = arith.constant 0 : i32
    return %c0_i32, %arg0 : i32, i32
  }
  func.func @transform_2(%arg0: i32) -> (i32, i32) {
    %c0_i32 = arith.constant 0 : i32
    %c0_i32_0 = arith.constant 0 : i32
    %c0_i32_1 = arith.constant 0 : i32
    return %c0_i32, %c0_i32_0 : i32, i32
  }
  func.func @transform_3(%arg0: i32) -> (i32, i32) {
    %c0_i32 = arith.constant 0 : i32
    %c0_i32_0 = arith.constant 0 : i32
    return %c0_i32, %arg0 : i32, i32
  }
}

module attributes {stable_mosaic.version = 11 : i64} {
  func.func @_matmul_bias_cm_kernel(%arg0: i32, %arg1: memref<32x144xbf16, #tpu.memory_space<vmem>>, %arg2: memref<144x128xbf16, #tpu.memory_space<vmem>>, %arg3: memref<32x1xf32, #tpu.memory_space<vmem>>, %arg4: memref<32x128xbf16, #tpu.memory_space<vmem>>) attributes {dimension_semantics = [#tpu.dimension_semantics<parallel>], iteration_bounds = array<i64: 1>, scalar_prefetch = 0 : i64, scratch_operands = 0 : i64, tpu.core_type = #tpu.core_type<tc>, window_params = [{pipeline_mode = #tpu.pipeline_mode<synchronous>, transform_indices = @transform_0, window_bounds = array<i64: 32, 144>}, {transform_indices = @transform_1, window_bounds = array<i64: 144, 128>}, {pipeline_mode = #tpu.pipeline_mode<synchronous>, transform_indices = @transform_2, window_bounds = array<i64: 32, 1>}, {transform_indices = @transform_3, window_bounds = array<i64: 32, 128>}]} {
    %c0 = arith.constant 0 : index
    %c0_0 = arith.constant 0 : index
    %0 = vector.load %arg1[%c0, %c0_0] : memref<32x144xbf16, #tpu.memory_space<vmem>>, vector<32x144xbf16>
    %c0_1 = arith.constant 0 : index
    %c0_2 = arith.constant 0 : index
    %1 = vector.load %arg2[%c0_1, %c0_2] : memref<144x128xbf16, #tpu.memory_space<vmem>>, vector<144x128xbf16>
    %cst = arith.constant dense<0.000000e+00> : vector<32x128xf32>
    %2 = tpu.matmul %0, %1, %cst {dimension_numbers = #tpu.dot_dimension_numbers<[1], [0], [0], [1], [0, 0, 1, 1], [], []>} : vector<32x144xbf16>, vector<144x128xbf16>, vector<32x128xf32> -> vector<32x128xf32>
    %c0_3 = arith.constant 0 : index
    %c0_4 = arith.constant 0 : index
    %3 = vector.load %arg3[%c0_3, %c0_4] : memref<32x1xf32, #tpu.memory_space<vmem>>, vector<32x1xf32>
    %4 = vector.broadcast %3 : vector<32x1xf32> to vector<32x128xf32>
    %5 = arith.addf %2, %4 : vector<32x128xf32>
    %cst_5 = arith.constant 0.000000e+00 : f32
    %6 = vector.broadcast %cst_5 : f32 to vector<32x128xf32>
    %7 = arith.maximumf %5, %6 : vector<32x128xf32>
    %8 = arith.truncf %7 : vector<32x128xf32> to vector<32x128xbf16>
    %c0_6 = arith.constant 0 : index
    %c0_7 = arith.constant 0 : index
    %9 = vector.load %arg4[%c0_6, %c0_7] : memref<32x128xbf16, #tpu.memory_space<vmem>>, vector<32x128xbf16>
    tpu.vector_store %arg4[%c0_6, %c0_7], %8 {strides = array<i32>} : memref<32x128xbf16, #tpu.memory_space<vmem>>, vector<32x128xbf16>,
    return
  }
  func.func @transform_0(%arg0: i32) -> (i32, i32) {
    %c0_i32 = arith.constant 0 : i32
    %c0_i32_0 = arith.constant 0 : i32
    %c0_i32_1 = arith.constant 0 : i32
    return %c0_i32, %c0_i32_0 : i32, i32
  }
  func.func @transform_1(%arg0: i32) -> (i32, i32) {
    %c0_i32 = arith.constant 0 : i32
    %c0_i32_0 = arith.constant 0 : i32
    return %c0_i32, %arg0 : i32, i32
  }
  func.func @transform_2(%arg0: i32) -> (i32, i32) {
    %c0_i32 = arith.constant 0 : i32
    %c0_i32_0 = arith.constant 0 : i32
    %c0_i32_1 = arith.constant 0 : i32
    return %c0_i32, %c0_i32_0 : i32, i32
  }
  func.func @transform_3(%arg0: i32) -> (i32, i32) {
    %c0_i32 = arith.constant 0 : i32
    %c0_i32_0 = arith.constant 0 : i32
    return %c0_i32, %arg0 : i32, i32
  }
}

module attributes {stable_mosaic.version = 11 : i64} {
  func.func @_head_kernel(%arg0: i32, %arg1: i32, %arg2: memref<8x32xbf16, #tpu.memory_space<vmem>>, %arg3: memref<32x64xbf16, #tpu.memory_space<vmem>>, %arg4: memref<1x64xf32, #tpu.memory_space<vmem>>, %arg5: memref<64x512xbf16, #tpu.memory_space<vmem>>, %arg6: memref<1x512xf32, #tpu.memory_space<vmem>>, %arg7: memref<512x128xbf16, #tpu.memory_space<vmem>>, %arg8: memref<1x128xf32, #tpu.memory_space<vmem>>, %arg9: memref<8x128xbf16, #tpu.memory_space<vmem>>, %arg10: memref<8x64xbf16, #tpu.memory_space<vmem>>, %arg11: memref<8x128xf32, #tpu.memory_space<vmem>>) attributes {dimension_semantics = [#tpu.dimension_semantics<parallel>, #tpu.dimension_semantics<arbitrary>], iteration_bounds = array<i64: 1, 8>, scalar_prefetch = 0 : i64, scratch_operands = 2 : i64, tpu.core_type = #tpu.core_type<tc>, window_params = [{transform_indices = @transform_0, window_bounds = array<i64: 8, 32>}, {pipeline_mode = #tpu.pipeline_mode<synchronous>, transform_indices = @transform_1, window_bounds = array<i64: 32, 64>}, {pipeline_mode = #tpu.pipeline_mode<synchronous>, transform_indices = @transform_2, window_bounds = array<i64: 1, 64>}, {transform_indices = @transform_3, window_bounds = array<i64: 64, 512>}, {transform_indices = @transform_4, window_bounds = array<i64: 1, 512>}, {transform_indices = @transform_5, window_bounds = array<i64: 512, 128>}, {pipeline_mode = #tpu.pipeline_mode<synchronous>, transform_indices = @transform_6, window_bounds = array<i64: 1, 128>}, {transform_indices = @transform_7, window_bounds = array<i64: 8, 128>}]} {
    %c0_i32 = arith.constant 0 : i32
    %0 = arith.cmpi eq, %arg1, %c0_i32 : i32
    %1 = arith.extui %0 : i1 to i32
    %c0_i32_0 = arith.constant 0 : i32
    %2 = arith.cmpi ne, %1, %c0_i32_0 : i32
    scf.if %2 {
      %c0_15 = arith.constant 0 : index
      %c0_16 = arith.constant 0 : index
      %20 = vector.load %arg2[%c0_15, %c0_16] : memref<8x32xbf16, #tpu.memory_space<vmem>>, vector<8x32xbf16>
      %c0_17 = arith.constant 0 : index
      %c0_18 = arith.constant 0 : index
      %21 = vector.load %arg3[%c0_17, %c0_18] : memref<32x64xbf16, #tpu.memory_space<vmem>>, vector<32x64xbf16>
      %cst_19 = arith.constant dense<0.000000e+00> : vector<8x64xf32>
      %22 = tpu.matmul %20, %21, %cst_19 {dimension_numbers = #tpu.dot_dimension_numbers<[1], [0], [0], [1], [0, 0, 1, 1], [], []>} : vector<8x32xbf16>, vector<32x64xbf16>, vector<8x64xf32> -> vector<8x64xf32>
      %c0_20 = arith.constant 0 : index
      %c0_21 = arith.constant 0 : index
      %23 = vector.load %arg4[%c0_20, %c0_21] : memref<1x64xf32, #tpu.memory_space<vmem>>, vector<1x64xf32>
      %24 = vector.broadcast %23 : vector<1x64xf32> to vector<8x64xf32>
      %25 = arith.addf %22, %24 : vector<8x64xf32>
      %cst_22 = arith.constant 0.000000e+00 : f32
      %26 = vector.broadcast %cst_22 : f32 to vector<8x64xf32>
      %27 = arith.maximumf %25, %26 : vector<8x64xf32>
      %28 = arith.truncf %27 : vector<8x64xf32> to vector<8x64xbf16>
      %c0_23 = arith.constant 0 : index
      %c0_24 = arith.constant 0 : index
      %29 = vector.load %arg10[%c0_23, %c0_24] : memref<8x64xbf16, #tpu.memory_space<vmem>>, vector<8x64xbf16>
      tpu.vector_store %arg10[%c0_23, %c0_24], %28 {strides = array<i32>} : memref<8x64xbf16, #tpu.memory_space<vmem>>, vector<8x64xbf16>,
      %cst_25 = arith.constant 0.000000e+00 : f32
      %30 = vector.broadcast %cst_25 : f32 to vector<8x128xf32>
      %c0_26 = arith.constant 0 : index
      %c0_27 = arith.constant 0 : index
      %31 = vector.load %arg11[%c0_26, %c0_27] : memref<8x128xf32, #tpu.memory_space<vmem>>, vector<8x128xf32>
      tpu.vector_store %arg11[%c0_26, %c0_27], %30 {strides = array<i32>} : memref<8x128xf32, #tpu.memory_space<vmem>>, vector<8x128xf32>,
    } else {
    }
    %c0 = arith.constant 0 : index
    %c0_1 = arith.constant 0 : index
    %3 = vector.load %arg10[%c0, %c0_1] : memref<8x64xbf16, #tpu.memory_space<vmem>>, vector<8x64xbf16>
    %c0_2 = arith.constant 0 : index
    %c0_3 = arith.constant 0 : index
    %4 = vector.load %arg5[%c0_2, %c0_3] : memref<64x512xbf16, #tpu.memory_space<vmem>>, vector<64x512xbf16>
    %cst = arith.constant dense<0.000000e+00> : vector<8x512xf32>
    %5 = tpu.matmul %3, %4, %cst {dimension_numbers = #tpu.dot_dimension_numbers<[1], [0], [0], [1], [0, 0, 1, 1], [], []>} : vector<8x64xbf16>, vector<64x512xbf16>, vector<8x512xf32> -> vector<8x512xf32>
    %c0_4 = arith.constant 0 : index
    %c0_5 = arith.constant 0 : index
    %6 = vector.load %arg6[%c0_4, %c0_5] : memref<1x512xf32, #tpu.memory_space<vmem>>, vector<1x512xf32>
    %7 = vector.broadcast %6 : vector<1x512xf32> to vector<8x512xf32>
    %8 = arith.addf %5, %7 : vector<8x512xf32>
    %cst_6 = arith.constant 0.000000e+00 : f32
    %9 = vector.broadcast %cst_6 : f32 to vector<8x512xf32>
    %10 = arith.maximumf %8, %9 : vector<8x512xf32>
    %c0_7 = arith.constant 0 : index
    %c0_8 = arith.constant 0 : index
    %11 = vector.load %arg11[%c0_7, %c0_8] : memref<8x128xf32, #tpu.memory_space<vmem>>, vector<8x128xf32>
    %12 = arith.truncf %10 : vector<8x512xf32> to vector<8x512xbf16>
    %c0_9 = arith.constant 0 : index
    %c0_10 = arith.constant 0 : index
    %13 = vector.load %arg7[%c0_9, %c0_10] : memref<512x128xbf16, #tpu.memory_space<vmem>>, vector<512x128xbf16>
    %cst_11 = arith.constant dense<0.000000e+00> : vector<8x128xf32>
    %14 = tpu.matmul %12, %13, %cst_11 {dimension_numbers = #tpu.dot_dimension_numbers<[1], [0], [0], [1], [0, 0, 1, 1], [], []>} : vector<8x512xbf16>, vector<512x128xbf16>, vector<8x128xf32> -> vector<8x128xf32>
    %15 = arith.addf %11, %14 : vector<8x128xf32>
    %c0_12 = arith.constant 0 : index
    %c0_13 = arith.constant 0 : index
    %16 = vector.load %arg11[%c0_12, %c0_13] : memref<8x128xf32, #tpu.memory_space<vmem>>, vector<8x128xf32>
    tpu.vector_store %arg11[%c0_12, %c0_13], %15 {strides = array<i32>} : memref<8x128xf32, #tpu.memory_space<vmem>>, vector<8x128xf32>,
    %c7_i32 = arith.constant 7 : i32
    %17 = arith.cmpi eq, %arg1, %c7_i32 : i32
    %18 = arith.extui %17 : i1 to i32
    %c0_i32_14 = arith.constant 0 : i32
    %19 = arith.cmpi ne, %18, %c0_i32_14 : i32
    scf.if %19 {
      %c0_15 = arith.constant 0 : index
      %c0_16 = arith.constant 0 : index
      %20 = vector.load %arg11[%c0_15, %c0_16] : memref<8x128xf32, #tpu.memory_space<vmem>>, vector<8x128xf32>
      %c0_17 = arith.constant 0 : index
      %c0_18 = arith.constant 0 : index
      %21 = vector.load %arg8[%c0_17, %c0_18] : memref<1x128xf32, #tpu.memory_space<vmem>>, vector<1x128xf32>
      %22 = vector.broadcast %21 : vector<1x128xf32> to vector<8x128xf32>
      %23 = arith.addf %20, %22 : vector<8x128xf32>
      %24 = arith.truncf %23 : vector<8x128xf32> to vector<8x128xbf16>
      %c0_19 = arith.constant 0 : index
      %c0_20 = arith.constant 0 : index
      %25 = vector.load %arg9[%c0_19, %c0_20] : memref<8x128xbf16, #tpu.memory_space<vmem>>, vector<8x128xbf16>
      tpu.vector_store %arg9[%c0_19, %c0_20], %24 {strides = array<i32>} : memref<8x128xbf16, #tpu.memory_space<vmem>>, vector<8x128xbf16>,
    } else {
    }
    return
  }
  func.func @transform_0(%arg0: i32, %arg1: i32) -> (i32, i32) {
    %c0_i32 = arith.constant 0 : i32
    %c0_i32_0 = arith.constant 0 : i32
    return %arg0, %c0_i32 : i32, i32
  }
  func.func @transform_1(%arg0: i32, %arg1: i32) -> (i32, i32) {
    %c0_i32 = arith.constant 0 : i32
    %c0_i32_0 = arith.constant 0 : i32
    %c0_i32_1 = arith.constant 0 : i32
    return %c0_i32, %c0_i32_0 : i32, i32
  }
  func.func @transform_2(%arg0: i32, %arg1: i32) -> (i32, i32) {
    %c0_i32 = arith.constant 0 : i32
    %c0_i32_0 = arith.constant 0 : i32
    %c0_i32_1 = arith.constant 0 : i32
    return %c0_i32, %c0_i32_0 : i32, i32
  }
  func.func @transform_3(%arg0: i32, %arg1: i32) -> (i32, i32) {
    %c0_i32 = arith.constant 0 : i32
    %c0_i32_0 = arith.constant 0 : i32
    return %c0_i32, %arg1 : i32, i32
  }
  func.func @transform_4(%arg0: i32, %arg1: i32) -> (i32, i32) {
    %c0_i32 = arith.constant 0 : i32
    %c0_i32_0 = arith.constant 0 : i32
    return %c0_i32, %arg1 : i32, i32
  }
  func.func @transform_5(%arg0: i32, %arg1: i32) -> (i32, i32) {
    %c0_i32 = arith.constant 0 : i32
    %c0_i32_0 = arith.constant 0 : i32
    return %arg1, %c0_i32 : i32, i32
  }
  func.func @transform_6(%arg0: i32, %arg1: i32) -> (i32, i32) {
    %c0_i32 = arith.constant 0 : i32
    %c0_i32_0 = arith.constant 0 : i32
    %c0_i32_1 = arith.constant 0 : i32
    return %c0_i32, %c0_i32_0 : i32, i32
  }
  func.func @transform_7(%arg0: i32, %arg1: i32) -> (i32, i32) {
    %c0_i32 = arith.constant 0 : i32
    %c0_i32_0 = arith.constant 0 : i32
    return %arg0, %c0_i32 : i32, i32
  }
}

module attributes {stable_mosaic.version = 11 : i64} {
  func.func @_deconv_kernel(%arg0: i32, %arg1: i32, %arg2: memref<24x512xbf16, #tpu.memory_space<vmem>>, %arg3: memref<512x1024xbf16, #tpu.memory_space<vmem>>, %arg4: memref<24x1024xf32, #tpu.memory_space<vmem>>) attributes {dimension_semantics = [#tpu.dimension_semantics<parallel>, #tpu.dimension_semantics<parallel>], iteration_bounds = array<i64: 1, 6>, scalar_prefetch = 0 : i64, scratch_operands = 0 : i64, tpu.core_type = #tpu.core_type<tc>, window_params = [{transform_indices = @transform_0, window_bounds = array<i64: 24, 512>}, {transform_indices = @transform_1, window_bounds = array<i64: 512, 1024>}, {transform_indices = @transform_2, window_bounds = array<i64: 24, 1024>}]} {
    %c0 = arith.constant 0 : index
    %c0_0 = arith.constant 0 : index
    %0 = vector.load %arg2[%c0, %c0_0] : memref<24x512xbf16, #tpu.memory_space<vmem>>, vector<24x512xbf16>
    %c0_1 = arith.constant 0 : index
    %c0_2 = arith.constant 0 : index
    %1 = vector.load %arg3[%c0_1, %c0_2] : memref<512x1024xbf16, #tpu.memory_space<vmem>>, vector<512x1024xbf16>
    %cst = arith.constant dense<0.000000e+00> : vector<24x1024xf32>
    %2 = tpu.matmul %0, %1, %cst {dimension_numbers = #tpu.dot_dimension_numbers<[1], [0], [0], [1], [0, 0, 1, 1], [], []>} : vector<24x512xbf16>, vector<512x1024xbf16>, vector<24x1024xf32> -> vector<24x1024xf32>
    %c0_3 = arith.constant 0 : index
    %c0_4 = arith.constant 0 : index
    %3 = vector.load %arg4[%c0_3, %c0_4] : memref<24x1024xf32, #tpu.memory_space<vmem>>, vector<24x1024xf32>
    tpu.vector_store %arg4[%c0_3, %c0_4], %2 {strides = array<i32>} : memref<24x1024xf32, #tpu.memory_space<vmem>>, vector<24x1024xf32>,
    return
  }
  func.func @transform_0(%arg0: i32, %arg1: i32) -> (i32, i32) {
    %c0_i32 = arith.constant 0 : i32
    %c0_i32_0 = arith.constant 0 : i32
    return %arg0, %c0_i32 : i32, i32
  }
  func.func @transform_1(%arg0: i32, %arg1: i32) -> (i32, i32) {
    %c0_i32 = arith.constant 0 : i32
    %c0_i32_0 = arith.constant 0 : i32
    return %c0_i32, %arg1 : i32, i32
  }
  func.func @transform_2(%arg0: i32, %arg1: i32) -> (i32, i32) {
    %c0_i32 = arith.constant 0 : i32
    return %arg0, %arg1 : i32, i32
  }
}

</mosaic_0001>

<bundles_post_ra>
// kernel: fcn32s_forward.7
= control target key start
LH: loop header
LB: loop body
LE: loop exit
PB: predicated region body
PF: predicated region fallthrough
CT: control target
= control target key end

     0   :  { %s686_s12 = smov 0   ;;  %s688_s13 = smov 0   ;;  %s810_s0 = inlined_call_operand.vmem [shape: bf16[8,32], index: 0, kind: input, shape index: {}]   ;;  %s811_s1 = inlined_call_operand.vmem [shape: bf16[32,2048], index: 1, kind: input, shape index: {}]   ;;  %s812_s2 = inlined_call_operand.vmem [shape: f32[8,1], index: 2, kind: input, shape index: {}]   ;;  %s813_s3 = inlined_call_operand.vmem [shape: bf16[8,2048], index: 3, kind: output, shape index: {}]  }
   0x1   :  { %s690_s14 = smov 0  }
   0x2 LB: > { %s513_s15 = sadd.s32 4294967295, %s663_s14   ;;  %s703_s16 = sadd.s32 1, %s663_s14   ;;  %s663_s14 = sphi %s690_s14, %s816_s14   ;;  %s659_s13 = sphi %s688_s13, %s815_s13   ;;  %s655_s12 = sphi %s686_s12, %s814_s12  }
   0x3   : > { %s38_s17 = ssub.s32 %s663_s14, %s703_s16  ;;  %s41_s18 = sadd.s32 1, %s659_s13 }
   0x4   : > { %p39_p0 = scmp.eq.s32.totalorder %s38_s17, 0  ;;  %p48_p1 = scmp.ne.s32.totalorder %s659_s13, %s655_s12 }
   0x5   : > { %p49_p2 = scmp.eq.s32.totalorder %s663_s14, 0  ;;  %p516_p4 = scmp.ge.s32.totalorder %s663_s14, 2 }
   0x6   : > { %s712_s19 = scalar_select %p39_p0, %s659_s13, %s41_s18  }
   0x7   : > { %p50_p3 = por %p49_p2, %p48_p1  ;;  %127 = sbr.rel (%p516_p4) target bundleno = 32 (0x20), region = 24 }
   0xc   : > { %130 = sbr.rel (!%p50_p3) target bundleno = 32 (0x20), region = 28  ;;  %s132_s20 = sand.u32 (%p50_p3), 1, %s659_s13  }
   0xd   : > { %s598_s21 = sshll.u32 (%p50_p3), %s663_s14, 5  ;;  %s517_s22 = sshll.u32 (%p50_p3), %s132_s20, 7 }
   0xe   : > { %s720_s25 = scalar_lea.vmem (%p50_p3), %s811_s1, %s598_s21  ;;  %s134_s26 = scalar_lea.vmem (%p50_p3), [#allocation2], %s517_s22 }
   0xf   : > { %v150_v0 = vld [vmem:[%s720_s25] sm:$0xff] (%p50_p3)  ;;  %v152_v1 = vld [vmem:[%s720_s25 + $0x8] sm:$0xff] (%p50_p3)  ;;  %v154_v2 = vld [vmem:[%s720_s25 + $0x10] sm:$0xff] (%p50_p3) }
  0x10   : > { %151 = vst [vmem:[%s134_s26] sm:$0xff] (%p50_p3), %v150_v0  ;;  %v156_v3 = vld [vmem:[%s720_s25 + $0x18] sm:$0xff] (%p50_p3)  ;;  %v158_v4 = vld [vmem:[%s720_s25 + $0x40] sm:$0xff] (%p50_p3)  ;;  %v160_v5 = vld [vmem:[%s720_s25 + $0x48] sm:$0xff] (%p50_p3) }
  0x11   : > { %153 = vst [vmem:[%s134_s26 + $0x8] sm:$0xff] %v152_v1  ;;  %v162_v6 = vld [vmem:[%s720_s25 + $0x50] sm:$0xff]  ;;  %v164_v7 = vld [vmem:[%s720_s25 + $0x58] sm:$0xff]  ;;  %v166_v8 = vld [vmem:[%s720_s25 + $0x80] sm:$0xff] }
  0x12   : > { %155 = vst [vmem:[%s134_s26 + $0x10] sm:$0xff] %v154_v2  ;;  %v168_v9 = vld [vmem:[%s720_s25 + $0x88] sm:$0xff]  ;;  %v170_v10 = vld [vmem:[%s720_s25 + $0x90] sm:$0xff]  ;;  %v172_v11 = vld [vmem:[%s720_s25 + $0x98] sm:$0xff] }
  0x13   : > { %157 = vst [vmem:[%s134_s26 + $0x18] sm:$0xff] %v156_v3  ;;  %v174_v12 = vld [vmem:[%s720_s25 + $0xc0] sm:$0xff]  ;;  %v176_v13 = vld [vmem:[%s720_s25 + $0xc8] sm:$0xff]  ;;  %v178_v14 = vld [vmem:[%s720_s25 + $0xd0] sm:$0xff] }
  0x14   : > { %159 = vst [vmem:[%s134_s26 + $0x20] sm:$0xff] %v158_v4  ;;  %v180_v15 = vld [vmem:[%s720_s25 + $0xd8] sm:$0xff] }
  0x15   : > { %161 = vst [vmem:[%s134_s26 + $0x28] sm:$0xff] %v160_v5 }
  0x16   : > { %163 = vst [vmem:[%s134_s26 + $0x30] sm:$0xff] %v162_v6 }
  0x17   : > { %165 = vst [vmem:[%s134_s26 + $0x38] sm:$0xff] %v164_v7 }
  0x18   : > { %167 = vst [vmem:[%s134_s26 + $0x40] sm:$0xff] %v166_v8 }
  0x19   : > { %169 = vst [vmem:[%s134_s26 + $0x48] sm:$0xff] %v168_v9 }
  0x1a   : > { %171 = vst [vmem:[%s134_s26 + $0x50] sm:$0xff] %v170_v10 }
  0x1b   : > { %173 = vst [vmem:[%s134_s26 + $0x58] sm:$0xff] %v172_v11 }
  0x1c   : > { %175 = vst [vmem:[%s134_s26 + $0x60] sm:$0xff] %v174_v12 }
  0x1d   : > { %177 = vst [vmem:[%s134_s26 + $0x68] sm:$0xff] %v176_v13 }
  0x1e   : > { %179 = vst [vmem:[%s134_s26 + $0x70] sm:$0xff] %v178_v14 }
  0x1f   : > { %181 = vst [vmem:[%s134_s26 + $0x78] sm:$0xff] %v180_v15 }
  0x20 PF: > { %p520_p5 = scmp.ge.s32.totalorder %s663_s14, 1  ;;  %p186_p6 = scmp.lt.s32.totalorder %s663_s14, 3 }
  0x22   : > { %p187_p7 = pnand %p520_p5, %p186_p6 }
  0x23   : > { %s193_s27 = sand.u32 (!%p187_p7), 1, %s655_s12   ;;  %s522_s7 = sshll.u32 (!%p187_p7), %s513_s15, 3 }
  0x24   : > { %190 = sbr.rel (%p187_p7) target bundleno = 210 (0xd2), region = 51  ;;  %s521_s30 = sshll.u32 (!%p187_p7), %s193_s27, 7 }
  0x25   : > { %s744_s4 = scalar_lea.vmem (!%p187_p7), [#allocation2], %s521_s30  ;;  %p218_p8 = scmp.lt.s32.totalorder (!%p187_p7), %s522_s7, 15 }
  0x29   : > { %v241_v16 = vld [vmem:[%s812_s2] sm:$0xff]  ;;  %v665_v17 = vmov 0   ;;  %vm327_vm0 = vcmask 261120   ;;  %v566_v23 = vld [vmem:[%s744_s4 + $0x48] sm:$0xf]  ;;  %s818_s7 = smov (!%p218_p8, %s522_s7), 15 }
  0x2a   : > { %640 = vset.pattern.permute.xlu0 %v665_v17  ;;  %v558_v18 = vld [vmem:[%s744_s4 + $0x40] sm:$0xf]  ;;  %v607_v20 = vld [vmem:[%s744_s4 + $0x44] sm:$0xf]  ;;  %v612_v24 = vld [vmem:[%s744_s4 + $0x64] sm:$0xf0] }
  0x2b   : > { %244 = vperm.xlu0 %640, %v241_v16   ;;  %v611_v19 = vld [vmem:[%s744_s4 + $0x5c] sm:$0xf0]  ;;  %v560_v22 = vld [vmem:[%s744_s4 + $0x60] sm:$0xf0]  ;;  %v567_v26 = vor.u32 %v612_v24, %v566_v23  ;;  %v608_v27 = vld [vmem:[%s744_s4 + $0x4c] sm:$0xf] }
  0x2c   : > { %v559_v21 = vor.u32 %v611_v19, %v558_v18  ;;  %v563_v25 = vor.u32 %v607_v20, %v560_v22  ;;  %v568_v28 = vld [vmem:[%s744_s4 + $0x68] sm:$0xf0]  ;;  %v526_v29 = vld [vmem:[%s744_s4] sm:$0xf]  ;;  %v599_v32 = vld [vmem:[%s744_s4 + $0x4] sm:$0xf] }
  0x2d   : > { %v571_v30 = vor.u32 %v608_v27, %v568_v28  ;;  %v603_v31 = vld [vmem:[%s744_s4 + $0x1c] sm:$0xf0]  ;;  %v528_v33 = vld [vmem:[%s744_s4 + $0x20] sm:$0xf0]  ;;  %363 = vmatpush.bf16.msra.mxu2 %v567_v26  ;;  %v534_v36 = vld [vmem:[%s744_s4 + $0x8] sm:$0xf] }
  0x2e   : > { %337 = vmatpush.bf16.msra.mxu0 %v559_v21  ;;  %350 = vmatpush.bf16.msra.mxu1 %v563_v25  ;;  %v527_v34 = vor.u32 %v603_v31, %v526_v29  ;;  %v531_v35 = vor.u32 %v599_v32, %v528_v33  ;;  %v604_v37 = vld [vmem:[%s744_s4 + $0x24] sm:$0xf0]  ;;  %v600_v38 = vld [vmem:[%s744_s4 + $0xc] sm:$0xf]  ;;  %v224_v41 = vld [vmem:[%s810_s0] sm:$0xf] }
  0x2f   : > { %376 = vmatpush.bf16.msra.mxu3 %v571_v30  ;;  %v535_v39 = vor.u32 %v604_v37, %v534_v36  ;;  %v536_v40 = vld [vmem:[%s744_s4 + $0x28] sm:$0xf0]  ;;  %v582_v42 = vld [vmem:[%s744_s4 + $0x58] sm:$0xf]  ;;  %v610_v46 = vld [vmem:[%s744_s4 + $0x5c] sm:$0xf] }
  0x30   : > { %v614_v43 = vld [vmem:[%s744_s4 + $0x74] sm:$0xf0]  ;;  %v539_v44 = vor.u32 %v600_v38, %v536_v40  ;;  %v584_v47 = vld [vmem:[%s744_s4 + $0x78] sm:$0xf0]  ;;  %v574_v48 = vld [vmem:[%s744_s4 + $0x50] sm:$0xf] }
  0x31   : > { %v583_v45 = vor.u32 %v614_v43, %v582_v42  ;;  %v587_v49 = vor.u32 %v610_v46, %v584_v47  ;;  %v613_v50 = vld [vmem:[%s744_s4 + $0x6c] sm:$0xf0]  ;;  %v609_v51 = vld [vmem:[%s744_s4 + $0x54] sm:$0xf]  ;;  %364 = vmatpush.bf16.msra.mxu2 %v535_v39  ;;  %v550_v54 = vld [vmem:[%s744_s4 + $0x18] sm:$0xf] }
  0x32   : > { %338 = vmatpush.bf16.msra.mxu0 %v527_v34  ;;  %v576_v52 = vld [vmem:[%s744_s4 + $0x70] sm:$0xf0]  ;;  %351 = vmatpush.bf16.msra.mxu1 %v531_v35  ;;  %v575_v53 = vor.u32 %v613_v50, %v574_v48  ;;  %v606_v55 = vld [vmem:[%s744_s4 + $0x34] sm:$0xf0]  ;;  %v602_v56 = vld [vmem:[%s744_s4 + $0x1c] sm:$0xf] }
  0x33   : > { %377 = vmatpush.bf16.msra.mxu3 %v539_v44  ;;  %v579_v57 = vor.u32 %v609_v51, %v576_v52  ;;  %v551_v58 = vor.u32 %v606_v55, %v550_v54  ;;  %v552_v59 = vld [vmem:[%s744_s4 + $0x38] sm:$0xf0]  ;;  %v542_v60 = vld [vmem:[%s744_s4 + $0x10] sm:$0xf]  ;;  %v601_v63 = vld [vmem:[%s744_s4 + $0x14] sm:$0xf] }
  0x34   : > { %v605_v61 = vld [vmem:[%s744_s4 + $0x2c] sm:$0xf0]  ;;  %v555_v62 = vor.u32 %v602_v56, %v552_v59  ;;  %v544_v0 = vld [vmem:[%s744_s4 + $0x30] sm:$0xf0]  ;;  %590 = vmatmul.msk.bf16.vlgmr.msra.gmra.mxu2 %vm327_vm0, %v224_v41  ;;  %s523_s8 = sshll.u32 %s818_s7, 2 }
  0x35   : > { %415 = vmatpush.bf16.msrb.mxu2 %v583_v45  ;;  %588 = vmatmul.msk.bf16.vlgmr.msra.gmra.mxu0 %vm327_vm0, %v224_v41  ;;  %v543_v1 = vor.u32 %v605_v61, %v542_v60  ;;  %v547_v2 = vor.u32 %v601_v63, %v544_v0  ;;  %s794_s11 = scalar_lea.vmem %s813_s3, %s523_s8 }
  0x36   : > { %589 = vmatmul.msk.bf16.vlgmr.msra.gmra.mxu1 %vm327_vm0, %v224_v41  ;;  %591 = vmatmul.msk.bf16.vlgmr.msra.gmra.mxu3 %vm327_vm0, %v224_v41 }
  0x37   : > { %428 = vmatpush.bf16.msrb.mxu3 %v587_v49  ;;  %389 = vmatpush.bf16.msrb.mxu0 %v575_v53 }
  0x38   : > { %402 = vmatpush.bf16.msrb.mxu1 %v579_v57 }
  0x39   : > { %416 = vmatpush.bf16.msrb.mxu2 %v551_v58 }
  0x3b   : > { %429 = vmatpush.bf16.msrb.mxu3 %v555_v62  ;;  %390 = vmatpush.bf16.msrb.mxu0 %v543_v1 }
  0x3c   : > { %403 = vmatpush.bf16.msrb.mxu1 %v547_v2 }
  0x44   : > { %594 = vmatmul.msk.bf16.vlgmr.msrb.gmra.mxu2 %vm327_vm0, %v224_v41 }
  0x45   : > { %592 = vmatmul.msk.bf16.vlgmr.msrb.gmra.mxu0 %vm327_vm0, %v224_v41 }
  0x46   : > { %593 = vmatmul.msk.bf16.vlgmr.msrb.gmra.mxu1 %vm327_vm0, %v224_v41  ;;  %595 = vmatmul.msk.bf16.vlgmr.msrb.gmra.mxu3 %vm327_vm0, %v224_v41 }
  0x9d   : > { %v245_v3 = vpop.permute.xlu0 %244 }
  0xb2   : > { %v340_v4 = vpop.f32.mrf.mxu0 }
  0xb3   : > { %v353_v5 = vpop.f32.mrf.mxu1  ;;  %v341_v6 = vadd.f32 %v340_v4, %v245_v3 }
  0xb4   : > { %v354_v7 = vadd.f32 %v353_v5, %v245_v3 }
  0xb5   : > { %v435_v8 = vmax.f32 %v341_v6, 0.0 }
  0xb6   : > { %v436_v9 = vmax.f32 %v354_v7, 0.0 }
  0xb7   : > { %v366_v11 = vpop.f32.mrf.mxu2 }
  0xb8   : > { %v443_v10 = vpack.c.bf16 %v436_v9, %v435_v8  ;;  %v367_v12 = vadd.f32 %v366_v11, %v245_v3 }
  0xb9   : > { %v379_v13 = vpop.f32.mrf.mxu3 }
  0xba   : > { %447 = vst [vmem:[%s794_s11] sm:$0xff] %v443_v10  ;;  %v342_v14 = vpop.f32.mrf.mxu0  ;;  %v380_v15 = vadd.f32 %v379_v13, %v245_v3  ;;  %v437_v17 = vmax.f32 %v367_v12, 0.0 }
  0xbb   : > { %v355_v16 = vpop.f32.mrf.mxu1 }
  0xbc   : > { %v438_v18 = vmax.f32 %v380_v15, 0.0 }
  0xbe   : > { %v444_v19 = vpack.c.bf16 %v438_v18, %v437_v17 }
  0xbf   : > { %v368_v20 = vpop.f32.mrf.mxu2 }
  0xc0   : > { %448 = vst [vmem:[%s794_s11 + $0x8] sm:$0xff] %v444_v19 }
  0xc1   : > { %v381_v21 = vpop.f32.mrf.mxu3 }
  0xc2   : > { %v392_v22 = vpop.f32.mrf.mxu0 }
  0xc3   : > { %v393_v23 = vadd.f32 %v392_v22, %v245_v3  ;;  %v405_v24 = vpop.f32.mrf.mxu1 }
  0xc4   : > { %v406_v25 = vadd.f32 %v405_v24, %v245_v3 }
  0xc5   : > { %v439_v26 = vmax.f32 %v393_v23, 0.0 }
  0xc6   : > { %v440_v27 = vmax.f32 %v406_v25, 0.0 }
  0xc7   : > { %v418_v29 = vpop.f32.mrf.mxu2 }
  0xc8   : > { %v445_v28 = vpack.c.bf16 %v440_v27, %v439_v26  ;;  %v419_v30 = vadd.f32 %v418_v29, %v245_v3 }
  0xc9   : > { %v431_v31 = vpop.f32.mrf.mxu3 }
  0xca   : > { %449 = vst [vmem:[%s794_s11 + $0x10] sm:$0xff] %v445_v28  ;;  %v394_v32 = vpop.f32.mrf.mxu0  ;;  %v432_v33 = vadd.f32 %v431_v31, %v245_v3  ;;  %v441_v35 = vmax.f32 %v419_v30, 0.0 }
  0xcb   : > { %v407_v34 = vpop.f32.mrf.mxu1 }
  0xcc   : > { %v442_v36 = vmax.f32 %v432_v33, 0.0 }
  0xce   : > { %v446_v37 = vpack.c.bf16 %v442_v36, %v441_v35 }
  0xcf   : > { %v420_v38 = vpop.f32.mrf.mxu2 }
  0xd0   : > { %450 = vst [vmem:[%s794_s11 + $0x18] sm:$0xff] %v446_v37 }
  0xd1   : > { %v433_v39 = vpop.f32.mrf.mxu3 }
  0xd2 PF: > { %p10_p9 = scmp.ge.s32.totalorder %s703_s16, 4   ;;  %s814_s12 = smov %s659_s13 }
  0xd3   : > { %s815_s13 = smov %s712_s19  ;;  %s816_s14 = smov %s703_s16 }
  0xd4   :  { %12 = sbr.rel (!%p10_p9) target bundleno = 2 (0x2), region = 90 }

// kernel: fcn32s_forward.8
= control target key start
LH: loop header
LB: loop body
LE: loop exit
PB: predicated region body
PF: predicated region fallthrough
CT: control target
= control target key end

     0   :  { %s533_s12 = smov 0   ;;  %s535_s13 = smov 0   ;;  %s610_s0 = inlined_call_operand.vmem [shape: bf16[8,72], index: 0, kind: input, shape index: {}]   ;;  %s611_s1 = inlined_call_operand.vmem [shape: bf16[72,512], index: 1, kind: input, shape index: {}]   ;;  %s612_s2 = inlined_call_operand.vmem [shape: f32[8,1], index: 2, kind: input, shape index: {}]   ;;  %s613_s3 = inlined_call_operand.vmem [shape: bf16[8,512], index: 3, kind: output, shape index: {}]  }
   0x1   :  { %s537_s14 = smov 0  }
   0x2 LB: > { %s406_s15 = sadd.s32 4294967295, %s510_s14   ;;  %s550_s16 = sadd.s32 1, %s510_s14   ;;  %s510_s14 = sphi %s537_s14, %s616_s14   ;;  %s506_s13 = sphi %s535_s13, %s615_s13   ;;  %s502_s12 = sphi %s533_s12, %s614_s12  }
   0x3   : > { %s38_s17 = ssub.s32 %s510_s14, %s550_s16  ;;  %s41_s18 = sadd.s32 1, %s506_s13 }
   0x4   : > { %p39_p0 = scmp.eq.s32.totalorder %s38_s17, 0  ;;  %p48_p1 = scmp.ne.s32.totalorder %s506_s13, %s502_s12 }
   0x5   : > { %p49_p2 = scmp.eq.s32.totalorder %s510_s14, 0  ;;  %p409_p4 = scmp.ge.s32.totalorder %s510_s14, 2 }
   0x6   : > { %s559_s19 = scalar_select %p39_p0, %s506_s13, %s41_s18  }
   0x7   : > { %p50_p3 = por %p49_p2, %p48_p1  ;;  %127 = sbr.rel (%p409_p4) target bundleno = 25 (0x19), region = 24 }
   0xc   : > { %130 = sbr.rel (!%p50_p3) target bundleno = 25 (0x19), region = 28  ;;  %s132_s20 = sand.u32 (%p50_p3), 1, %s506_s13  }
   0xd   : > { %s451_s21 = sshll.u32 (%p50_p3), %s510_s14, 3  ;;  %s460_s22 = smul.u32 (%p50_p3), 72, %s132_s20 }
   0xe   : > { %s137_s25 = scalar_lea.vmem (%p50_p3), %s611_s1, %s451_s21 }
   0xf   : > { %v182_v0 = vld [vmem:[%s137_s25] sm:$0xff] (%p50_p3)  ;;  %v184_v1 = vld [vmem:[%s137_s25 + $0x10] sm:$0xff] (%p50_p3)  ;;  %s134_s26 = scalar_lea.vmem (%p50_p3), [#allocation2], %s460_s22 }
  0x10   : > { %v186_v2 = vld [vmem:[%s137_s25 + $0x20] sm:$0xff] (%p50_p3)  ;;  %183 = vst [vmem:[%s134_s26] sm:$0xff] (%p50_p3), %v182_v0  ;;  %v188_v3 = vld [vmem:[%s137_s25 + $0x30] sm:$0xff] (%p50_p3) }
  0x11   : > { %185 = vst [vmem:[%s134_s26 + $0x8] sm:$0xff] %v184_v1  ;;  %v190_v4 = vld [vmem:[%s137_s25 + $0x40] sm:$0xff]  ;;  %v192_v5 = vld [vmem:[%s137_s25 + $0x50] sm:$0xff] }
  0x12   : > { %187 = vst [vmem:[%s134_s26 + $0x10] sm:$0xff] %v186_v2  ;;  %v194_v6 = vld [vmem:[%s137_s25 + $0x60] sm:$0xff]  ;;  %v196_v7 = vld [vmem:[%s137_s25 + $0x70] sm:$0xff] }
  0x13   : > { %189 = vst [vmem:[%s134_s26 + $0x18] sm:$0xff] %v188_v3  ;;  %v198_v8 = vld [vmem:[%s137_s25 + $0x80] sm:$0xff] }
  0x14   : > { %191 = vst [vmem:[%s134_s26 + $0x20] sm:$0xff] %v190_v4 }
  0x15   : > { %193 = vst [vmem:[%s134_s26 + $0x28] sm:$0xff] %v192_v5 }
  0x16   : > { %195 = vst [vmem:[%s134_s26 + $0x30] sm:$0xff] %v194_v6 }
  0x17   : > { %197 = vst [vmem:[%s134_s26 + $0x38] sm:$0xff] %v196_v7 }
  0x18   : > { %199 = vst [vmem:[%s134_s26 + $0x40] sm:$0xff] %v198_v8 }
  0x19 PF: > { %p412_p5 = scmp.ge.s32.totalorder %s510_s14, 1  ;;  %p204_p6 = scmp.lt.s32.totalorder %s510_s14, 3 }
  0x1b   : > { %p205_p7 = pnand %p412_p5, %p204_p6 }
  0x1c   : > { %s211_s27 = sand.u32 (!%p205_p7), 1, %s502_s12   ;;  %s413_s7 = sshll.u32 (!%p205_p7), %s406_s15, 1 }
  0x1d   : > { %208 = sbr.rel (%p205_p7) target bundleno = 194 (0xc2), region = 66  ;;  %p236_p8 = scmp.lt.s32.totalorder (!%p205_p7), %s413_s7, 3 }
  0x1e   : > { %s461_s28 = smul.u32 (!%p205_p7), 72, %s211_s27 }
  0x20   : > { %s573_s4 = scalar_lea.vmem (!%p205_p7), [#allocation2], %s461_s28 }
  0x22   : > { %v512_v9 = vmov 0   ;;  %v252_v10 = vld [vmem:[%s612_s2] sm:$0xff]  ;;  %vm307_vm0 = vcmask 1043456   ;;  %v441_v14 = vld [vmem:[%s573_s4 + $0x30] sm:$0xf]  ;;  %vm303_vm1 = vcmask 588800  }
  0x23   : > { %487 = vset.pattern.permute.xlu0 %v512_v9  ;;  %v251_v11 = vld [vmem:[%s573_s4 + $0x40] sm:$0xff]  ;;  %v459_v17 = vld [vmem:[%s573_s4 + $0x34] sm:$0xf0]  ;;  %v458_v18 = vld [vmem:[%s573_s4 + $0x34] sm:$0xf]  ;;  %s618_s7 = smov (!%p236_p8, %s413_s7), 3 }
  0x24   : > { %255 = vperm.xlu0 %487, %v252_v10   ;;  %v283_v12 = vunpack.c.l.b16 %v251_v11  ;;  %v284_v13 = vunpack.c.h.b16 %v251_v11  ;;  %v443_v19 = vld [vmem:[%s573_s4 + $0x38] sm:$0xf0]  ;;  %v442_v22 = vor.u32 %v459_v17, %v441_v14  ;;  %v433_v24 = vld [vmem:[%s573_s4 + $0x20] sm:$0xf]  ;;  %v457_v25 = vld [vmem:[%s573_s4 + $0x24] sm:$0xf0] }
  0x25   : > { %v446_v23 = vor.u32 %v458_v18, %v443_v19  ;;  %v456_v26 = vld [vmem:[%s573_s4 + $0x24] sm:$0xf]  ;;  %v435_v27 = vld [vmem:[%s573_s4 + $0x28] sm:$0xf0]  ;;  %v434_v28 = vor.u32 %v457_v25, %v433_v24  ;;  %v425_v30 = vld [vmem:[%s573_s4 + $0x10] sm:$0xf] }
  0x26   : > { %v293_v15 = vpack.c.b16 %v283_v12, %v283_v12  ;;  %v294_v16 = vpack.c.b16 %v284_v13, %v284_v13  ;;  %v438_v29 = vor.u32 %v456_v26, %v435_v27  ;;  %v455_v31 = vld [vmem:[%s573_s4 + $0x14] sm:$0xf0]  ;;  %v454_v32 = vld [vmem:[%s573_s4 + $0x14] sm:$0xf]  ;;  %v427_v33 = vld [vmem:[%s573_s4 + $0x18] sm:$0xf0] }
  0x27   : > { %v426_v34 = vor.u32 %v455_v31, %v425_v30  ;;  %v430_v35 = vor.u32 %v454_v32, %v427_v33  ;;  %v417_v36 = vld [vmem:[%s573_s4] sm:$0xf]  ;;  %v453_v37 = vld [vmem:[%s573_s4 + $0x4] sm:$0xf0]  ;;  %v452_v38 = vld [vmem:[%s573_s4 + $0x4] sm:$0xf] }
  0x28   : > { %v309_v20 = vsel %vm307_vm0, %v293_v15, 0  ;;  %v312_v21 = vsel %vm307_vm0, %v294_v16, 0  ;;  %v419_v39 = vld [vmem:[%s573_s4 + $0x8] sm:$0xf0]  ;;  %v418_v40 = vor.u32 %v453_v37, %v417_v36  ;;  %v242_v42 = vld [vmem:[%s610_s0] sm:$0xf] }
  0x29   : > { %317 = vmatpush.bf16.msra.mxu0 %v309_v20  ;;  %330 = vmatpush.bf16.msra.mxu1 %v312_v21  ;;  %v422_v41 = vor.u32 %v452_v38, %v419_v39  ;;  %s414_s8 = sshll.u32 %s618_s7, 2 }
  0x2a   : > { %s239_s11 = scalar_lea.vmem %s613_s3, %s414_s8 }
  0x2d   : > { %318 = vmatpush.bf16.msra.mxu0 %v442_v22  ;;  %331 = vmatpush.bf16.msra.mxu1 %v446_v23 }
  0x31   : > { %319 = vmatpush.bf16.msra.mxu0 %v434_v28  ;;  %332 = vmatpush.bf16.msra.mxu1 %v438_v29 }
  0x35   : > { %320 = vmatpush.bf16.msra.mxu0 %v426_v34  ;;  %333 = vmatpush.bf16.msra.mxu1 %v430_v35 }
  0x39   : > { %321 = vmatpush.bf16.msra.mxu0 %v418_v40  ;;  %334 = vmatpush.bf16.msra.mxu1 %v422_v41 }
  0x3c   : > { %447 = vmatmul.msk.bf16.vlgmr.msra.gmra.mxu0 %vm303_vm1, %v242_v42  ;;  %448 = vmatmul.msk.bf16.vlgmr.msra.gmra.mxu1 %vm303_vm1, %v242_v42 }
  0x96   : > { %v256_v43 = vpop.permute.xlu0 %255 }
  0xb9   : > { %v323_v44 = vpop.f32.mrf.mxu0  ;;  %v336_v45 = vpop.f32.mrf.mxu1 }
  0xba   : > { %v324_v46 = vadd.f32 %v323_v44, %v256_v43  ;;  %v337_v47 = vadd.f32 %v336_v45, %v256_v43 }
  0xbc   : > { %v340_v48 = vmax.f32 %v324_v46, 0.0  ;;  %v341_v49 = vmax.f32 %v337_v47, 0.0 }
  0xbe   : > { %v342_v50 = vpack.c.bf16 %v341_v49, %v340_v48 }
  0xc0   : > { %343 = vst [vmem:[%s239_s11] sm:$0xff] %v342_v50 }
  0xc1   : > { %v325_v51 = vpop.f32.mrf.mxu0  ;;  %v338_v52 = vpop.f32.mrf.mxu1 }
  0xc2 PF: > { %p10_p9 = scmp.ge.s32.totalorder %s550_s16, 4   ;;  %s614_s12 = smov %s506_s13 }
  0xc3   : > { %s615_s13 = smov %s559_s19  ;;  %s616_s14 = smov %s550_s16 }
  0xc4   :  { %12 = sbr.rel (!%p10_p9) target bundleno = 2 (0x2), region = 105 }

// kernel: fcn32s_forward.9
= control target key start
LH: loop header
LB: loop body
LE: loop exit
PB: predicated region body
PF: predicated region fallthrough
CT: control target
= control target key end

     0   :  { %v135_v1 = vmov 0   ;;  %vm74_vm0 = vcmask 1043456   ;;  %vm70_vm1 = vcmask 588800   ;;  %s183_s1 = inlined_call_operand.vmem [shape: bf16[72,128], index: 1, kind: input, shape index: {}]   ;;  %s184_s2 = inlined_call_operand.vmem [shape: f32[16,1], index: 2, kind: input, shape index: {}]   ;;  %s185_s0 = inlined_call_operand.vmem [shape: bf16[16,72], index: 0, kind: input, shape index: {}]   ;;  %s186_s3 = inlined_call_operand.vmem [shape: bf16[16,128], index: 3, kind: output, shape index: {}]  }
   0x1   :  { %v25_v0 = vld [vmem:[%s183_s1 + $0x20] sm:$0xf]  ;;  %134 = vset.pattern.permute.xlu0 %v135_v1  ;;  %v127_v6 = vld [vmem:[%s183_s1 + $0x18] sm:$0xff]  ;;  %v27_v7 = vld [vmem:[%s184_s2 + $0x8] sm:$0xff] }
   0x2   :  { %v60_v2 = vunpack.c.l.b16 %v25_v0  ;;  %v26_v3 = vld [vmem:[%s184_s2] sm:$0xff]  ;;  %v126_v8 = vld [vmem:[%s183_s1 + $0x10] sm:$0xff]  ;;  %v125_v9 = vld [vmem:[%s183_s1 + $0x8] sm:$0xff] }
   0x3   :  { %30 = vperm.xlu0 %134, %v26_v3   ;;  %v124_v10 = vld [vmem:[%s183_s1] sm:$0xff] }
   0x4   :  { %v65_v4 = vpack.c.b16 %v60_v2, %v60_v2  ;;  %v123_v11 = vld [vmem:[%s185_s0] sm:$0xff] }
   0x6   :  { %v76_v5 = vsel %vm74_vm0, %v65_v4, 0 }
   0x7   :  { %81 = vmatpush.bf16.msra.mxu0 %v76_v5 }
   0xb   :  { %82 = vmatpush.bf16.msra.mxu0 %v127_v6  ;;  %35 = vperm.xlu0 %134, %v27_v7  }
   0xf   :  { %83 = vmatpush.bf16.msra.mxu0 %v126_v8 }
  0x13   :  { %84 = vmatpush.bf16.msra.mxu0 %v125_v9 }
  0x17   :  { %85 = vmatpush.bf16.msra.mxu0 %v124_v10 }
  0x1a   :  { %122 = vmatmul.msk.bf16.vlgmr.msra.gmra.mxu0 %vm70_vm1, %v123_v11 }
  0x75   :  { %v31_v12 = vpop.permute.xlu0 %30 }
  0x7d   :  { %v36_v15 = vpop.permute.xlu0 %35 }
  0x97   :  { %v87_v13 = vpop.f32.mrf.mxu0 }
  0x98   :  { %v88_v14 = vadd.f32 %v87_v13, %v31_v12 }
  0x9a   :  { %v92_v18 = vmax.f32 %v88_v14, 0.0 }
  0x9f   :  { %v89_v16 = vpop.f32.mrf.mxu0 }
  0xa0   :  { %v90_v17 = vadd.f32 %v89_v16, %v36_v15 }
  0xa2   :  { %v93_v19 = vmax.f32 %v90_v17, 0.0 }
  0xa4   :  { %v131_v20 = vpack.c.bf16 %v93_v19, %v92_v18 }
  0xa6   :  { %132 = vst [vmem:[%s186_s3] sm:$0xff] %v131_v20  }

// kernel: fcn32s_forward.10
= control target key start
LH: loop header
LB: loop body
LE: loop exit
PB: predicated region body
PF: predicated region fallthrough
CT: control target
= control target key end

     0   :  { %v215_v4 = vmov 0   ;;  %vm110_vm0 = vcmask 130048   ;;  %s284_s1 = inlined_call_operand.vmem [shape: bf16[144,128], index: 1, kind: input, shape index: {}]   ;;  %s285_s0 = inlined_call_operand.vmem [shape: bf16[16,144], index: 0, kind: input, shape index: {}]   ;;  %s286_s2 = inlined_call_operand.vmem [shape: f32[16,1], index: 2, kind: input, shape index: {}]   ;;  %s287_s3 = inlined_call_operand.vmem [shape: bf16[16,128], index: 3, kind: output, shape index: {}]  }
   0x1   :  { %v206_v0 = vld [vmem:[%s284_s1 + $0x38] sm:$0xff]  ;;  %v205_v1 = vld [vmem:[%s284_s1 + $0x30] sm:$0xff]  ;;  %v207_v2 = vld [vmem:[%s284_s1 + $0x40] sm:$0xff]  ;;  %214 = vset.pattern.permute.xlu0 %v215_v4 }
   0x2   :  { %114 = vmatpush.bf16.msra.mxu0 %v206_v0  ;;  %v197_v3 = vld [vmem:[%s285_s0 + $0x4] sm:$0xf]  ;;  %v156_v5 = vld [vmem:[%s285_s0 + $0x8] sm:$0xf0]  ;;  %135 = vmatpush.bf16.msra.mxu1 %v207_v2  ;;  %v202_v11 = vld [vmem:[%s284_s1 + $0x18] sm:$0xff] }
   0x3   :  { %v159_v6 = vor.u32 %v197_v3, %v156_v5  ;;  %v35_v7 = vld [vmem:[%s286_s2] sm:$0xff]  ;;  %v204_v8 = vld [vmem:[%s284_s1 + $0x28] sm:$0xff]  ;;  %v201_v12 = vld [vmem:[%s284_s1 + $0x10] sm:$0xff] }
   0x4   :  { %39 = vperm.xlu0 %214, %v35_v7   ;;  %v203_v9 = vld [vmem:[%s284_s1 + $0x20] sm:$0xff]  ;;  %v36_v10 = vld [vmem:[%s286_s2 + $0x8] sm:$0xff] }
   0x5   :  { %196 = vmatmul.msk.bf16.vlgmr.msra.gmra.mxu1 %vm110_vm0, %v159_v6  ;;  %v200_v13 = vld [vmem:[%s284_s1 + $0x8] sm:$0xff]  ;;  %v199_v14 = vld [vmem:[%s284_s1] sm:$0xff] }
   0x6   :  { %115 = vmatpush.bf16.msra.mxu0 %v205_v1  ;;  %v154_v15 = vld [vmem:[%s285_s0] sm:$0xf]  ;;  %v198_v16 = vld [vmem:[%s285_s0 + $0x4] sm:$0xf0] }
   0x7   :  { %v155_v17 = vor.u32 %v198_v16, %v154_v15 }
   0xa   :  { %116 = vmatpush.bf16.msra.mxu0 %v204_v8 }
   0xc   :  { %44 = vperm.xlu0 %214, %v36_v10  }
   0xe   :  { %117 = vmatpush.bf16.msra.mxu0 %v203_v9 }
  0x12   :  { %118 = vmatpush.bf16.msra.mxu0 %v202_v11 }
  0x16   :  { %119 = vmatpush.bf16.msra.mxu0 %v201_v12 }
  0x1a   :  { %120 = vmatpush.bf16.msra.mxu0 %v200_v13 }
  0x1e   :  { %121 = vmatpush.bf16.msra.mxu0 %v199_v14 }
  0x21   :  { %122 = vmatmul.bf16.vlgmr.msra.gmra.mxu0 %v155_v17 }
  0x76   :  { %v40_v18 = vpop.permute.xlu0 %39 }
  0x7e   :  { %v45_v22 = vpop.permute.xlu0 %44 }
  0x82   :  { %v137_v19 = vpop.f32.mrf.mxu1 }
  0x8a   :  { %v139_v26 = vpop.f32.mrf.mxu1 }
  0x9e   :  { %v123_v20 = vpop.f32.mrf.mxu0 }
  0x9f   :  { %v124_v21 = vadd.f32 %v123_v20, %v40_v18 }
  0xa1   :  { %v138_v24 = vadd.f32 %v137_v19, %v124_v21 }
  0xa3   :  { %v142_v28 = vmax.f32 %v138_v24, 0.0 }
  0xa6   :  { %v125_v23 = vpop.f32.mrf.mxu0 }
  0xa7   :  { %v126_v25 = vadd.f32 %v125_v23, %v45_v22 }
  0xa9   :  { %v140_v27 = vadd.f32 %v139_v26, %v126_v25 }
  0xab   :  { %v143_v29 = vmax.f32 %v140_v27, 0.0 }
  0xad   :  { %v211_v30 = vpack.c.bf16 %v143_v29, %v142_v28 }
  0xaf   :  { %212 = vst [vmem:[%s287_s3] sm:$0xff] %v211_v30  }

// kernel: fcn32s_forward.11
= control target key start
LH: loop header
LB: loop body
LE: loop exit
PB: predicated region body
PF: predicated region fallthrough
CT: control target
= control target key end

     0   :  { %v283_v6 = vmov 0   ;;  %vm133_vm0 = vcmask 130048   ;;  %s375_s1 = inlined_call_operand.vmem [shape: bf16[144,128], index: 1, kind: input, shape index: {}]   ;;  %s376_s0 = inlined_call_operand.vmem [shape: bf16[32,144], index: 0, kind: input, shape index: {}]   ;;  %s377_s2 = inlined_call_operand.vmem [shape: f32[32,1], index: 2, kind: input, shape index: {}]   ;;  %s378_s3 = inlined_call_operand.vmem [shape: bf16[32,128], index: 3, kind: output, shape index: {}]  }
   0x1   :  { %v259_v0 = vld [vmem:[%s375_s1 + $0x38] sm:$0xff]  ;;  %v260_v1 = vld [vmem:[%s375_s1 + $0x40] sm:$0xff]  ;;  %v258_v3 = vld [vmem:[%s375_s1 + $0x30] sm:$0xff]  ;;  %282 = vset.pattern.permute.xlu1 %v283_v6  ;;  %281 = vset.pattern.permute.xlu0 %v283_v6 }
   0x2   :  { %v248_v2 = vld [vmem:[%s376_s0 + $0x4] sm:$0xf]  ;;  %140 = vmatpush.bf16.msra.mxu0 %v259_v0  ;;  %272 = vmatpush.bf16.msra.mxu2 %v259_v0  ;;  %v198_v4 = vld [vmem:[%s376_s0 + $0x8] sm:$0xf0]  ;;  %v39_v7 = vld [vmem:[%s377_s2 + $0x10] sm:$0xff] }
   0x3   :  { %166 = vmatpush.bf16.msra.mxu1 %v260_v1  ;;  %v201_v5 = vor.u32 %v248_v2, %v198_v4  ;;  %v257_v8 = vld [vmem:[%s375_s1 + $0x28] sm:$0xff]  ;;  %v37_v9 = vld [vmem:[%s377_s2] sm:$0xff]  ;;  %53 = vperm.xlu1 %282, %v39_v7   ;;  %v40_v11 = vld [vmem:[%s377_s2 + $0x18] sm:$0xff] }
   0x4   :  { %43 = vperm.xlu0 %281, %v37_v9   ;;  %v256_v10 = vld [vmem:[%s375_s1 + $0x20] sm:$0xff]  ;;  %v38_v12 = vld [vmem:[%s377_s2 + $0x8] sm:$0xff]  ;;  %v255_v13 = vld [vmem:[%s375_s1 + $0x18] sm:$0xff] }
   0x5   :  { %v250_v14 = vld [vmem:[%s376_s0 + $0x14] sm:$0xf]  ;;  %v206_v15 = vld [vmem:[%s376_s0 + $0x18] sm:$0xf0]  ;;  %v253_v18 = vld [vmem:[%s375_s1 + $0x8] sm:$0xff] }
   0x6   :  { %141 = vmatpush.bf16.msra.mxu0 %v258_v3  ;;  %273 = vmatpush.bf16.msra.mxu2 %v258_v3  ;;  %v254_v16 = vld [vmem:[%s375_s1 + $0x10] sm:$0xff]  ;;  %v209_v17 = vor.u32 %v250_v14, %v206_v15  ;;  %v252_v19 = vld [vmem:[%s375_s1] sm:$0xff]  ;;  %v249_v21 = vld [vmem:[%s376_s0 + $0x4] sm:$0xf0] }
   0x7   :  { %246 = vmatmul.msk.bf16.vlgmr.msra.gmra.mxu1 %vm133_vm0, %v201_v5  ;;  %v196_v20 = vld [vmem:[%s376_s0] sm:$0xf]  ;;  %v204_v22 = vld [vmem:[%s376_s0 + $0x10] sm:$0xf]  ;;  %v251_v23 = vld [vmem:[%s376_s0 + $0x14] sm:$0xf0] }
   0x8   :  { %v197_v24 = vor.u32 %v249_v21, %v196_v20  ;;  %v205_v25 = vor.u32 %v251_v23, %v204_v22 }
   0xa   :  { %142 = vmatpush.bf16.msra.mxu0 %v257_v8  ;;  %274 = vmatpush.bf16.msra.mxu2 %v257_v8 }
   0xb   :  { %58 = vperm.xlu1 %282, %v40_v11  }
   0xc   :  { %48 = vperm.xlu0 %281, %v38_v12  }
   0xe   :  { %143 = vmatpush.bf16.msra.mxu0 %v256_v10  ;;  %275 = vmatpush.bf16.msra.mxu2 %v256_v10 }
  0x12   :  { %144 = vmatpush.bf16.msra.mxu0 %v255_v13  ;;  %276 = vmatpush.bf16.msra.mxu2 %v255_v13 }
  0x16   :  { %145 = vmatpush.bf16.msra.mxu0 %v254_v16  ;;  %277 = vmatpush.bf16.msra.mxu2 %v254_v16 }
  0x17   :  { %247 = vmatmul.msk.bf16.gmra.mxu1 %vm133_vm0, %v209_v17 }
  0x1a   :  { %146 = vmatpush.bf16.msra.mxu0 %v253_v18  ;;  %278 = vmatpush.bf16.msra.mxu2 %v253_v18 }
  0x1e   :  { %147 = vmatpush.bf16.msra.mxu0 %v252_v19  ;;  %279 = vmatpush.bf16.msra.mxu2 %v252_v19 }
  0x21   :  { %148 = vmatmul.bf16.vlgmr.msra.gmra.mxu0 %v197_v24  ;;  %153 = vmatmul.bf16.vlgmr.msra.gmra.mxu2 %v205_v25 }
  0x75   :  { %v54_v30 = vpop.permute.xlu1 %53 }
  0x76   :  { %v44_v28 = vpop.permute.xlu0 %43 }
  0x7d   :  { %v59_v42 = vpop.permute.xlu1 %58 }
  0x7e   :  { %v49_v34 = vpop.permute.xlu0 %48 }
  0x84   :  { %v168_v26 = vpop.f32.mrf.mxu1 }
  0x8c   :  { %v170_v27 = vpop.f32.mrf.mxu1 }
  0x94   :  { %v173_v32 = vpop.f32.mrf.mxu1 }
  0x9c   :  { %v175_v47 = vpop.f32.mrf.mxu1 }
  0x9e   :  { %v149_v29 = vpop.f32.mrf.mxu0 }
  0x9f   :  { %v150_v31 = vadd.f32 %v149_v29, %v44_v28 }
  0xa1   :  { %v169_v36 = vadd.f32 %v168_v26, %v150_v31 }
  0xa3   :  { %v178_v40 = vmax.f32 %v169_v36, 0.0 }
  0xa4   :  { %v154_v33 = vpop.f32.mrf.mxu2 }
  0xa5   :  { %v155_v38 = vadd.f32 %v154_v33, %v54_v30 }
  0xa6   :  { %v151_v35 = vpop.f32.mrf.mxu0 }
  0xa7   :  { %v152_v37 = vadd.f32 %v151_v35, %v49_v34  ;;  %v174_v44 = vadd.f32 %v173_v32, %v155_v38 }
  0xa9   :  { %v171_v39 = vadd.f32 %v170_v27, %v152_v37  ;;  %v180_v49 = vmax.f32 %v174_v44, 0.0 }
  0xab   :  { %v179_v41 = vmax.f32 %v171_v39, 0.0 }
  0xac   :  { %v156_v43 = vpop.f32.mrf.mxu2 }
  0xad   :  { %v264_v45 = vpack.c.bf16 %v179_v41, %v178_v40  ;;  %v157_v46 = vadd.f32 %v156_v43, %v59_v42 }
  0xaf   :  { %265 = vst [vmem:[%s378_s3] sm:$0xff] %v264_v45   ;;  %v176_v48 = vadd.f32 %v175_v47, %v157_v46 }
  0xb1   :  { %v181_v50 = vmax.f32 %v176_v48, 0.0 }
  0xb3   :  { %v269_v51 = vpack.c.bf16 %v181_v50, %v180_v49 }
  0xb5   :  { %271 = vst [vmem:[%s378_s3 + $0x8] sm:$0xff] %v269_v51  }

// kernel: fcn32s_forward.12
= control target key start
LH: loop header
LB: loop body
LE: loop exit
PB: predicated region body
PF: predicated region fallthrough
CT: control target
= control target key end

     0   :  { %s1438_s24 = smov 0   ;;  %s1440_s25 = smov 0   ;;  %s1621_s0 = inlined_call_operand.vmem [shape: bf16[8,32], index: 0, kind: input, shape index: {}]   ;;  %s1622_s1 = inlined_call_operand.vmem [shape: bf16[32,64], index: 1, kind: input, shape index: {}]   ;;  %s1623_s2 = inlined_call_operand.vmem [shape: f32[1,64], index: 2, kind: input, shape index: {}]   ;;  %s1624_s3 = inlined_call_operand.vmem [shape: bf16[64,4096], index: 3, kind: input, shape index: {}]   ;;  %s1625_s4 = inlined_call_operand.vmem [shape: f32[1,4096], index: 4, kind: input, shape index: {}]   ;;  %s1626_s5 = inlined_call_operand.vmem [shape: bf16[4096,128], index: 5, kind: input, shape index: {}]   ;;  %s1627_s6 = inlined_call_operand.vmem [shape: f32[1,128], index: 6, kind: input, shape index: {}]   ;;  %s1628_s7 = inlined_call_operand.vmem [shape: bf16[8,128], index: 7, kind: output, shape index: {}]  }
   0x1   :  { %s1442_s26 = smov 0   ;;  %s1444_s27 = smov 0  }
   0x2   :  { %s1446_s28 = smov 0  }
   0x3 LB: > { %s26_s29 = sadd.s32 1, %s1391_s27  ;;  %p111_p1 = scmp.ne.s32.totalorder %s1383_s25, %s1379_s24  ;;  %s1395_s28 = sphi %s1446_s28, %s17_s28   ;;  %s1391_s27 = sphi %s1444_s27, %s1632_s27   ;;  %s1387_s26 = sphi %s1442_s26, %s1631_s26   ;;  %s1383_s25 = sphi %s1440_s25, %s1630_s25   ;;  %s1379_s24 = sphi %s1438_s24, %s1629_s24  }
   0x4   : > { %p27_p0 = scmp.ge.s32.totalorder %s26_s29, 8  ;;  %p112_p2 = scmp.eq.s32.totalorder %s1395_s28, 0 }
   0x5   : > { %s104_s8 = sadd.s32 1, %s1383_s25  ;;  %p1044_p5 = scmp.ge.s32.totalorder %s1395_s28, 8 }
   0x6   : > { %s1634_s29 = smov (%p27_p0, %s26_s29), 0  ;;  %p113_p3 = por %p112_p2, %p111_p1 }
   0x7   : > { %s101_s30 = ssub.s32 %s1391_s27, %s1634_s29  ;;  %252 = sbr.rel (%p1044_p5) target bundleno = 32 (0x20), region = 32 }
   0x8   : > { %p102_p4 = scmp.eq.s32.totalorder %s101_s30, 0 }
   0xa   : > { %s1473_s9 = scalar_select %p102_p4, %s1383_s25, %s104_s8  }
   0xc   : > { %255 = sbr.rel (!%p113_p3) target bundleno = 32 (0x20), region = 36  ;;  %s257_s10 = sand.u32 (%p113_p3), 1, %s1383_s25  }
   0xd   : > { %s1263_s11 = sshll.u32 (%p113_p3), %s1391_s27, 4  ;;  %s1045_s12 = sshll.u32 (%p113_p3), %s257_s10, 7 }
   0xe   : > { %s1481_s15 = scalar_lea.vmem (%p113_p3), %s1624_s3, %s1263_s11  ;;  %s259_s16 = scalar_lea.vmem (%p113_p3), [#allocation4], %s1045_s12 }
   0xf   : > { %v275_v0 = vld [vmem:[%s1481_s15] sm:$0xff] (%p113_p3)  ;;  %v277_v1 = vld [vmem:[%s1481_s15 + $0x8] sm:$0xff] (%p113_p3) }
  0x10   : > { %v279_v2 = vld [vmem:[%s1481_s15 + $0x80] sm:$0xff] (%p113_p3)  ;;  %276 = vst [vmem:[%s259_s16] sm:$0xff] (%p113_p3), %v275_v0  ;;  %v281_v3 = vld [vmem:[%s1481_s15 + $0x88] sm:$0xff] (%p113_p3) }
  0x11   : > { %278 = vst [vmem:[%s259_s16 + $0x8] sm:$0xff] %v277_v1  ;;  %v283_v4 = vld [vmem:[%s1481_s15 + $0x100] sm:$0xff]  ;;  %v285_v5 = vld [vmem:[%s1481_s15 + $0x108] sm:$0xff] }
  0x12   : > { %280 = vst [vmem:[%s259_s16 + $0x10] sm:$0xff] %v279_v2  ;;  %v287_v6 = vld [vmem:[%s1481_s15 + $0x180] sm:$0xff]  ;;  %v289_v7 = vld [vmem:[%s1481_s15 + $0x188] sm:$0xff] }
  0x13   : > { %282 = vst [vmem:[%s259_s16 + $0x18] sm:$0xff] %v281_v3  ;;  %v291_v8 = vld [vmem:[%s1481_s15 + $0x200] sm:$0xff]  ;;  %v293_v9 = vld [vmem:[%s1481_s15 + $0x208] sm:$0xff] }
  0x14   : > { %284 = vst [vmem:[%s259_s16 + $0x20] sm:$0xff] %v283_v4  ;;  %v295_v10 = vld [vmem:[%s1481_s15 + $0x280] sm:$0xff]  ;;  %v297_v11 = vld [vmem:[%s1481_s15 + $0x288] sm:$0xff] }
  0x15   : > { %286 = vst [vmem:[%s259_s16 + $0x28] sm:$0xff] %v285_v5  ;;  %v299_v12 = vld [vmem:[%s1481_s15 + $0x300] sm:$0xff]  ;;  %v301_v13 = vld [vmem:[%s1481_s15 + $0x308] sm:$0xff] }
  0x16   : > { %288 = vst [vmem:[%s259_s16 + $0x30] sm:$0xff] %v287_v6  ;;  %v303_v14 = vld [vmem:[%s1481_s15 + $0x380] sm:$0xff]  ;;  %v305_v15 = vld [vmem:[%s1481_s15 + $0x388] sm:$0xff] }
  0x17   : > { %290 = vst [vmem:[%s259_s16 + $0x38] sm:$0xff] %v289_v7 }
  0x18   : > { %292 = vst [vmem:[%s259_s16 + $0x40] sm:$0xff] %v291_v8 }
  0x19   : > { %294 = vst [vmem:[%s259_s16 + $0x48] sm:$0xff] %v293_v9 }
  0x1a   : > { %296 = vst [vmem:[%s259_s16 + $0x50] sm:$0xff] %v295_v10 }
  0x1b   : > { %298 = vst [vmem:[%s259_s16 + $0x58] sm:$0xff] %v297_v11 }
  0x1c   : > { %300 = vst [vmem:[%s259_s16 + $0x60] sm:$0xff] %v299_v12 }
  0x1d   : > { %302 = vst [vmem:[%s259_s16 + $0x68] sm:$0xff] %v301_v13 }
  0x1e   : > { %304 = vst [vmem:[%s259_s16 + $0x70] sm:$0xff] %v303_v14 }
  0x1f   : > { %306 = vst [vmem:[%s259_s16 + $0x78] sm:$0xff] %v305_v15 }
  0x20 PF: > { %p1048_p6 = scmp.ge.s32.totalorder %s1395_s28, 1  ;;  %p328_p7 = scmp.lt.s32.totalorder %s1395_s28, 9 }
  0x22   : > { %p329_p8 = pnand %p1048_p6, %p328_p7 }
  0x23   : > { %s335_s17 = sand.u32 (!%p329_p8), 1, %s1379_s24   ;;  %s1050_s18 = sshll.u32 (!%p329_p8), %s1387_s26, 2 }
  0x24   : > { %332 = sbr.rel (%p329_p8) target bundleno = 497 (0x1f1), region = 67  ;;  %s1049_s19 = sshll.u32 (!%p329_p8), %s335_s17, 7 }
  0x25   : > { %p384_p9 = scmp.lt.s32.totalorder (!%p329_p8), %s1050_s18, 31  ;;  %s1051_s20 = sshll.u32 (!%p329_p8), %s1387_s26, 6 }
  0x26   : > { %p389_p10 = scmp.lt.s32.totalorder (!%p329_p8), %s1051_s20, 511  ;;  %s1515_s24 = scalar_lea.vmem (!%p329_p8), [#allocation4], %s1049_s19 }
  0x27   : > { %p1053_p11 = scmp.ne.s32.totalorder (!%p329_p8), %s1387_s26, 0 }
  0x29   : > { %s1636_s18 = smov (!%p384_p9, %s1050_s18), 31  ;;  %s1638_s20 = smov (!%p389_p10, %s1051_s20), 511 }
  0x2a   : > { %s386_s23 = scalar_lea.vmem %s1625_s4, %s1636_s18  ;;  %s1052_s30 = sshll.u32 %s1638_s20, 2 }
  0x2b   : > { %s1513_s11 = scalar_lea.vmem %s1626_s5, %s1052_s30  ;;  %402 = sbr.rel (%p1053_p11) target bundleno = 190 (0xbe), region = 75 }
  0x30   : > { %v1265_v16 = vld [vmem:[%s1622_s1 + $0x8] sm:$0xff]  ;;  %v1264_v17 = vld [vmem:[%s1622_s1] sm:$0xff]  ;;  %vm424_vm0 = vcmask 261120   ;;  %v1397_v19 = vmov 0.0   ;;  %vm443_vm1 = vcmask 519168  }
  0x31   : > { %434 = vmatpush.bf16.msra.mxu0 %v1265_v16  ;;  %v403_v18 = vld [vmem:[%s1621_s0] sm:$0xf]  ;;  %445 = vst [vmem:[#allocation3] sm:$0xff] %v1397_v19 }
  0x32   : > { %v1355_v20 = vld [vmem:[%s1623_s2] ss:$0 sm:$0xff] }
  0x35   : > { %435 = vmatpush.bf16.msra.mxu0 %v1264_v17 }
  0x38   : > { %1062 = vmatmul.msk.bf16.vlgmr.msra.gmra.mxu0 %vm424_vm0, %v403_v18 }
  0xb5   : > { %v437_v21 = vpop.f32.mrf.mxu0 }
  0xb6   : > { %v438_v22 = vadd.f32 %v1355_v20, %v437_v21 }
  0xb8   : > { %v441_v23 = vmax.f32 %v438_v22, 0.0 }
  0xba   : > { %v442_v24 = vpack.c.bf16 %v441_v23, %v441_v23 }
  0xbc   : > { %444 = vst.msk [vmem:[#allocation2] sm:$0xf] %vm443_vm1, %v442_v24 }
  0xbd   : > { %v439_v25 = vpop.f32.mrf.mxu0 }
  0xbe PF: > { %v1121_v26 = vld [vmem:[%s1515_s24 + $0x68] sm:$0xf]  ;;  %v1281_v27 = vld [vmem:[%s1515_s24 + $0x74] sm:$0xf0]  ;;  %v1279_v28 = vld [vmem:[%s1515_s24 + $0x6c] sm:$0xf] }
  0xbf   : > { %v1122_v29 = vor.u32 %v1281_v27, %v1121_v26  ;;  %v1123_v30 = vld [vmem:[%s1515_s24 + $0x78] sm:$0xf0]  ;;  %v1113_v31 = vld [vmem:[%s1515_s24 + $0x60] sm:$0xf]  ;;  %v1280_v32 = vld [vmem:[%s1515_s24 + $0x6c] sm:$0xf0] }
  0xc0   : > { %v1126_v33 = vor.u32 %v1279_v28, %v1123_v30  ;;  %v1114_v34 = vor.u32 %v1280_v32, %v1113_v31  ;;  %v1278_v35 = vld [vmem:[%s1515_s24 + $0x64] sm:$0xf]  ;;  %v1115_v36 = vld [vmem:[%s1515_s24 + $0x70] sm:$0xf0]  ;;  %v1105_v37 = vld [vmem:[%s1515_s24 + $0x48] sm:$0xf] }
  0xc1   : > { %587 = vmatpush.bf16.msra.mxu2 %v1122_v29  ;;  %v1118_v38 = vor.u32 %v1278_v35, %v1115_v36  ;;  %v1277_v39 = vld [vmem:[%s1515_s24 + $0x54] sm:$0xf0]  ;;  %v1275_v40 = vld [vmem:[%s1515_s24 + $0x4c] sm:$0xf]  ;;  %v1107_v41 = vld [vmem:[%s1515_s24 + $0x58] sm:$0xf0] }
  0xc2   : > { %600 = vmatpush.bf16.msra.mxu3 %v1126_v33  ;;  %561 = vmatpush.bf16.msra.mxu0 %v1114_v34  ;;  %v1106_v42 = vor.u32 %v1277_v39, %v1105_v37  ;;  %v1110_v43 = vor.u32 %v1275_v40, %v1107_v41  ;;  %v1097_v44 = vld [vmem:[%s1515_s24 + $0x40] sm:$0xf]  ;;  %v1276_v45 = vld [vmem:[%s1515_s24 + $0x4c] sm:$0xf0]  ;;  %v1274_v46 = vld [vmem:[%s1515_s24 + $0x44] sm:$0xf] }
  0xc3   : > { %574 = vmatpush.bf16.msra.mxu1 %v1118_v38  ;;  %v1098_v47 = vor.u32 %v1276_v45, %v1097_v44  ;;  %v1099_v48 = vld [vmem:[%s1515_s24 + $0x50] sm:$0xf0]  ;;  %v1089_v49 = vld [vmem:[%s1515_s24 + $0x28] sm:$0xf]  ;;  %v1273_v50 = vld [vmem:[%s1515_s24 + $0x34] sm:$0xf0] }
  0xc4   : > { %v1102_v51 = vor.u32 %v1274_v46, %v1099_v48  ;;  %v1271_v52 = vld [vmem:[%s1515_s24 + $0x2c] sm:$0xf]  ;;  %v1091_v53 = vld [vmem:[%s1515_s24 + $0x38] sm:$0xf0]  ;;  %v1081_v54 = vld [vmem:[%s1515_s24 + $0x20] sm:$0xf]  ;;  %v1090_v55 = vor.u32 %v1273_v50, %v1089_v49 }
  0xc5   : > { %588 = vmatpush.bf16.msra.mxu2 %v1106_v42  ;;  %v1272_v56 = vld [vmem:[%s1515_s24 + $0x2c] sm:$0xf0]  ;;  %v1270_v57 = vld [vmem:[%s1515_s24 + $0x24] sm:$0xf]  ;;  %v1083_v58 = vld [vmem:[%s1515_s24 + $0x30] sm:$0xf0]  ;;  %v1094_v59 = vor.u32 %v1271_v52, %v1091_v53 }
  0xc6   : > { %601 = vmatpush.bf16.msra.mxu3 %v1110_v43  ;;  %562 = vmatpush.bf16.msra.mxu0 %v1098_v47  ;;  %v1082_v60 = vor.u32 %v1272_v56, %v1081_v54  ;;  %v1073_v61 = vld [vmem:[%s1515_s24 + $0x8] sm:$0xf]  ;;  %v1269_v62 = vld [vmem:[%s1515_s24 + $0x14] sm:$0xf0]  ;;  %v1267_v63 = vld [vmem:[%s1515_s24 + $0xc] sm:$0xf]  ;;  %v1086_v0 = vor.u32 %v1270_v57, %v1083_v58 }
  0xc7   : > { %575 = vmatpush.bf16.msra.mxu1 %v1102_v51  ;;  %v1075_v1 = vld [vmem:[%s1515_s24 + $0x18] sm:$0xf0]  ;;  %v1065_v2 = vld [vmem:[%s1515_s24] sm:$0xf]  ;;  %v1268_v3 = vld [vmem:[%s1515_s24 + $0xc] sm:$0xf0]  ;;  %v1074_v6 = vor.u32 %v1269_v62, %v1073_v61 }
  0xc8   : > { %v1266_v4 = vld [vmem:[%s1515_s24 + $0x4] sm:$0xf]  ;;  %v1067_v5 = vld [vmem:[%s1515_s24 + $0x10] sm:$0xf0]  ;;  %v1078_v7 = vor.u32 %v1267_v63, %v1075_v1  ;;  %v1066_v8 = vor.u32 %v1268_v3, %v1065_v2  ;;  %v1289_v10 = vld [vmem:[%s1513_s11 + $0x38] sm:$0xff]  ;;  %vm553_vm2 = vcmask 523264  }
  0xc9   : > { %589 = vmatpush.bf16.msra.mxu2 %v1090_v55  ;;  %v1070_v9 = vor.u32 %v1266_v4, %v1067_v5  ;;  %v1297_v11 = vld [vmem:[%s1513_s11 + $0x78] sm:$0xff]  ;;  %v446_v12 = vld [vmem:[#allocation2] sm:$0xf]  ;;  %v1288_v15 = vld [vmem:[%s1513_s11 + $0x30] sm:$0xff]  ;;  %p1259_p12 = scmp.ne.s32.totalorder %s1387_s26, 7 }
  0xca   : > { %602 = vmatpush.bf16.msra.mxu3 %v1094_v59  ;;  %563 = vmatpush.bf16.msra.mxu0 %v1082_v60  ;;  %v1305_v13 = vld [vmem:[%s1513_s11 + $0xb8] sm:$0xff]  ;;  %v1296_v16 = vld [vmem:[%s1513_s11 + $0x70] sm:$0xff]  ;;  %v1287_v19 = vld [vmem:[%s1513_s11 + $0x28] sm:$0xff] }
  0xcb   : > { %576 = vmatpush.bf16.msra.mxu1 %v1086_v0  ;;  %v1313_v14 = vld [vmem:[%s1513_s11 + $0xf8] sm:$0xff]  ;;  %v1304_v17 = vld [vmem:[%s1513_s11 + $0xb0] sm:$0xff]  ;;  %v1295_v20 = vld [vmem:[%s1513_s11 + $0x68] sm:$0xff] }
  0xcc   : > { %v1312_v18 = vld [vmem:[%s1513_s11 + $0xf0] sm:$0xff]  ;;  %v1303_v21 = vld [vmem:[%s1513_s11 + $0xa8] sm:$0xff]  ;;  %v1286_v23 = vld [vmem:[%s1513_s11 + $0x20] sm:$0xff] }
  0xcd   : > { %590 = vmatpush.bf16.msra.mxu2 %v1074_v6  ;;  %v1311_v22 = vld [vmem:[%s1513_s11 + $0xe8] sm:$0xff]  ;;  %v1294_v24 = vld [vmem:[%s1513_s11 + $0x60] sm:$0xff]  ;;  %v1285_v27 = vld [vmem:[%s1513_s11 + $0x18] sm:$0xff] }
  0xce   : > { %603 = vmatpush.bf16.msra.mxu3 %v1078_v7  ;;  %564 = vmatpush.bf16.msra.mxu0 %v1066_v8  ;;  %v1302_v25 = vld [vmem:[%s1513_s11 + $0xa0] sm:$0xff]  ;;  %v1293_v28 = vld [vmem:[%s1513_s11 + $0x58] sm:$0xff]  ;;  %v1284_v31 = vld [vmem:[%s1513_s11 + $0x10] sm:$0xff] }
  0xcf   : > { %577 = vmatpush.bf16.msra.mxu1 %v1070_v9  ;;  %v1310_v26 = vld [vmem:[%s1513_s11 + $0xe0] sm:$0xff]  ;;  %v1301_v29 = vld [vmem:[%s1513_s11 + $0x98] sm:$0xff]  ;;  %v1292_v32 = vld [vmem:[%s1513_s11 + $0x50] sm:$0xff] }
  0xd0   : > { %1129 = vmatmul.msk.bf16.vlgmr.msra.gmra.mxu2 %vm553_vm2, %v446_v12  ;;  %v1309_v30 = vld [vmem:[%s1513_s11 + $0xd8] sm:$0xff]  ;;  %v1300_v33 = vld [vmem:[%s1513_s11 + $0x90] sm:$0xff]  ;;  %v1283_v35 = vld [vmem:[%s1513_s11 + $0x8] sm:$0xff] }
  0xd1   : > { %1130 = vmatmul.msk.bf16.vlgmr.msra.gmra.mxu3 %vm553_vm2, %v446_v12  ;;  %1127 = vmatmul.msk.bf16.vlgmr.msra.gmra.mxu0 %vm553_vm2, %v446_v12  ;;  %v1308_v34 = vld [vmem:[%s1513_s11 + $0xd0] sm:$0xff]  ;;  %v1291_v36 = vld [vmem:[%s1513_s11 + $0x48] sm:$0xff]  ;;  %v1282_v39 = vld [vmem:[%s1513_s11] sm:$0xff] }
  0xd2   : > { %874 = vmatpush.bf16.msrb.mxu0 %v1289_v10  ;;  %1128 = vmatmul.msk.bf16.vlgmr.msra.gmra.mxu1 %vm553_vm2, %v446_v12  ;;  %v1299_v37 = vld [vmem:[%s1513_s11 + $0x88] sm:$0xff]  ;;  %v1290_v40 = vld [vmem:[%s1513_s11 + $0x40] sm:$0xff] }
  0xd3   : > { %887 = vmatpush.bf16.msrb.mxu1 %v1297_v11  ;;  %900 = vmatpush.bf16.msrb.mxu2 %v1305_v13  ;;  %v1307_v38 = vld [vmem:[%s1513_s11 + $0xc8] sm:$0xff]  ;;  %v1298_v41 = vld [vmem:[%s1513_s11 + $0x80] sm:$0xff] }
  0xd4   : > { %913 = vmatpush.bf16.msrb.mxu3 %v1313_v14  ;;  %v1306_v42 = vld [vmem:[%s1513_s11 + $0xc0] sm:$0xff] }
  0xd5   : > { %v463_v43 = vld [vmem:[%s386_s23] sm:$0xf]  ;;  %v613_v12 = vld [vmem:[#allocation3] sm:$0xff] }
  0xd6   : > { %875 = vmatpush.bf16.msrb.mxu0 %v1288_v15  ;;  %v465_v44 = vperm.slane %v463_v43, 0  ;;  %v466_v45 = vperm.slane %v463_v43, 1  ;;  %v467_v50 = vperm.slane %v463_v43, 2  ;;  %v468_v52 = vperm.slane %v463_v43, 3 }
  0xd7   : > { %888 = vmatpush.bf16.msrb.mxu1 %v1296_v16  ;;  %901 = vmatpush.bf16.msrb.mxu2 %v1304_v17 }
  0xd8   : > { %914 = vmatpush.bf16.msrb.mxu3 %v1312_v18 }
  0xda   : > { %876 = vmatpush.bf16.msrb.mxu0 %v1287_v19 }
  0xdb   : > { %889 = vmatpush.bf16.msrb.mxu1 %v1295_v20  ;;  %902 = vmatpush.bf16.msrb.mxu2 %v1303_v21 }
  0xdc   : > { %915 = vmatpush.bf16.msrb.mxu3 %v1311_v22 }
  0xde   : > { %877 = vmatpush.bf16.msrb.mxu0 %v1286_v23 }
  0xdf   : > { %890 = vmatpush.bf16.msrb.mxu1 %v1294_v24  ;;  %903 = vmatpush.bf16.msrb.mxu2 %v1302_v25 }
  0xe0   : > { %916 = vmatpush.bf16.msrb.mxu3 %v1310_v26 }
  0xe2   : > { %878 = vmatpush.bf16.msrb.mxu0 %v1285_v27 }
  0xe3   : > { %891 = vmatpush.bf16.msrb.mxu1 %v1293_v28  ;;  %904 = vmatpush.bf16.msrb.mxu2 %v1301_v29 }
  0xe4   : > { %917 = vmatpush.bf16.msrb.mxu3 %v1309_v30 }
  0xe6   : > { %879 = vmatpush.bf16.msrb.mxu0 %v1284_v31 }
  0xe7   : > { %892 = vmatpush.bf16.msrb.mxu1 %v1292_v32  ;;  %905 = vmatpush.bf16.msrb.mxu2 %v1300_v33 }
  0xe8   : > { %918 = vmatpush.bf16.msrb.mxu3 %v1308_v34 }
  0xea   : > { %880 = vmatpush.bf16.msrb.mxu0 %v1283_v35 }
  0xeb   : > { %893 = vmatpush.bf16.msrb.mxu1 %v1291_v36  ;;  %906 = vmatpush.bf16.msrb.mxu2 %v1299_v37 }
  0xec   : > { %919 = vmatpush.bf16.msrb.mxu3 %v1307_v38 }
  0xee   : > { %881 = vmatpush.bf16.msrb.mxu0 %v1282_v39 }
  0xef   : > { %894 = vmatpush.bf16.msrb.mxu1 %v1290_v40  ;;  %907 = vmatpush.bf16.msrb.mxu2 %v1298_v41 }
  0xf0   : > { %920 = vmatpush.bf16.msrb.mxu3 %v1306_v42 }
 0x14e   : > { %v566_v46 = vpop.f32.mrf.mxu0 }
 0x14f   : > { %v567_v47 = vadd.f32 %v566_v46, %v465_v44  ;;  %v579_v48 = vpop.f32.mrf.mxu1 }
 0x150   : > { %v580_v49 = vadd.f32 %v579_v48, %v466_v45 }
 0x151   : > { %v609_v51 = vmax.f32 %v567_v47, 0.0 }
 0x152   : > { %v610_v53 = vmax.f32 %v580_v49, 0.0 }
 0x153   : > { %v614_v54 = vpack.c.bf16 %v609_v51, %v609_v51  ;;  %v592_v55 = vpop.f32.mrf.mxu2 }
 0x154   : > { %v615_v56 = vpack.c.bf16 %v610_v53, %v610_v53  ;;  %v593_v57 = vadd.f32 %v592_v55, %v467_v50  ;;  %v605_v58 = vpop.f32.mrf.mxu3 }
 0x155   : > { %v606_v59 = vadd.f32 %v605_v58, %v468_v52  ;;  %882 = vmatmul.bf16.vlgmr.msrb.gmra.mxu0 %v614_v54 }
 0x156   : > { %v611_v60 = vmax.f32 %v593_v57, 0.0  ;;  %895 = vmatmul.bf16.vlgmr.msrb.gmra.mxu1 %v615_v56  ;;  %v568_v61 = vpop.f32.mrf.mxu0 }
 0x157   : > { %v612_v62 = vmax.f32 %v606_v59, 0.0  ;;  %v581_v63 = vpop.f32.mrf.mxu1 }
 0x158   : > { %v616_v0 = vpack.c.bf16 %v611_v60, %v611_v60 }
 0x159   : > { %v617_v1 = vpack.c.bf16 %v612_v62, %v612_v62 }
 0x15a   : > { %908 = vmatmul.bf16.vlgmr.msrb.gmra.mxu2 %v616_v0 }
 0x15b   : > { %921 = vmatmul.bf16.vlgmr.msrb.gmra.mxu3 %v617_v1  ;;  %v594_v2 = vpop.f32.mrf.mxu2 }
 0x15c   : > { %v607_v3 = vpop.f32.mrf.mxu3 }
 0x1d2   : > { %v883_v4 = vpop.f32.mrf.mxu0 }
 0x1d3   : > { %v896_v5 = vpop.f32.mrf.mxu1 }
 0x1d4   : > { %v897_v6 = vadd.f32 %v896_v5, %v883_v4 }
 0x1da   : > { %v885_v7 = vpop.f32.mrf.mxu0 }
 0x1db   : > { %v898_v8 = vpop.f32.mrf.mxu1 }
 0x1dd   : > { %v909_v9 = vpop.f32.mrf.mxu2 }
 0x1de   : > { %v910_v10 = vadd.f32 %v909_v9, %v897_v6  ;;  %v922_v11 = vpop.f32.mrf.mxu3 }
 0x1e0   : > { %v923_v13 = vadd.f32 %v922_v11, %v910_v10 }
 0x1e2   : > { %v926_v14 = vadd.f32 %v923_v13, %v613_v12  ;;  %931 = sbr.rel (%p1259_p12) target bundleno = 497 (0x1f1), region = 79 }
 0x1e4   : > { %927 = vst [vmem:[#allocation3] sm:$0xff] %v926_v14 }
 0x1e5   : > { %v911_v15 = vpop.f32.mrf.mxu2 }
 0x1e6   : > { %v924_v16 = vpop.f32.mrf.mxu3 }
 0x1e7   : > { %v1356_v18 = vld [vmem:[%s1627_s6] ss:$0 sm:$0xff] }
 0x1eb   : > { %v932_v17 = vld [vmem:[#allocation3] sm:$0xff] }
 0x1ec   : > { %v937_v19 = vadd.f32 %v1356_v18, %v932_v17 }
 0x1ee   : > { %v938_v20 = vpack.c.bf16 %v937_v19, %v937_v19 }
 0x1f0   : > { %939 = vst [vmem:[%s1628_s7] sm:$0xf] %v938_v20 }
 0x1f1 PF: > { %s17_s28 = sadd.s32 1, %s1395_s28   ;;  %s1629_s24 = smov %s1383_s25 }
 0x1f2   : > { %p14_p13 = scmp.ge.s32.totalorder %s17_s28, 10   ;;  %s1630_s25 = smov %s1473_s9 }
 0x1f3   : > { %s1631_s26 = smov %s1391_s27  ;;  %s1632_s27 = smov %s1634_s29 }
 0x1f4   :  { %16 = sbr.rel (!%p14_p13) target bundleno = 3 (0x3), region = 123 }

// kernel: fcn32s_forward.13
= control target key start
LH: loop header
LB: loop body
LE: loop exit
PB: predicated region body
PF: predicated region fallthrough
CT: control target
= control target key end

     0   :  { %s4457_s9 = smov 0   ;;  %s4459_s10 = smov 0   ;;  %s5752_s0 = inlined_call_operand.vmem [shape: bf16[24,512], index: 0, kind: input, shape index: {}]   ;;  %s5753_s1 = inlined_call_operand.vmem [shape: bf16[512,6144], index: 1, kind: input, shape index: {}]   ;;  %s5754_s2 = inlined_call_operand.vmem [shape: f32[24,6144], index: 2, kind: output, shape index: {}]  }
   0x1   :  { %s4461_s11 = smov 0   ;;  %s4463_s12 = smov 0  }
   0x2   :  { %s4465_s13 = smov 0  }
   0x3 LB: > { %s21_s14 = sadd.s32 1, %s4436_s12  ;;  %s3045_s15 = sadd.s32 4294967295, %s4440_s13   ;;  %s4440_s13 = sphi %s4465_s13, %s12_s13   ;;  %s4436_s12 = sphi %s4463_s12, %s5759_s12   ;;  %s4432_s11 = sphi %s4461_s11, %s5758_s11   ;;  %s4428_s10 = sphi %s4459_s10, %s5757_s10   ;;  %s4424_s9 = sphi %s4457_s9, %s5756_s9  }
   0x4   : > { %p22_p0 = scmp.ge.s32.totalorder %s21_s14, 6  ;;  %p64_p1 = scmp.ne.s32.totalorder %s4428_s10, %s4424_s9 }
   0x5   : > { %p65_p2 = scmp.eq.s32.totalorder %s4440_s13, 0  ;;  %p96_p4 = scmp.eq.s32.totalorder %s3045_s15, 5 }
   0x6   : > { %s5761_s14 = smov (%p22_p0, %s21_s14), 0  ;;  %s57_s17 = sadd.s32 1, %s4428_s10 }
   0x7   : > { %p66_p3 = por %p65_p2, %p64_p1  ;;  %s54_s16 = ssub.s32 %s4436_s12, %s5761_s14 }
   0x8   : > { %p55_p5 = scmp.eq.s32.totalorder %s54_s16, 0  ;;  %p4492_p6 = por %p96_p4, %p64_p1 }
   0x9   : > { %p3049_p7 = scmp.ge.s32.totalorder %s4440_s13, 6 }
   0xa   : > { %s4497_s19 = scalar_select %p55_p5, %s4428_s10, %s57_s17  }
   0xb   : > { %128 = sbr.rel (%p3049_p7) target bundleno = 276 (0x114), region = 20 }
  0x10   : > { %131 = sbr.rel (!%p66_p3) target bundleno = 276 (0x114), region = 24  ;;  %s133_s20 = sand.u32 (%p66_p3), 1, %s4428_s10  }
  0x11   : > { %s4099_s21 = sshll.u32 (%p66_p3), %s4436_s12, 5  ;;  %s3050_s22 = sshll.u32 (%p66_p3), %s133_s20, 11 }
  0x12   : > { %s4505_s25 = scalar_lea.vmem (%p66_p3), %s5753_s1, %s4099_s21  ;;  %s4510_s26 = scalar_lea.vmem (%p66_p3), [#allocation2], %s3050_s22 }
  0x13   : > { %v151_v0 = vld [vmem:[%s4505_s25] sm:$0xff] (%p66_p3)  ;;  %v153_v1 = vld [vmem:[%s4505_s25 + $0x8] sm:$0xff] (%p66_p3)  ;;  %v155_v2 = vld [vmem:[%s4505_s25 + $0x10] sm:$0xff] (%p66_p3) }
  0x14   : > { %152 = vst [vmem:[%s4510_s26] sm:$0xff] (%p66_p3), %v151_v0  ;;  %v157_v3 = vld [vmem:[%s4505_s25 + $0x18] sm:$0xff] (%p66_p3)  ;;  %v159_v4 = vld [vmem:[%s4505_s25 + $0xc0] sm:$0xff] (%p66_p3)  ;;  %v161_v5 = vld [vmem:[%s4505_s25 + $0xc8] sm:$0xff] (%p66_p3) }
  0x15   : > { %154 = vst [vmem:[%s4510_s26 + $0x8] sm:$0xff] %v153_v1  ;;  %v163_v6 = vld [vmem:[%s4505_s25 + $0xd0] sm:$0xff]  ;;  %v165_v7 = vld [vmem:[%s4505_s25 + $0xd8] sm:$0xff]  ;;  %v167_v8 = vld [vmem:[%s4505_s25 + $0x180] sm:$0xff] }
  0x16   : > { %156 = vst [vmem:[%s4510_s26 + $0x10] sm:$0xff] %v155_v2  ;;  %v169_v9 = vld [vmem:[%s4505_s25 + $0x188] sm:$0xff]  ;;  %v171_v10 = vld [vmem:[%s4505_s25 + $0x190] sm:$0xff]  ;;  %v173_v11 = vld [vmem:[%s4505_s25 + $0x198] sm:$0xff] }
  0x17   : > { %158 = vst [vmem:[%s4510_s26 + $0x18] sm:$0xff] %v157_v3  ;;  %v175_v12 = vld [vmem:[%s4505_s25 + $0x240] sm:$0xff]  ;;  %v177_v13 = vld [vmem:[%s4505_s25 + $0x248] sm:$0xff]  ;;  %v179_v14 = vld [vmem:[%s4505_s25 + $0x250] sm:$0xff] }
  0x18   : > { %160 = vst [vmem:[%s4510_s26 + $0x20] sm:$0xff] %v159_v4  ;;  %v181_v15 = vld [vmem:[%s4505_s25 + $0x258] sm:$0xff]  ;;  %v183_v16 = vld [vmem:[%s4505_s25 + $0x300] sm:$0xff]  ;;  %v185_v17 = vld [vmem:[%s4505_s25 + $0x308] sm:$0xff] }
  0x19   : > { %162 = vst [vmem:[%s4510_s26 + $0x28] sm:$0xff] %v161_v5  ;;  %v187_v18 = vld [vmem:[%s4505_s25 + $0x310] sm:$0xff]  ;;  %v189_v19 = vld [vmem:[%s4505_s25 + $0x318] sm:$0xff]  ;;  %v191_v20 = vld [vmem:[%s4505_s25 + $0x3c0] sm:$0xff] }
  0x1a   : > { %164 = vst [vmem:[%s4510_s26 + $0x30] sm:$0xff] %v163_v6  ;;  %v193_v21 = vld [vmem:[%s4505_s25 + $0x3c8] sm:$0xff]  ;;  %v195_v22 = vld [vmem:[%s4505_s25 + $0x3d0] sm:$0xff]  ;;  %v197_v23 = vld [vmem:[%s4505_s25 + $0x3d8] sm:$0xff] }
  0x1b   : > { %166 = vst [vmem:[%s4510_s26 + $0x38] sm:$0xff] %v165_v7  ;;  %v199_v24 = vld [vmem:[%s4505_s25 + $0x480] sm:$0xff]  ;;  %v201_v25 = vld [vmem:[%s4505_s25 + $0x488] sm:$0xff]  ;;  %v203_v26 = vld [vmem:[%s4505_s25 + $0x490] sm:$0xff] }
  0x1c   : > { %168 = vst [vmem:[%s4510_s26 + $0x40] sm:$0xff] %v167_v8  ;;  %v205_v27 = vld [vmem:[%s4505_s25 + $0x498] sm:$0xff]  ;;  %v207_v28 = vld [vmem:[%s4505_s25 + $0x540] sm:$0xff]  ;;  %v209_v29 = vld [vmem:[%s4505_s25 + $0x548] sm:$0xff] }
  0x1d   : > { %170 = vst [vmem:[%s4510_s26 + $0x48] sm:$0xff] %v169_v9  ;;  %v211_v30 = vld [vmem:[%s4505_s25 + $0x550] sm:$0xff]  ;;  %v213_v31 = vld [vmem:[%s4505_s25 + $0x558] sm:$0xff]  ;;  %v215_v32 = vld [vmem:[%s4505_s25 + $0x600] sm:$0xff] }
  0x1e   : > { %172 = vst [vmem:[%s4510_s26 + $0x50] sm:$0xff] %v171_v10  ;;  %v217_v33 = vld [vmem:[%s4505_s25 + $0x608] sm:$0xff]  ;;  %v219_v34 = vld [vmem:[%s4505_s25 + $0x610] sm:$0xff]  ;;  %v221_v35 = vld [vmem:[%s4505_s25 + $0x618] sm:$0xff] }
  0x1f   : > { %174 = vst [vmem:[%s4510_s26 + $0x58] sm:$0xff] %v173_v11  ;;  %v223_v36 = vld [vmem:[%s4505_s25 + $0x6c0] sm:$0xff]  ;;  %v225_v37 = vld [vmem:[%s4505_s25 + $0x6c8] sm:$0xff]  ;;  %v227_v38 = vld [vmem:[%s4505_s25 + $0x6d0] sm:$0xff] }
  0x20   : > { %176 = vst [vmem:[%s4510_s26 + $0x60] sm:$0xff] %v175_v12  ;;  %v229_v39 = vld [vmem:[%s4505_s25 + $0x6d8] sm:$0xff]  ;;  %v231_v40 = vld [vmem:[%s4505_s25 + $0x780] sm:$0xff]  ;;  %v233_v41 = vld [vmem:[%s4505_s25 + $0x788] sm:$0xff] }
  0x21   : > { %178 = vst [vmem:[%s4510_s26 + $0x68] sm:$0xff] %v177_v13  ;;  %v235_v42 = vld [vmem:[%s4505_s25 + $0x790] sm:$0xff]  ;;  %v237_v43 = vld [vmem:[%s4505_s25 + $0x798] sm:$0xff]  ;;  %v239_v44 = vld [vmem:[%s4505_s25 + $0x840] sm:$0xff] }
  0x22   : > { %180 = vst [vmem:[%s4510_s26 + $0x70] sm:$0xff] %v179_v14  ;;  %v241_v45 = vld [vmem:[%s4505_s25 + $0x848] sm:$0xff]  ;;  %v243_v46 = vld [vmem:[%s4505_s25 + $0x850] sm:$0xff]  ;;  %v245_v47 = vld [vmem:[%s4505_s25 + $0x858] sm:$0xff] }
  0x23   : > { %182 = vst [vmem:[%s4510_s26 + $0x78] sm:$0xff] %v181_v15  ;;  %v247_v48 = vld [vmem:[%s4505_s25 + $0x900] sm:$0xff]  ;;  %v249_v49 = vld [vmem:[%s4505_s25 + $0x908] sm:$0xff]  ;;  %v251_v50 = vld [vmem:[%s4505_s25 + $0x910] sm:$0xff] }
  0x24   : > { %184 = vst [vmem:[%s4510_s26 + $0x80] sm:$0xff] %v183_v16  ;;  %v253_v51 = vld [vmem:[%s4505_s25 + $0x918] sm:$0xff]  ;;  %v255_v52 = vld [vmem:[%s4505_s25 + $0x9c0] sm:$0xff]  ;;  %v257_v53 = vld [vmem:[%s4505_s25 + $0x9c8] sm:$0xff] }
  0x25   : > { %186 = vst [vmem:[%s4510_s26 + $0x88] sm:$0xff] %v185_v17  ;;  %v259_v54 = vld [vmem:[%s4505_s25 + $0x9d0] sm:$0xff]  ;;  %v261_v55 = vld [vmem:[%s4505_s25 + $0x9d8] sm:$0xff]  ;;  %v263_v56 = vld [vmem:[%s4505_s25 + $0xa80] sm:$0xff] }
  0x26   : > { %188 = vst [vmem:[%s4510_s26 + $0x90] sm:$0xff] %v187_v18  ;;  %v265_v57 = vld [vmem:[%s4505_s25 + $0xa88] sm:$0xff]  ;;  %v267_v58 = vld [vmem:[%s4505_s25 + $0xa90] sm:$0xff]  ;;  %v269_v59 = vld [vmem:[%s4505_s25 + $0xa98] sm:$0xff] }
  0x27   : > { %190 = vst [vmem:[%s4510_s26 + $0x98] sm:$0xff] %v189_v19  ;;  %v271_v60 = vld [vmem:[%s4505_s25 + $0xb40] sm:$0xff]  ;;  %v273_v61 = vld [vmem:[%s4505_s25 + $0xb48] sm:$0xff]  ;;  %v275_v62 = vld [vmem:[%s4505_s25 + $0xb50] sm:$0xff] }
  0x28   : > { %192 = vst [vmem:[%s4510_s26 + $0xa0] sm:$0xff] %v191_v20  ;;  %v277_v63 = vld [vmem:[%s4505_s25 + $0xb58] sm:$0xff]  ;;  %v279_v0 = vld [vmem:[%s4505_s25 + $0xc00] sm:$0xff]  ;;  %v281_v1 = vld [vmem:[%s4505_s25 + $0xc08] sm:$0xff] }
  0x29   : > { %194 = vst [vmem:[%s4510_s26 + $0xa8] sm:$0xff] %v193_v21  ;;  %v283_v2 = vld [vmem:[%s4505_s25 + $0xc10] sm:$0xff]  ;;  %v285_v3 = vld [vmem:[%s4505_s25 + $0xc18] sm:$0xff]  ;;  %v287_v4 = vld [vmem:[%s4505_s25 + $0xcc0] sm:$0xff] }
  0x2a   : > { %196 = vst [vmem:[%s4510_s26 + $0xb0] sm:$0xff] %v195_v22  ;;  %v289_v5 = vld [vmem:[%s4505_s25 + $0xcc8] sm:$0xff]  ;;  %v291_v6 = vld [vmem:[%s4505_s25 + $0xcd0] sm:$0xff]  ;;  %v293_v7 = vld [vmem:[%s4505_s25 + $0xcd8] sm:$0xff] }
  0x2b   : > { %198 = vst [vmem:[%s4510_s26 + $0xb8] sm:$0xff] %v197_v23  ;;  %v295_v8 = vld [vmem:[%s4505_s25 + $0xd80] sm:$0xff]  ;;  %v297_v9 = vld [vmem:[%s4505_s25 + $0xd88] sm:$0xff]  ;;  %v299_v10 = vld [vmem:[%s4505_s25 + $0xd90] sm:$0xff] }
  0x2c   : > { %200 = vst [vmem:[%s4510_s26 + $0xc0] sm:$0xff] %v199_v24  ;;  %v301_v11 = vld [vmem:[%s4505_s25 + $0xd98] sm:$0xff]  ;;  %v303_v12 = vld [vmem:[%s4505_s25 + $0xe40] sm:$0xff]  ;;  %v305_v13 = vld [vmem:[%s4505_s25 + $0xe48] sm:$0xff] }
  0x2d   : > { %202 = vst [vmem:[%s4510_s26 + $0xc8] sm:$0xff] %v201_v25  ;;  %v307_v14 = vld [vmem:[%s4505_s25 + $0xe50] sm:$0xff]  ;;  %v309_v15 = vld [vmem:[%s4505_s25 + $0xe58] sm:$0xff]  ;;  %v311_v16 = vld [vmem:[%s4505_s25 + $0xf00] sm:$0xff] }
  0x2e   : > { %204 = vst [vmem:[%s4510_s26 + $0xd0] sm:$0xff] %v203_v26  ;;  %v313_v17 = vld [vmem:[%s4505_s25 + $0xf08] sm:$0xff]  ;;  %v315_v18 = vld [vmem:[%s4505_s25 + $0xf10] sm:$0xff]  ;;  %v317_v19 = vld [vmem:[%s4505_s25 + $0xf18] sm:$0xff] }
  0x2f   : > { %206 = vst [vmem:[%s4510_s26 + $0xd8] sm:$0xff] %v205_v27  ;;  %v319_v20 = vld [vmem:[%s4505_s25 + $0xfc0] sm:$0xff]  ;;  %v321_v21 = vld [vmem:[%s4505_s25 + $0xfc8] sm:$0xff]  ;;  %v323_v22 = vld [vmem:[%s4505_s25 + $0xfd0] sm:$0xff] }
  0x30   : > { %208 = vst [vmem:[%s4510_s26 + $0xe0] sm:$0xff] %v207_v28  ;;  %v325_v23 = vld [vmem:[%s4505_s25 + $0xfd8] sm:$0xff]  ;;  %v327_v24 = vld [vmem:[%s4505_s25 + $0x1080] sm:$0xff]  ;;  %v329_v25 = vld [vmem:[%s4505_s25 + $0x1088] sm:$0xff] }
  0x31   : > { %210 = vst [vmem:[%s4510_s26 + $0xe8] sm:$0xff] %v209_v29  ;;  %v331_v26 = vld [vmem:[%s4505_s25 + $0x1090] sm:$0xff]  ;;  %v333_v27 = vld [vmem:[%s4505_s25 + $0x1098] sm:$0xff]  ;;  %v335_v28 = vld [vmem:[%s4505_s25 + $0x1140] sm:$0xff] }
  0x32   : > { %212 = vst [vmem:[%s4510_s26 + $0xf0] sm:$0xff] %v211_v30  ;;  %v337_v29 = vld [vmem:[%s4505_s25 + $0x1148] sm:$0xff]  ;;  %v339_v30 = vld [vmem:[%s4505_s25 + $0x1150] sm:$0xff] }
  0x33   : > { %214 = vst [vmem:[%s4510_s26 + $0xf8] sm:$0xff] %v213_v31  ;;  %v341_v31 = vld [vmem:[%s4505_s25 + $0x1158] sm:$0xff] }
  0x34   : > { %216 = vst [vmem:[%s4510_s26 + $0x100] sm:$0xff] %v215_v32  ;;  %v343_v32 = vld [vmem:[%s4505_s25 + $0x1200] sm:$0xff] }
  0x35   : > { %218 = vst [vmem:[%s4510_s26 + $0x108] sm:$0xff] %v217_v33  ;;  %v345_v33 = vld [vmem:[%s4505_s25 + $0x1208] sm:$0xff] }
  0x36   : > { %220 = vst [vmem:[%s4510_s26 + $0x110] sm:$0xff] %v219_v34  ;;  %v347_v34 = vld [vmem:[%s4505_s25 + $0x1210] sm:$0xff] }
  0x37   : > { %222 = vst [vmem:[%s4510_s26 + $0x118] sm:$0xff] %v221_v35  ;;  %v349_v35 = vld [vmem:[%s4505_s25 + $0x1218] sm:$0xff] }
  0x38   : > { %224 = vst [vmem:[%s4510_s26 + $0x120] sm:$0xff] %v223_v36  ;;  %v351_v36 = vld [vmem:[%s4505_s25 + $0x12c0] sm:$0xff] }
  0x39   : > { %226 = vst [vmem:[%s4510_s26 + $0x128] sm:$0xff] %v225_v37  ;;  %v353_v37 = vld [vmem:[%s4505_s25 + $0x12c8] sm:$0xff] }
  0x3a   : > { %228 = vst [vmem:[%s4510_s26 + $0x130] sm:$0xff] %v227_v38  ;;  %v355_v38 = vld [vmem:[%s4505_s25 + $0x12d0] sm:$0xff] }
  0x3b   : > { %230 = vst [vmem:[%s4510_s26 + $0x138] sm:$0xff] %v229_v39  ;;  %v357_v39 = vld [vmem:[%s4505_s25 + $0x12d8] sm:$0xff] }
  0x3c   : > { %232 = vst [vmem:[%s4510_s26 + $0x140] sm:$0xff] %v231_v40  ;;  %v359_v40 = vld [vmem:[%s4505_s25 + $0x1380] sm:$0xff] }
  0x3d   : > { %234 = vst [vmem:[%s4510_s26 + $0x148] sm:$0xff] %v233_v41  ;;  %v361_v41 = vld [vmem:[%s4505_s25 + $0x1388] sm:$0xff] }
  0x3e   : > { %236 = vst [vmem:[%s4510_s26 + $0x150] sm:$0xff] %v235_v42  ;;  %v363_v42 = vld [vmem:[%s4505_s25 + $0x1390] sm:$0xff] }
  0x3f   : > { %238 = vst [vmem:[%s4510_s26 + $0x158] sm:$0xff] %v237_v43  ;;  %v365_v43 = vld [vmem:[%s4505_s25 + $0x1398] sm:$0xff] }
  0x40   : > { %240 = vst [vmem:[%s4510_s26 + $0x160] sm:$0xff] %v239_v44  ;;  %v367_v44 = vld [vmem:[%s4505_s25 + $0x1440] sm:$0xff] }
  0x41   : > { %242 = vst [vmem:[%s4510_s26 + $0x168] sm:$0xff] %v241_v45  ;;  %v369_v45 = vld [vmem:[%s4505_s25 + $0x1448] sm:$0xff] }
  0x42   : > { %244 = vst [vmem:[%s4510_s26 + $0x170] sm:$0xff] %v243_v46  ;;  %v371_v46 = vld [vmem:[%s4505_s25 + $0x1450] sm:$0xff] }
  0x43   : > { %246 = vst [vmem:[%s4510_s26 + $0x178] sm:$0xff] %v245_v47  ;;  %v373_v47 = vld [vmem:[%s4505_s25 + $0x1458] sm:$0xff] }
  0x44   : > { %248 = vst [vmem:[%s4510_s26 + $0x180] sm:$0xff] %v247_v48  ;;  %v375_v48 = vld [vmem:[%s4505_s25 + $0x1500] sm:$0xff] }
  0x45   : > { %250 = vst [vmem:[%s4510_s26 + $0x188] sm:$0xff] %v249_v49  ;;  %v377_v49 = vld [vmem:[%s4505_s25 + $0x1508] sm:$0xff] }
  0x46   : > { %252 = vst [vmem:[%s4510_s26 + $0x190] sm:$0xff] %v251_v50  ;;  %v379_v50 = vld [vmem:[%s4505_s25 + $0x1510] sm:$0xff] }
  0x47   : > { %254 = vst [vmem:[%s4510_s26 + $0x198] sm:$0xff] %v253_v51  ;;  %v381_v51 = vld [vmem:[%s4505_s25 + $0x1518] sm:$0xff] }
  0x48   : > { %256 = vst [vmem:[%s4510_s26 + $0x1a0] sm:$0xff] %v255_v52  ;;  %v383_v52 = vld [vmem:[%s4505_s25 + $0x15c0] sm:$0xff] }
  0x49   : > { %258 = vst [vmem:[%s4510_s26 + $0x1a8] sm:$0xff] %v257_v53  ;;  %v385_v53 = vld [vmem:[%s4505_s25 + $0x15c8] sm:$0xff] }
  0x4a   : > { %260 = vst [vmem:[%s4510_s26 + $0x1b0] sm:$0xff] %v259_v54  ;;  %v387_v54 = vld [vmem:[%s4505_s25 + $0x15d0] sm:$0xff] }
  0x4b   : > { %262 = vst [vmem:[%s4510_s26 + $0x1b8] sm:$0xff] %v261_v55  ;;  %v389_v55 = vld [vmem:[%s4505_s25 + $0x15d8] sm:$0xff] }
  0x4c   : > { %264 = vst [vmem:[%s4510_s26 + $0x1c0] sm:$0xff] %v263_v56  ;;  %v391_v56 = vld [vmem:[%s4505_s25 + $0x1680] sm:$0xff] }
  0x4d   : > { %266 = vst [vmem:[%s4510_s26 + $0x1c8] sm:$0xff] %v265_v57  ;;  %v393_v57 = vld [vmem:[%s4505_s25 + $0x1688] sm:$0xff] }
  0x4e   : > { %268 = vst [vmem:[%s4510_s26 + $0x1d0] sm:$0xff] %v267_v58  ;;  %v395_v58 = vld [vmem:[%s4505_s25 + $0x1690] sm:$0xff] }
  0x4f   : > { %270 = vst [vmem:[%s4510_s26 + $0x1d8] sm:$0xff] %v269_v59  ;;  %v397_v59 = vld [vmem:[%s4505_s25 + $0x1698] sm:$0xff] }
  0x50   : > { %272 = vst [vmem:[%s4510_s26 + $0x1e0] sm:$0xff] %v271_v60  ;;  %v399_v60 = vld [vmem:[%s4505_s25 + $0x1740] sm:$0xff] }
  0x51   : > { %274 = vst [vmem:[%s4510_s26 + $0x1e8] sm:$0xff] %v273_v61  ;;  %v401_v61 = vld [vmem:[%s4505_s25 + $0x1748] sm:$0xff] }
  0x52   : > { %276 = vst [vmem:[%s4510_s26 + $0x1f0] sm:$0xff] %v275_v62  ;;  %v403_v62 = vld [vmem:[%s4505_s25 + $0x1750] sm:$0xff] }
  0x53   : > { %278 = vst [vmem:[%s4510_s26 + $0x1f8] sm:$0xff] %v277_v63  ;;  %v405_v63 = vld [vmem:[%s4505_s25 + $0x1758] sm:$0xff] }
  0x54   : > { %280 = vst [vmem:[%s4510_s26 + $0x200] sm:$0xff] %v279_v0  ;;  %v407_v0 = vld [vmem:[%s4505_s25 + $0x1800] sm:$0xff] }
  0x55   : > { %282 = vst [vmem:[%s4510_s26 + $0x208] sm:$0xff] %v281_v1  ;;  %v409_v1 = vld [vmem:[%s4505_s25 + $0x1808] sm:$0xff] }
  0x56   : > { %284 = vst [vmem:[%s4510_s26 + $0x210] sm:$0xff] %v283_v2  ;;  %v411_v2 = vld [vmem:[%s4505_s25 + $0x1810] sm:$0xff] }
  0x57   : > { %286 = vst [vmem:[%s4510_s26 + $0x218] sm:$0xff] %v285_v3  ;;  %v413_v3 = vld [vmem:[%s4505_s25 + $0x1818] sm:$0xff] }
  0x58   : > { %288 = vst [vmem:[%s4510_s26 + $0x220] sm:$0xff] %v287_v4  ;;  %v415_v4 = vld [vmem:[%s4505_s25 + $0x18c0] sm:$0xff] }
  0x59   : > { %290 = vst [vmem:[%s4510_s26 + $0x228] sm:$0xff] %v289_v5  ;;  %v417_v5 = vld [vmem:[%s4505_s25 + $0x18c8] sm:$0xff] }
  0x5a   : > { %292 = vst [vmem:[%s4510_s26 + $0x230] sm:$0xff] %v291_v6  ;;  %v419_v6 = vld [vmem:[%s4505_s25 + $0x18d0] sm:$0xff] }
  0x5b   : > { %294 = vst [vmem:[%s4510_s26 + $0x238] sm:$0xff] %v293_v7  ;;  %v421_v7 = vld [vmem:[%s4505_s25 + $0x18d8] sm:$0xff] }
  0x5c   : > { %296 = vst [vmem:[%s4510_s26 + $0x240] sm:$0xff] %v295_v8  ;;  %v423_v8 = vld [vmem:[%s4505_s25 + $0x1980] sm:$0xff] }
  0x5d   : > { %298 = vst [vmem:[%s4510_s26 + $0x248] sm:$0xff] %v297_v9  ;;  %v425_v9 = vld [vmem:[%s4505_s25 + $0x1988] sm:$0xff] }
  0x5e   : > { %300 = vst [vmem:[%s4510_s26 + $0x250] sm:$0xff] %v299_v10  ;;  %v427_v10 = vld [vmem:[%s4505_s25 + $0x1990] sm:$0xff] }
  0x5f   : > { %302 = vst [vmem:[%s4510_s26 + $0x258] sm:$0xff] %v301_v11  ;;  %v429_v11 = vld [vmem:[%s4505_s25 + $0x1998] sm:$0xff] }
  0x60   : > { %304 = vst [vmem:[%s4510_s26 + $0x260] sm:$0xff] %v303_v12  ;;  %v431_v12 = vld [vmem:[%s4505_s25 + $0x1a40] sm:$0xff] }
  0x61   : > { %306 = vst [vmem:[%s4510_s26 + $0x268] sm:$0xff] %v305_v13  ;;  %v433_v13 = vld [vmem:[%s4505_s25 + $0x1a48] sm:$0xff] }
  0x62   : > { %308 = vst [vmem:[%s4510_s26 + $0x270] sm:$0xff] %v307_v14  ;;  %v435_v14 = vld [vmem:[%s4505_s25 + $0x1a50] sm:$0xff] }
  0x63   : > { %310 = vst [vmem:[%s4510_s26 + $0x278] sm:$0xff] %v309_v15  ;;  %v437_v15 = vld [vmem:[%s4505_s25 + $0x1a58] sm:$0xff] }
  0x64   : > { %312 = vst [vmem:[%s4510_s26 + $0x280] sm:$0xff] %v311_v16  ;;  %v439_v16 = vld [vmem:[%s4505_s25 + $0x1b00] sm:$0xff] }
  0x65   : > { %314 = vst [vmem:[%s4510_s26 + $0x288] sm:$0xff] %v313_v17  ;;  %v441_v17 = vld [vmem:[%s4505_s25 + $0x1b08] sm:$0xff] }
  0x66   : > { %316 = vst [vmem:[%s4510_s26 + $0x290] sm:$0xff] %v315_v18  ;;  %v443_v18 = vld [vmem:[%s4505_s25 + $0x1b10] sm:$0xff] }
  0x67   : > { %318 = vst [vmem:[%s4510_s26 + $0x298] sm:$0xff] %v317_v19  ;;  %v445_v19 = vld [vmem:[%s4505_s25 + $0x1b18] sm:$0xff] }
  0x68   : > { %320 = vst [vmem:[%s4510_s26 + $0x2a0] sm:$0xff] %v319_v20  ;;  %v447_v20 = vld [vmem:[%s4505_s25 + $0x1bc0] sm:$0xff] }
  0x69   : > { %322 = vst [vmem:[%s4510_s26 + $0x2a8] sm:$0xff] %v321_v21  ;;  %v449_v21 = vld [vmem:[%s4505_s25 + $0x1bc8] sm:$0xff] }
  0x6a   : > { %324 = vst [vmem:[%s4510_s26 + $0x2b0] sm:$0xff] %v323_v22  ;;  %v451_v22 = vld [vmem:[%s4505_s25 + $0x1bd0] sm:$0xff] }
  0x6b   : > { %326 = vst [vmem:[%s4510_s26 + $0x2b8] sm:$0xff] %v325_v23  ;;  %v453_v23 = vld [vmem:[%s4505_s25 + $0x1bd8] sm:$0xff] }
  0x6c   : > { %328 = vst [vmem:[%s4510_s26 + $0x2c0] sm:$0xff] %v327_v24  ;;  %v455_v24 = vld [vmem:[%s4505_s25 + $0x1c80] sm:$0xff] }
  0x6d   : > { %330 = vst [vmem:[%s4510_s26 + $0x2c8] sm:$0xff] %v329_v25  ;;  %v457_v25 = vld [vmem:[%s4505_s25 + $0x1c88] sm:$0xff] }
  0x6e   : > { %332 = vst [vmem:[%s4510_s26 + $0x2d0] sm:$0xff] %v331_v26  ;;  %v459_v26 = vld [vmem:[%s4505_s25 + $0x1c90] sm:$0xff] }
  0x6f   : > { %334 = vst [vmem:[%s4510_s26 + $0x2d8] sm:$0xff] %v333_v27  ;;  %v461_v27 = vld [vmem:[%s4505_s25 + $0x1c98] sm:$0xff] }
  0x70   : > { %336 = vst [vmem:[%s4510_s26 + $0x2e0] sm:$0xff] %v335_v28  ;;  %v463_v28 = vld [vmem:[%s4505_s25 + $0x1d40] sm:$0xff] }
  0x71   : > { %338 = vst [vmem:[%s4510_s26 + $0x2e8] sm:$0xff] %v337_v29  ;;  %v465_v29 = vld [vmem:[%s4505_s25 + $0x1d48] sm:$0xff] }
  0x72   : > { %340 = vst [vmem:[%s4510_s26 + $0x2f0] sm:$0xff] %v339_v30  ;;  %v467_v30 = vld [vmem:[%s4505_s25 + $0x1d50] sm:$0xff] }
  0x73   : > { %342 = vst [vmem:[%s4510_s26 + $0x2f8] sm:$0xff] %v341_v31  ;;  %v469_v31 = vld [vmem:[%s4505_s25 + $0x1d58] sm:$0xff] }
  0x74   : > { %344 = vst [vmem:[%s4510_s26 + $0x300] sm:$0xff] %v343_v32  ;;  %v471_v32 = vld [vmem:[%s4505_s25 + $0x1e00] sm:$0xff] }
  0x75   : > { %346 = vst [vmem:[%s4510_s26 + $0x308] sm:$0xff] %v345_v33  ;;  %v473_v33 = vld [vmem:[%s4505_s25 + $0x1e08] sm:$0xff] }
  0x76   : > { %348 = vst [vmem:[%s4510_s26 + $0x310] sm:$0xff] %v347_v34  ;;  %v475_v34 = vld [vmem:[%s4505_s25 + $0x1e10] sm:$0xff] }
  0x77   : > { %350 = vst [vmem:[%s4510_s26 + $0x318] sm:$0xff] %v349_v35  ;;  %v477_v35 = vld [vmem:[%s4505_s25 + $0x1e18] sm:$0xff] }
  0x78   : > { %352 = vst [vmem:[%s4510_s26 + $0x320] sm:$0xff] %v351_v36  ;;  %v479_v36 = vld [vmem:[%s4505_s25 + $0x1ec0] sm:$0xff] }
  0x79   : > { %354 = vst [vmem:[%s4510_s26 + $0x328] sm:$0xff] %v353_v37  ;;  %v481_v37 = vld [vmem:[%s4505_s25 + $0x1ec8] sm:$0xff] }
  0x7a   : > { %356 = vst [vmem:[%s4510_s26 + $0x330] sm:$0xff] %v355_v38  ;;  %v483_v38 = vld [vmem:[%s4505_s25 + $0x1ed0] sm:$0xff] }
  0x7b   : > { %358 = vst [vmem:[%s4510_s26 + $0x338] sm:$0xff] %v357_v39  ;;  %v485_v39 = vld [vmem:[%s4505_s25 + $0x1ed8] sm:$0xff] }
  0x7c   : > { %360 = vst [vmem:[%s4510_s26 + $0x340] sm:$0xff] %v359_v40  ;;  %v487_v40 = vld [vmem:[%s4505_s25 + $0x1f80] sm:$0xff] }
  0x7d   : > { %362 = vst [vmem:[%s4510_s26 + $0x348] sm:$0xff] %v361_v41  ;;  %v489_v41 = vld [vmem:[%s4505_s25 + $0x1f88] sm:$0xff] }
  0x7e   : > { %364 = vst [vmem:[%s4510_s26 + $0x350] sm:$0xff] %v363_v42  ;;  %v491_v42 = vld [vmem:[%s4505_s25 + $0x1f90] sm:$0xff] }
  0x7f   : > { %366 = vst [vmem:[%s4510_s26 + $0x358] sm:$0xff] %v365_v43  ;;  %v493_v43 = vld [vmem:[%s4505_s25 + $0x1f98] sm:$0xff] }
  0x80   : > { %368 = vst [vmem:[%s4510_s26 + $0x360] sm:$0xff] %v367_v44  ;;  %v495_v44 = vld [vmem:[%s4505_s25 + $0x2040] sm:$0xff] }
  0x81   : > { %370 = vst [vmem:[%s4510_s26 + $0x368] sm:$0xff] %v369_v45  ;;  %v497_v45 = vld [vmem:[%s4505_s25 + $0x2048] sm:$0xff] }
  0x82   : > { %372 = vst [vmem:[%s4510_s26 + $0x370] sm:$0xff] %v371_v46  ;;  %v499_v46 = vld [vmem:[%s4505_s25 + $0x2050] sm:$0xff] }
  0x83   : > { %374 = vst [vmem:[%s4510_s26 + $0x378] sm:$0xff] %v373_v47  ;;  %v501_v47 = vld [vmem:[%s4505_s25 + $0x2058] sm:$0xff] }
  0x84   : > { %376 = vst [vmem:[%s4510_s26 + $0x380] sm:$0xff] %v375_v48  ;;  %v503_v48 = vld [vmem:[%s4505_s25 + $0x2100] sm:$0xff] }
  0x85   : > { %378 = vst [vmem:[%s4510_s26 + $0x388] sm:$0xff] %v377_v49  ;;  %v505_v49 = vld [vmem:[%s4505_s25 + $0x2108] sm:$0xff] }
  0x86   : > { %380 = vst [vmem:[%s4510_s26 + $0x390] sm:$0xff] %v379_v50  ;;  %v507_v50 = vld [vmem:[%s4505_s25 + $0x2110] sm:$0xff] }
  0x87   : > { %382 = vst [vmem:[%s4510_s26 + $0x398] sm:$0xff] %v381_v51  ;;  %v509_v51 = vld [vmem:[%s4505_s25 + $0x2118] sm:$0xff] }
  0x88   : > { %384 = vst [vmem:[%s4510_s26 + $0x3a0] sm:$0xff] %v383_v52  ;;  %v511_v52 = vld [vmem:[%s4505_s25 + $0x21c0] sm:$0xff] }
  0x89   : > { %386 = vst [vmem:[%s4510_s26 + $0x3a8] sm:$0xff] %v385_v53  ;;  %v513_v53 = vld [vmem:[%s4505_s25 + $0x21c8] sm:$0xff] }
  0x8a   : > { %388 = vst [vmem:[%s4510_s26 + $0x3b0] sm:$0xff] %v387_v54  ;;  %v515_v54 = vld [vmem:[%s4505_s25 + $0x21d0] sm:$0xff] }
  0x8b   : > { %390 = vst [vmem:[%s4510_s26 + $0x3b8] sm:$0xff] %v389_v55  ;;  %v517_v55 = vld [vmem:[%s4505_s25 + $0x21d8] sm:$0xff] }
  0x8c   : > { %392 = vst [vmem:[%s4510_s26 + $0x3c0] sm:$0xff] %v391_v56  ;;  %v519_v56 = vld [vmem:[%s4505_s25 + $0x2280] sm:$0xff] }
  0x8d   : > { %394 = vst [vmem:[%s4510_s26 + $0x3c8] sm:$0xff] %v393_v57  ;;  %v521_v57 = vld [vmem:[%s4505_s25 + $0x2288] sm:$0xff] }
  0x8e   : > { %396 = vst [vmem:[%s4510_s26 + $0x3d0] sm:$0xff] %v395_v58  ;;  %v523_v58 = vld [vmem:[%s4505_s25 + $0x2290] sm:$0xff] }
  0x8f   : > { %398 = vst [vmem:[%s4510_s26 + $0x3d8] sm:$0xff] %v397_v59  ;;  %v525_v59 = vld [vmem:[%s4505_s25 + $0x2298] sm:$0xff] }
  0x90   : > { %400 = vst [vmem:[%s4510_s26 + $0x3e0] sm:$0xff] %v399_v60  ;;  %v527_v60 = vld [vmem:[%s4505_s25 + $0x2340] sm:$0xff] }
  0x91   : > { %402 = vst [vmem:[%s4510_s26 + $0x3e8] sm:$0xff] %v401_v61  ;;  %v529_v61 = vld [vmem:[%s4505_s25 + $0x2348] sm:$0xff] }
  0x92   : > { %404 = vst [vmem:[%s4510_s26 + $0x3f0] sm:$0xff] %v403_v62  ;;  %v531_v62 = vld [vmem:[%s4505_s25 + $0x2350] sm:$0xff] }
  0x93   : > { %406 = vst [vmem:[%s4510_s26 + $0x3f8] sm:$0xff] %v405_v63  ;;  %v533_v63 = vld [vmem:[%s4505_s25 + $0x2358] sm:$0xff] }
  0x94   : > { %408 = vst [vmem:[%s4510_s26 + $0x400] sm:$0xff] %v407_v0  ;;  %v535_v0 = vld [vmem:[%s4505_s25 + $0x2400] sm:$0xff] }
  0x95   : > { %410 = vst [vmem:[%s4510_s26 + $0x408] sm:$0xff] %v409_v1  ;;  %v537_v1 = vld [vmem:[%s4505_s25 + $0x2408] sm:$0xff] }
  0x96   : > { %412 = vst [vmem:[%s4510_s26 + $0x410] sm:$0xff] %v411_v2  ;;  %v539_v2 = vld [vmem:[%s4505_s25 + $0x2410] sm:$0xff] }
  0x97   : > { %414 = vst [vmem:[%s4510_s26 + $0x418] sm:$0xff] %v413_v3  ;;  %v541_v3 = vld [vmem:[%s4505_s25 + $0x2418] sm:$0xff] }
  0x98   : > { %416 = vst [vmem:[%s4510_s26 + $0x420] sm:$0xff] %v415_v4  ;;  %v543_v4 = vld [vmem:[%s4505_s25 + $0x24c0] sm:$0xff] }
  0x99   : > { %418 = vst [vmem:[%s4510_s26 + $0x428] sm:$0xff] %v417_v5  ;;  %v545_v5 = vld [vmem:[%s4505_s25 + $0x24c8] sm:$0xff] }
  0x9a   : > { %420 = vst [vmem:[%s4510_s26 + $0x430] sm:$0xff] %v419_v6  ;;  %v547_v6 = vld [vmem:[%s4505_s25 + $0x24d0] sm:$0xff] }
  0x9b   : > { %422 = vst [vmem:[%s4510_s26 + $0x438] sm:$0xff] %v421_v7  ;;  %v549_v7 = vld [vmem:[%s4505_s25 + $0x24d8] sm:$0xff] }
  0x9c   : > { %424 = vst [vmem:[%s4510_s26 + $0x440] sm:$0xff] %v423_v8  ;;  %v551_v8 = vld [vmem:[%s4505_s25 + $0x2580] sm:$0xff] }
  0x9d   : > { %426 = vst [vmem:[%s4510_s26 + $0x448] sm:$0xff] %v425_v9  ;;  %v553_v9 = vld [vmem:[%s4505_s25 + $0x2588] sm:$0xff] }
  0x9e   : > { %428 = vst [vmem:[%s4510_s26 + $0x450] sm:$0xff] %v427_v10  ;;  %v555_v10 = vld [vmem:[%s4505_s25 + $0x2590] sm:$0xff] }
  0x9f   : > { %430 = vst [vmem:[%s4510_s26 + $0x458] sm:$0xff] %v429_v11  ;;  %v557_v11 = vld [vmem:[%s4505_s25 + $0x2598] sm:$0xff] }
  0xa0   : > { %432 = vst [vmem:[%s4510_s26 + $0x460] sm:$0xff] %v431_v12  ;;  %v559_v12 = vld [vmem:[%s4505_s25 + $0x2640] sm:$0xff] }
  0xa1   : > { %434 = vst [vmem:[%s4510_s26 + $0x468] sm:$0xff] %v433_v13  ;;  %v561_v13 = vld [vmem:[%s4505_s25 + $0x2648] sm:$0xff] }
  0xa2   : > { %436 = vst [vmem:[%s4510_s26 + $0x470] sm:$0xff] %v435_v14  ;;  %v563_v14 = vld [vmem:[%s4505_s25 + $0x2650] sm:$0xff] }
  0xa3   : > { %438 = vst [vmem:[%s4510_s26 + $0x478] sm:$0xff] %v437_v15  ;;  %v565_v15 = vld [vmem:[%s4505_s25 + $0x2658] sm:$0xff] }
  0xa4   : > { %440 = vst [vmem:[%s4510_s26 + $0x480] sm:$0xff] %v439_v16  ;;  %v567_v16 = vld [vmem:[%s4505_s25 + $0x2700] sm:$0xff] }
  0xa5   : > { %442 = vst [vmem:[%s4510_s26 + $0x488] sm:$0xff] %v441_v17  ;;  %v569_v17 = vld [vmem:[%s4505_s25 + $0x2708] sm:$0xff] }
  0xa6   : > { %444 = vst [vmem:[%s4510_s26 + $0x490] sm:$0xff] %v443_v18  ;;  %v571_v18 = vld [vmem:[%s4505_s25 + $0x2710] sm:$0xff] }
  0xa7   : > { %446 = vst [vmem:[%s4510_s26 + $0x498] sm:$0xff] %v445_v19  ;;  %v573_v19 = vld [vmem:[%s4505_s25 + $0x2718] sm:$0xff] }
  0xa8   : > { %448 = vst [vmem:[%s4510_s26 + $0x4a0] sm:$0xff] %v447_v20  ;;  %v575_v20 = vld [vmem:[%s4505_s25 + $0x27c0] sm:$0xff] }
  0xa9   : > { %450 = vst [vmem:[%s4510_s26 + $0x4a8] sm:$0xff] %v449_v21  ;;  %v577_v21 = vld [vmem:[%s4505_s25 + $0x27c8] sm:$0xff] }
  0xaa   : > { %452 = vst [vmem:[%s4510_s26 + $0x4b0] sm:$0xff] %v451_v22  ;;  %v579_v22 = vld [vmem:[%s4505_s25 + $0x27d0] sm:$0xff] }
  0xab   : > { %454 = vst [vmem:[%s4510_s26 + $0x4b8] sm:$0xff] %v453_v23  ;;  %v581_v23 = vld [vmem:[%s4505_s25 + $0x27d8] sm:$0xff] }
  0xac   : > { %456 = vst [vmem:[%s4510_s26 + $0x4c0] sm:$0xff] %v455_v24  ;;  %v583_v24 = vld [vmem:[%s4505_s25 + $0x2880] sm:$0xff] }
  0xad   : > { %458 = vst [vmem:[%s4510_s26 + $0x4c8] sm:$0xff] %v457_v25  ;;  %v585_v25 = vld [vmem:[%s4505_s25 + $0x2888] sm:$0xff] }
  0xae   : > { %460 = vst [vmem:[%s4510_s26 + $0x4d0] sm:$0xff] %v459_v26  ;;  %v587_v26 = vld [vmem:[%s4505_s25 + $0x2890] sm:$0xff] }
  0xaf   : > { %462 = vst [vmem:[%s4510_s26 + $0x4d8] sm:$0xff] %v461_v27  ;;  %v589_v27 = vld [vmem:[%s4505_s25 + $0x2898] sm:$0xff] }
  0xb0   : > { %464 = vst [vmem:[%s4510_s26 + $0x4e0] sm:$0xff] %v463_v28  ;;  %v591_v28 = vld [vmem:[%s4505_s25 + $0x2940] sm:$0xff] }
  0xb1   : > { %466 = vst [vmem:[%s4510_s26 + $0x4e8] sm:$0xff] %v465_v29  ;;  %v593_v29 = vld [vmem:[%s4505_s25 + $0x2948] sm:$0xff] }
  0xb2   : > { %468 = vst [vmem:[%s4510_s26 + $0x4f0] sm:$0xff] %v467_v30  ;;  %v595_v30 = vld [vmem:[%s4505_s25 + $0x2950] sm:$0xff] }
  0xb3   : > { %470 = vst [vmem:[%s4510_s26 + $0x4f8] sm:$0xff] %v469_v31  ;;  %v597_v31 = vld [vmem:[%s4505_s25 + $0x2958] sm:$0xff] }
  0xb4   : > { %472 = vst [vmem:[%s4510_s26 + $0x500] sm:$0xff] %v471_v32  ;;  %v599_v32 = vld [vmem:[%s4505_s25 + $0x2a00] sm:$0xff] }
  0xb5   : > { %474 = vst [vmem:[%s4510_s26 + $0x508] sm:$0xff] %v473_v33  ;;  %v601_v33 = vld [vmem:[%s4505_s25 + $0x2a08] sm:$0xff] }
  0xb6   : > { %476 = vst [vmem:[%s4510_s26 + $0x510] sm:$0xff] %v475_v34  ;;  %v603_v34 = vld [vmem:[%s4505_s25 + $0x2a10] sm:$0xff] }
  0xb7   : > { %478 = vst [vmem:[%s4510_s26 + $0x518] sm:$0xff] %v477_v35  ;;  %v605_v35 = vld [vmem:[%s4505_s25 + $0x2a18] sm:$0xff] }
  0xb8   : > { %480 = vst [vmem:[%s4510_s26 + $0x520] sm:$0xff] %v479_v36  ;;  %v607_v36 = vld [vmem:[%s4505_s25 + $0x2ac0] sm:$0xff] }
  0xb9   : > { %482 = vst [vmem:[%s4510_s26 + $0x528] sm:$0xff] %v481_v37  ;;  %v609_v37 = vld [vmem:[%s4505_s25 + $0x2ac8] sm:$0xff] }
  0xba   : > { %484 = vst [vmem:[%s4510_s26 + $0x530] sm:$0xff] %v483_v38  ;;  %v611_v38 = vld [vmem:[%s4505_s25 + $0x2ad0] sm:$0xff] }
  0xbb   : > { %486 = vst [vmem:[%s4510_s26 + $0x538] sm:$0xff] %v485_v39  ;;  %v613_v39 = vld [vmem:[%s4505_s25 + $0x2ad8] sm:$0xff] }
  0xbc   : > { %488 = vst [vmem:[%s4510_s26 + $0x540] sm:$0xff] %v487_v40  ;;  %v615_v40 = vld [vmem:[%s4505_s25 + $0x2b80] sm:$0xff] }
  0xbd   : > { %490 = vst [vmem:[%s4510_s26 + $0x548] sm:$0xff] %v489_v41  ;;  %v617_v41 = vld [vmem:[%s4505_s25 + $0x2b88] sm:$0xff] }
  0xbe   : > { %492 = vst [vmem:[%s4510_s26 + $0x550] sm:$0xff] %v491_v42  ;;  %v619_v42 = vld [vmem:[%s4505_s25 + $0x2b90] sm:$0xff] }
  0xbf   : > { %494 = vst [vmem:[%s4510_s26 + $0x558] sm:$0xff] %v493_v43  ;;  %v621_v43 = vld [vmem:[%s4505_s25 + $0x2b98] sm:$0xff] }
  0xc0   : > { %496 = vst [vmem:[%s4510_s26 + $0x560] sm:$0xff] %v495_v44  ;;  %v623_v44 = vld [vmem:[%s4505_s25 + $0x2c40] sm:$0xff] }
  0xc1   : > { %498 = vst [vmem:[%s4510_s26 + $0x568] sm:$0xff] %v497_v45  ;;  %v625_v45 = vld [vmem:[%s4505_s25 + $0x2c48] sm:$0xff] }
  0xc2   : > { %500 = vst [vmem:[%s4510_s26 + $0x570] sm:$0xff] %v499_v46  ;;  %v627_v46 = vld [vmem:[%s4505_s25 + $0x2c50] sm:$0xff] }
  0xc3   : > { %502 = vst [vmem:[%s4510_s26 + $0x578] sm:$0xff] %v501_v47  ;;  %v629_v47 = vld [vmem:[%s4505_s25 + $0x2c58] sm:$0xff] }
  0xc4   : > { %504 = vst [vmem:[%s4510_s26 + $0x580] sm:$0xff] %v503_v48  ;;  %v631_v48 = vld [vmem:[%s4505_s25 + $0x2d00] sm:$0xff] }
  0xc5   : > { %506 = vst [vmem:[%s4510_s26 + $0x588] sm:$0xff] %v505_v49  ;;  %v633_v49 = vld [vmem:[%s4505_s25 + $0x2d08] sm:$0xff] }
  0xc6   : > { %508 = vst [vmem:[%s4510_s26 + $0x590] sm:$0xff] %v507_v50  ;;  %v635_v50 = vld [vmem:[%s4505_s25 + $0x2d10] sm:$0xff] }
  0xc7   : > { %510 = vst [vmem:[%s4510_s26 + $0x598] sm:$0xff] %v509_v51  ;;  %v637_v51 = vld [vmem:[%s4505_s25 + $0x2d18] sm:$0xff] }
  0xc8   : > { %512 = vst [vmem:[%s4510_s26 + $0x5a0] sm:$0xff] %v511_v52  ;;  %v639_v52 = vld [vmem:[%s4505_s25 + $0x2dc0] sm:$0xff] }
  0xc9   : > { %514 = vst [vmem:[%s4510_s26 + $0x5a8] sm:$0xff] %v513_v53  ;;  %v641_v53 = vld [vmem:[%s4505_s25 + $0x2dc8] sm:$0xff] }
  0xca   : > { %516 = vst [vmem:[%s4510_s26 + $0x5b0] sm:$0xff] %v515_v54  ;;  %v643_v54 = vld [vmem:[%s4505_s25 + $0x2dd0] sm:$0xff] }
  0xcb   : > { %518 = vst [vmem:[%s4510_s26 + $0x5b8] sm:$0xff] %v517_v55  ;;  %v645_v55 = vld [vmem:[%s4505_s25 + $0x2dd8] sm:$0xff] }
  0xcc   : > { %520 = vst [vmem:[%s4510_s26 + $0x5c0] sm:$0xff] %v519_v56  ;;  %v647_v56 = vld [vmem:[%s4505_s25 + $0x2e80] sm:$0xff] }
  0xcd   : > { %522 = vst [vmem:[%s4510_s26 + $0x5c8] sm:$0xff] %v521_v57  ;;  %v649_v57 = vld [vmem:[%s4505_s25 + $0x2e88] sm:$0xff] }
  0xce   : > { %524 = vst [vmem:[%s4510_s26 + $0x5d0] sm:$0xff] %v523_v58  ;;  %v651_v58 = vld [vmem:[%s4505_s25 + $0x2e90] sm:$0xff] }
  0xcf   : > { %526 = vst [vmem:[%s4510_s26 + $0x5d8] sm:$0xff] %v525_v59  ;;  %v653_v59 = vld [vmem:[%s4505_s25 + $0x2e98] sm:$0xff] }
  0xd0   : > { %528 = vst [vmem:[%s4510_s26 + $0x5e0] sm:$0xff] %v527_v60  ;;  %v655_v60 = vld [vmem:[%s4505_s25 + $0x2f40] sm:$0xff] }
  0xd1   : > { %530 = vst [vmem:[%s4510_s26 + $0x5e8] sm:$0xff] %v529_v61  ;;  %v657_v61 = vld [vmem:[%s4505_s25 + $0x2f48] sm:$0xff] }
  0xd2   : > { %532 = vst [vmem:[%s4510_s26 + $0x5f0] sm:$0xff] %v531_v62  ;;  %v659_v62 = vld [vmem:[%s4505_s25 + $0x2f50] sm:$0xff] }
  0xd3   : > { %534 = vst [vmem:[%s4510_s26 + $0x5f8] sm:$0xff] %v533_v63  ;;  %v661_v63 = vld [vmem:[%s4505_s25 + $0x2f58] sm:$0xff] }
  0xd4   : > { %536 = vst [vmem:[%s4510_s26 + $0x600] sm:$0xff] %v535_v0 }
  0xd5   : > { %538 = vst [vmem:[%s4510_s26 + $0x608] sm:$0xff] %v537_v1 }
  0xd6   : > { %540 = vst [vmem:[%s4510_s26 + $0x610] sm:$0xff] %v539_v2 }
  0xd7   : > { %542 = vst [vmem:[%s4510_s26 + $0x618] sm:$0xff] %v541_v3 }
  0xd8   : > { %544 = vst [vmem:[%s4510_s26 + $0x620] sm:$0xff] %v543_v4 }
  0xd9   : > { %546 = vst [vmem:[%s4510_s26 + $0x628] sm:$0xff] %v545_v5 }
  0xda   : > { %548 = vst [vmem:[%s4510_s26 + $0x630] sm:$0xff] %v547_v6 }
  0xdb   : > { %550 = vst [vmem:[%s4510_s26 + $0x638] sm:$0xff] %v549_v7 }
  0xdc   : > { %552 = vst [vmem:[%s4510_s26 + $0x640] sm:$0xff] %v551_v8 }
  0xdd   : > { %554 = vst [vmem:[%s4510_s26 + $0x648] sm:$0xff] %v553_v9 }
  0xde   : > { %556 = vst [vmem:[%s4510_s26 + $0x650] sm:$0xff] %v555_v10 }
  0xdf   : > { %558 = vst [vmem:[%s4510_s26 + $0x658] sm:$0xff] %v557_v11 }
  0xe0   : > { %560 = vst [vmem:[%s4510_s26 + $0x660] sm:$0xff] %v559_v12 }
  0xe1   : > { %562 = vst [vmem:[%s4510_s26 + $0x668] sm:$0xff] %v561_v13 }
  0xe2   : > { %564 = vst [vmem:[%s4510_s26 + $0x670] sm:$0xff] %v563_v14 }
  0xe3   : > { %566 = vst [vmem:[%s4510_s26 + $0x678] sm:$0xff] %v565_v15 }
  0xe4   : > { %568 = vst [vmem:[%s4510_s26 + $0x680] sm:$0xff] %v567_v16 }
  0xe5   : > { %570 = vst [vmem:[%s4510_s26 + $0x688] sm:$0xff] %v569_v17 }
  0xe6   : > { %572 = vst [vmem:[%s4510_s26 + $0x690] sm:$0xff] %v571_v18 }
  0xe7   : > { %574 = vst [vmem:[%s4510_s26 + $0x698] sm:$0xff] %v573_v19 }
  0xe8   : > { %576 = vst [vmem:[%s4510_s26 + $0x6a0] sm:$0xff] %v575_v20 }
  0xe9   : > { %578 = vst [vmem:[%s4510_s26 + $0x6a8] sm:$0xff] %v577_v21 }
  0xea   : > { %580 = vst [vmem:[%s4510_s26 + $0x6b0] sm:$0xff] %v579_v22 }
  0xeb   : > { %582 = vst [vmem:[%s4510_s26 + $0x6b8] sm:$0xff] %v581_v23 }
  0xec   : > { %584 = vst [vmem:[%s4510_s26 + $0x6c0] sm:$0xff] %v583_v24 }
  0xed   : > { %586 = vst [vmem:[%s4510_s26 + $0x6c8] sm:$0xff] %v585_v25 }
  0xee   : > { %588 = vst [vmem:[%s4510_s26 + $0x6d0] sm:$0xff] %v587_v26 }
  0xef   : > { %590 = vst [vmem:[%s4510_s26 + $0x6d8] sm:$0xff] %v589_v27 }
  0xf0   : > { %592 = vst [vmem:[%s4510_s26 + $0x6e0] sm:$0xff] %v591_v28 }
  0xf1   : > { %594 = vst [vmem:[%s4510_s26 + $0x6e8] sm:$0xff] %v593_v29 }
  0xf2   : > { %596 = vst [vmem:[%s4510_s26 + $0x6f0] sm:$0xff] %v595_v30 }
  0xf3   : > { %598 = vst [vmem:[%s4510_s26 + $0x6f8] sm:$0xff] %v597_v31 }
  0xf4   : > { %600 = vst [vmem:[%s4510_s26 + $0x700] sm:$0xff] %v599_v32 }
  0xf5   : > { %602 = vst [vmem:[%s4510_s26 + $0x708] sm:$0xff] %v601_v33 }
  0xf6   : > { %604 = vst [vmem:[%s4510_s26 + $0x710] sm:$0xff] %v603_v34 }
  0xf7   : > { %606 = vst [vmem:[%s4510_s26 + $0x718] sm:$0xff] %v605_v35 }
  0xf8   : > { %608 = vst [vmem:[%s4510_s26 + $0x720] sm:$0xff] %v607_v36 }
  0xf9   : > { %610 = vst [vmem:[%s4510_s26 + $0x728] sm:$0xff] %v609_v37 }
  0xfa   : > { %612 = vst [vmem:[%s4510_s26 + $0x730] sm:$0xff] %v611_v38 }
  0xfb   : > { %614 = vst [vmem:[%s4510_s26 + $0x738] sm:$0xff] %v613_v39 }
  0xfc   : > { %616 = vst [vmem:[%s4510_s26 + $0x740] sm:$0xff] %v615_v40 }
  0xfd   : > { %618 = vst [vmem:[%s4510_s26 + $0x748] sm:$0xff] %v617_v41 }
  0xfe   : > { %620 = vst [vmem:[%s4510_s26 + $0x750] sm:$0xff] %v619_v42 }
  0xff   : > { %622 = vst [vmem:[%s4510_s26 + $0x758] sm:$0xff] %v621_v43 }
 0x100   : > { %624 = vst [vmem:[%s4510_s26 + $0x760] sm:$0xff] %v623_v44 }
 0x101   : > { %626 = vst [vmem:[%s4510_s26 + $0x768] sm:$0xff] %v625_v45 }
 0x102   : > { %628 = vst [vmem:[%s4510_s26 + $0x770] sm:$0xff] %v627_v46 }
 0x103   : > { %630 = vst [vmem:[%s4510_s26 + $0x778] sm:$0xff] %v629_v47 }
 0x104   : > { %632 = vst [vmem:[%s4510_s26 + $0x780] sm:$0xff] %v631_v48 }
 0x105   : > { %634 = vst [vmem:[%s4510_s26 + $0x788] sm:$0xff] %v633_v49 }
 0x106   : > { %636 = vst [vmem:[%s4510_s26 + $0x790] sm:$0xff] %v635_v50 }
 0x107   : > { %638 = vst [vmem:[%s4510_s26 + $0x798] sm:$0xff] %v637_v51 }
 0x108   : > { %640 = vst [vmem:[%s4510_s26 + $0x7a0] sm:$0xff] %v639_v52 }
 0x109   : > { %642 = vst [vmem:[%s4510_s26 + $0x7a8] sm:$0xff] %v641_v53 }
 0x10a   : > { %644 = vst [vmem:[%s4510_s26 + $0x7b0] sm:$0xff] %v643_v54 }
 0x10b   : > { %646 = vst [vmem:[%s4510_s26 + $0x7b8] sm:$0xff] %v645_v55 }
 0x10c   : > { %648 = vst [vmem:[%s4510_s26 + $0x7c0] sm:$0xff] %v647_v56 }
 0x10d   : > { %650 = vst [vmem:[%s4510_s26 + $0x7c8] sm:$0xff] %v649_v57 }
 0x10e   : > { %652 = vst [vmem:[%s4510_s26 + $0x7d0] sm:$0xff] %v651_v58 }
 0x10f   : > { %654 = vst [vmem:[%s4510_s26 + $0x7d8] sm:$0xff] %v653_v59 }
 0x110   : > { %656 = vst [vmem:[%s4510_s26 + $0x7e0] sm:$0xff] %v655_v60 }
 0x111   : > { %658 = vst [vmem:[%s4510_s26 + $0x7e8] sm:$0xff] %v657_v61 }
 0x112   : > { %660 = vst [vmem:[%s4510_s26 + $0x7f0] sm:$0xff] %v659_v62 }
 0x113   : > { %662 = vst [vmem:[%s4510_s26 + $0x7f8] sm:$0xff] %v661_v63 }
 0x114 PF: > { %p3053_p8 = scmp.ge.s32.totalorder %s4440_s13, 1  ;;  %p667_p9 = scmp.lt.s32.totalorder %s4440_s13, 7 }
 0x116   : > { %p668_p10 = pnand %p3053_p8, %p667_p9 }
 0x117   : > { %s674_s27 = sand.u32 (!%p668_p10), 1, %s4424_s9  }
 0x118   : > { %671 = sbr.rel (%p668_p10) target bundleno = 744 (0x2e8), region = 47  ;;  %s3054_s28 = sshll.u32 (!%p668_p10), %s674_s27, 11 }
 0x119   : > { %s5026_s29 = scalar_lea.vmem (!%p668_p10), [#allocation2], %s3054_s28  ;;  %s5464_s4 = smul.u32 (!%p668_p10), 192, %s674_s27 }
 0x11b   : > { %s5480_s9 = scalar_lea.vmem (!%p668_p10), [#allocation3], %s5464_s4 }
 0x11d   : > { %v3297_v0 = vld [vmem:[%s5026_s29 + $0x1c0] sm:$0xf]  ;;  %s4360_s27 = sshll.u32 (%p4492_p6), %s4432_s11, 6 }
 0x11e   : > { %v4164_v1 = vld [vmem:[%s5026_s29 + $0x1dc] sm:$0xf0]  ;;  %s5689_s6 = scalar_lea.vmem (%p4492_p6), %s5754_s2, %s4360_s27 }
 0x11f   : > { %v3553_v2 = vld [vmem:[%s5026_s29 + $0x3c0] sm:$0xf]  ;;  %v3298_v3 = vor.u32 %v4164_v1, %v3297_v0 }
 0x120   : > { %v4228_v4 = vld [vmem:[%s5026_s29 + $0x3dc] sm:$0xf0] }
 0x121   : > { %v3809_v5 = vld [vmem:[%s5026_s29 + $0x5c0] sm:$0xf]  ;;  %v3554_v7 = vor.u32 %v4228_v4, %v3553_v2  ;;  %2286 = vmatpush.bf16.msra.mxu0 %v3298_v3 }
 0x122   : > { %v4292_v6 = vld [vmem:[%s5026_s29 + $0x5dc] sm:$0xf0] }
 0x123   : > { %v3810_v8 = vor.u32 %v4292_v6, %v3809_v5  ;;  %v4065_v9 = vld [vmem:[%s5026_s29 + $0x7c0] sm:$0xf]  ;;  %2304 = vmatpush.bf16.msra.mxu1 %v3554_v7 }
 0x124   : > { %v4356_v10 = vld [vmem:[%s5026_s29 + $0x7dc] sm:$0xf0] }
 0x125   : > { %v3265_v11 = vld [vmem:[%s5026_s29 + $0x180] sm:$0xf]  ;;  %v4066_v12 = vor.u32 %v4356_v10, %v4065_v9  ;;  %2322 = vmatpush.bf16.msra.mxu2 %v3810_v8 }
 0x126   : > { %v4156_v13 = vld [vmem:[%s5026_s29 + $0x19c] sm:$0xf0] }
 0x127   : > { %v3521_v14 = vld [vmem:[%s5026_s29 + $0x380] sm:$0xf]  ;;  %v3266_v16 = vor.u32 %v4156_v13, %v3265_v11  ;;  %2340 = vmatpush.bf16.msra.mxu3 %v4066_v12 }
 0x128   : > { %v4220_v15 = vld [vmem:[%s5026_s29 + $0x39c] sm:$0xf0] }
 0x129   : > { %v3522_v17 = vor.u32 %v4220_v15, %v3521_v14  ;;  %v3777_v18 = vld [vmem:[%s5026_s29 + $0x580] sm:$0xf]  ;;  %2287 = vmatpush.bf16.msra.mxu0 %v3266_v16 }
 0x12a   : > { %v4284_v19 = vld [vmem:[%s5026_s29 + $0x59c] sm:$0xf0] }
 0x12b   : > { %v4033_v20 = vld [vmem:[%s5026_s29 + $0x780] sm:$0xf]  ;;  %v3778_v21 = vor.u32 %v4284_v19, %v3777_v18  ;;  %2305 = vmatpush.bf16.msra.mxu1 %v3522_v17 }
 0x12c   : > { %v4348_v22 = vld [vmem:[%s5026_s29 + $0x79c] sm:$0xf0] }
 0x12d   : > { %v3233_v23 = vld [vmem:[%s5026_s29 + $0x140] sm:$0xf]  ;;  %v4034_v25 = vor.u32 %v4348_v22, %v4033_v20  ;;  %2323 = vmatpush.bf16.msra.mxu2 %v3778_v21 }
 0x12e   : > { %v4148_v24 = vld [vmem:[%s5026_s29 + $0x15c] sm:$0xf0] }
 0x12f   : > { %v3489_v26 = vld [vmem:[%s5026_s29 + $0x340] sm:$0xf]  ;;  %v3234_v29 = vor.u32 %v4148_v24, %v3233_v23  ;;  %2341 = vmatpush.bf16.msra.mxu3 %v4034_v25 }
 0x130   : > { %v4212_v27 = vld [vmem:[%s5026_s29 + $0x35c] sm:$0xf0] }
 0x131   : > { %v3745_v28 = vld [vmem:[%s5026_s29 + $0x540] sm:$0xf]  ;;  %v3490_v33 = vor.u32 %v4212_v27, %v3489_v26  ;;  %2288 = vmatpush.bf16.msra.mxu0 %v3234_v29  ;;  %v4102_v29 = vld [vmem:[%s5752_s0 + $0xc] sm:$0xf0] }
 0x132   : > { %v4276_v30 = vld [vmem:[%s5026_s29 + $0x55c] sm:$0xf0] }
 0x133   : > { %v4001_v31 = vld [vmem:[%s5026_s29 + $0x740] sm:$0xf]  ;;  %v3746_v34 = vor.u32 %v4276_v30, %v3745_v28  ;;  %2306 = vmatpush.bf16.msra.mxu1 %v3490_v33  ;;  %v4100_v30 = vld [vmem:[%s5752_s0 + $0x4] sm:$0xf] }
 0x134   : > { %v4340_v32 = vld [vmem:[%s5026_s29 + $0x75c] sm:$0xf0]  ;;  %v3811_v33 = vld [vmem:[%s5026_s29 + $0x5e0] sm:$0xf0] }
 0x135   : > { %v3201_v35 = vld [vmem:[%s5026_s29 + $0x100] sm:$0xf]  ;;  %v4002_v38 = vor.u32 %v4340_v32, %v4001_v31  ;;  %2324 = vmatpush.bf16.msra.mxu2 %v3746_v34  ;;  %v3059_v31 = vld [vmem:[%s5752_s0 + $0x10] sm:$0xf0]  ;;  %v4288_v32 = vld [vmem:[%s5026_s29 + $0x5c4] sm:$0xf] }
 0x136   : > { %v4140_v36 = vld [vmem:[%s5026_s29 + $0x11c] sm:$0xf0] }
 0x137   : > { %v3457_v37 = vld [vmem:[%s5026_s29 + $0x300] sm:$0xf]  ;;  %v3202_v44 = vor.u32 %v4140_v36, %v3201_v35  ;;  %2342 = vmatpush.bf16.msra.mxu3 %v4002_v38  ;;  %v3065_v35 = vld [vmem:[%s5752_s0 + $0x8] sm:$0xf]  ;;  %v4352_v36 = vld [vmem:[%s5026_s29 + $0x7c4] sm:$0xf] }
 0x138   : > { %v4204_v39 = vld [vmem:[%s5026_s29 + $0x31c] sm:$0xf0] }
 0x139   : > { %v3713_v40 = vld [vmem:[%s5026_s29 + $0x500] sm:$0xf]  ;;  %v3458_v45 = vor.u32 %v4204_v39, %v3457_v37  ;;  %2289 = vmatpush.bf16.msra.mxu0 %v3202_v44  ;;  %v4067_v37 = vld [vmem:[%s5026_s29 + $0x7e0] sm:$0xf0]  ;;  %v3814_v44 = vor.u32 %v4288_v32, %v3811_v33 }
 0x13a   : > { %v4268_v41 = vld [vmem:[%s5026_s29 + $0x51c] sm:$0xf0]  ;;  %v4320_v33 = vld [vmem:[%s5026_s29 + $0x6c4] sm:$0xf] }
 0x13b   : > { %v3969_v42 = vld [vmem:[%s5026_s29 + $0x700] sm:$0xf]  ;;  %v3714_v46 = vor.u32 %v4268_v41, %v3713_v40  ;;  %2307 = vmatpush.bf16.msra.mxu1 %v3458_v45  ;;  %v4103_v40 = vld [vmem:[%s5752_s0 + $0x14] sm:$0xf0]  ;;  %v4101_v41 = vld [vmem:[%s5752_s0 + $0xc] sm:$0xf] }
 0x13c   : > { %v4332_v43 = vld [vmem:[%s5026_s29 + $0x71c] sm:$0xf0]  ;;  %v4160_v45 = vld [vmem:[%s5026_s29 + $0x1c4] sm:$0xf] }
 0x13d   : > { %v3169_v47 = vld [vmem:[%s5026_s29 + $0xc0] sm:$0xf]  ;;  %v3970_v50 = vor.u32 %v4332_v43, %v3969_v42  ;;  %2325 = vmatpush.bf16.msra.mxu2 %v3714_v46  ;;  %v3067_v42 = vld [vmem:[%s5752_s0 + $0x18] sm:$0xf0]  ;;  %v3299_v46 = vld [vmem:[%s5026_s29 + $0x1e0] sm:$0xf0] }
 0x13e   : > { %v4132_v48 = vld [vmem:[%s5026_s29 + $0xdc] sm:$0xf0] }
 0x13f   : > { %v3425_v49 = vld [vmem:[%s5026_s29 + $0x2c0] sm:$0xf]  ;;  %v3170_v56 = vor.u32 %v4132_v48, %v3169_v47  ;;  %2343 = vmatpush.bf16.msra.mxu3 %v3970_v50  ;;  %v4224_v47 = vld [vmem:[%s5026_s29 + $0x3c4] sm:$0xf] }
 0x140   : > { %v4196_v51 = vld [vmem:[%s5026_s29 + $0x2dc] sm:$0xf0]  ;;  %v3555_v50 = vld [vmem:[%s5026_s29 + $0x3e0] sm:$0xf0] }
 0x141   : > { %v3681_v52 = vld [vmem:[%s5026_s29 + $0x4c0] sm:$0xf]  ;;  %v3426_v57 = vor.u32 %v4196_v51, %v3425_v49  ;;  %2290 = vmatpush.bf16.msra.mxu0 %v3170_v56  ;;  %v4070_v49 = vor.u32 %v4352_v36, %v4067_v37  ;;  %v4280_v51 = vld [vmem:[%s5026_s29 + $0x584] sm:$0xf] }
 0x142   : > { %v4260_v53 = vld [vmem:[%s5026_s29 + $0x4dc] sm:$0xf0]  ;;  %v4035_v56 = vld [vmem:[%s5026_s29 + $0x7a0] sm:$0xf0] }
 0x143   : > { %v3937_v54 = vld [vmem:[%s5026_s29 + $0x6c0] sm:$0xf]  ;;  %v3682_v58 = vor.u32 %v4260_v53, %v3681_v52  ;;  %2308 = vmatpush.bf16.msra.mxu1 %v3426_v57  ;;  %v3779_v52 = vld [vmem:[%s5026_s29 + $0x5a0] sm:$0xf0]  ;;  %v5128_v53 = vor.u32 %v4100_v30, %v3059_v31  ;;  %v5134_v57 = vor.u32 %v4101_v41, %v3067_v42 }
 0x144   : > { %v4324_v55 = vld [vmem:[%s5026_s29 + $0x6dc] sm:$0xf0]  ;;  %v3683_v30 = vld [vmem:[%s5026_s29 + $0x4e0] sm:$0xf0] }
 0x145   : > { %v3137_v59 = vld [vmem:[%s5026_s29 + $0x80] sm:$0xf]  ;;  %v3938_v62 = vor.u32 %v4324_v55, %v3937_v54  ;;  %2326 = vmatpush.bf16.msra.mxu2 %v3682_v58  ;;  %v5130_v54 = vor.u32 %v4103_v40, %v3065_v35  ;;  %v4344_v55 = vld [vmem:[%s5026_s29 + $0x784] sm:$0xf]  ;;  %v3302_v58 = vor.u32 %v4160_v45, %v3299_v46 }
 0x146   : > { %v4124_v60 = vld [vmem:[%s5026_s29 + $0x9c] sm:$0xf0]  ;;  %v3171_v40 = vld [vmem:[%s5026_s29 + $0xe0] sm:$0xf0] }
 0x147   : > { %v3393_v61 = vld [vmem:[%s5026_s29 + $0x280] sm:$0xf]  ;;  %v3138_v4 = vor.u32 %v4124_v60, %v3137_v59  ;;  %2344 = vmatpush.bf16.msra.mxu3 %v3938_v62  ;;  %v3558_v59 = vor.u32 %v4224_v47, %v3555_v50  ;;  %v3782_v60 = vor.u32 %v4280_v51, %v3779_v52  ;;  %v3267_v62 = vld [vmem:[%s5026_s29 + $0x1a0] sm:$0xf0] }
 0x148   : > { %v4188_v63 = vld [vmem:[%s5026_s29 + $0x29c] sm:$0xf0]  ;;  %v4192_v41 = vld [vmem:[%s5026_s29 + $0x2c4] sm:$0xf] }
 0x149   : > { %v3649_v0 = vld [vmem:[%s5026_s29 + $0x480] sm:$0xf]  ;;  %v3394_v5 = vor.u32 %v4188_v63, %v3393_v61  ;;  %2291 = vmatpush.bf16.msra.mxu0 %v3138_v4  ;;  %v4152_v61 = vld [vmem:[%s5026_s29 + $0x184] sm:$0xf] }
 0x14a   : > { %v4252_v1 = vld [vmem:[%s5026_s29 + $0x49c] sm:$0xf0]  ;;  %v4216_v63 = vld [vmem:[%s5026_s29 + $0x384] sm:$0xf] }
 0x14b   : > { %v3905_v2 = vld [vmem:[%s5026_s29 + $0x680] sm:$0xf]  ;;  %v3650_v6 = vor.u32 %v4252_v1, %v3649_v0  ;;  %2309 = vmatpush.bf16.msra.mxu1 %v3394_v5  ;;  %v4038_v0 = vor.u32 %v4344_v55, %v4035_v56  ;;  %v3523_v1 = vld [vmem:[%s5026_s29 + $0x3a0] sm:$0xf0] }
 0x14c   : > { %v4316_v3 = vld [vmem:[%s5026_s29 + $0x69c] sm:$0xf0]  ;;  %v4336_v4 = vld [vmem:[%s5026_s29 + $0x744] sm:$0xf] }
 0x14d   : > { %v3105_v7 = vld [vmem:[%s5026_s29 + $0x40] sm:$0xf]  ;;  %v3906_v10 = vor.u32 %v4316_v3, %v3905_v2  ;;  %2327 = vmatpush.bf16.msra.mxu2 %v3650_v6  ;;  %v4272_v2 = vld [vmem:[%s5026_s29 + $0x544] sm:$0xf]  ;;  %v3270_v6 = vor.u32 %v4152_v61, %v3267_v62 }
 0x14e   : > { %v4116_v8 = vld [vmem:[%s5026_s29 + $0x5c] sm:$0xf0]  ;;  %v3747_v3 = vld [vmem:[%s5026_s29 + $0x560] sm:$0xf0] }
 0x14f   : > { %v3361_v9 = vld [vmem:[%s5026_s29 + $0x240] sm:$0xf]  ;;  %v3106_v17 = vor.u32 %v4116_v8, %v3105_v7  ;;  %2345 = vmatpush.bf16.msra.mxu3 %v3906_v10  ;;  %v4003_v5 = vld [vmem:[%s5026_s29 + $0x760] sm:$0xf0]  ;;  %v3526_v7 = vor.u32 %v4216_v63, %v3523_v1  ;;  %v3750_v8 = vor.u32 %v4272_v2, %v3747_v3 }
 0x150   : > { %v4180_v11 = vld [vmem:[%s5026_s29 + $0x25c] sm:$0xf0]  ;;  %v3235_v10 = vld [vmem:[%s5026_s29 + $0x160] sm:$0xf0] }
 0x151   : > { %v3617_v12 = vld [vmem:[%s5026_s29 + $0x440] sm:$0xf]  ;;  %v3362_v21 = vor.u32 %v4180_v11, %v3361_v9  ;;  %2292 = vmatpush.bf16.msra.mxu0 %v3106_v17  ;;  %v4144_v9 = vld [vmem:[%s5026_s29 + $0x144] sm:$0xf] }
 0x152   : > { %v4244_v13 = vld [vmem:[%s5026_s29 + $0x45c] sm:$0xf0]  ;;  %v4208_v11 = vld [vmem:[%s5026_s29 + $0x344] sm:$0xf] }
 0x153   : > { %v3873_v14 = vld [vmem:[%s5026_s29 + $0x640] sm:$0xf]  ;;  %v3618_v22 = vor.u32 %v4244_v13, %v3617_v12  ;;  %2310 = vmatpush.bf16.msra.mxu1 %v3362_v21  ;;  %v4006_v12 = vor.u32 %v4336_v4, %v4003_v5  ;;  %v3491_v13 = vld [vmem:[%s5026_s29 + $0x360] sm:$0xf0] }
 0x154   : > { %v4308_v15 = vld [vmem:[%s5026_s29 + $0x65c] sm:$0xf0]  ;;  %v3971_v17 = vld [vmem:[%s5026_s29 + $0x720] sm:$0xf0]  ;;  %v3494_v21 = vor.u32 %v4208_v11, %v3491_v13 }
 0x155   : > { %v3073_v16 = vld [vmem:[%s5026_s29] sm:$0xf]  ;;  %v3874_v26 = vor.u32 %v4308_v15, %v3873_v14  ;;  %2328 = vmatpush.bf16.msra.mxu2 %v3618_v22  ;;  %v4264_v14 = vld [vmem:[%s5026_s29 + $0x504] sm:$0xf] }
 0x156   : > { %v4108_v18 = vld [vmem:[%s5026_s29 + $0x1c] sm:$0xf0]  ;;  %v3715_v15 = vld [vmem:[%s5026_s29 + $0x520] sm:$0xf0] }
 0x157   : > { %v3329_v19 = vld [vmem:[%s5026_s29 + $0x200] sm:$0xf]  ;;  %v3074_v34 = vor.u32 %v4108_v18, %v3073_v16  ;;  %2346 = vmatpush.bf16.msra.mxu3 %v3874_v26  ;;  %v4328_v16 = vld [vmem:[%s5026_s29 + $0x704] sm:$0xf]  ;;  %v3718_v22 = vor.u32 %v4264_v14, %v3715_v15 }
 0x158   : > { %v4172_v20 = vld [vmem:[%s5026_s29 + $0x21c] sm:$0xf0]  ;;  %v3974_v26 = vor.u32 %v4328_v16, %v3971_v17  ;;  %v4248_v45 = vld [vmem:[%s5026_s29 + $0x484] sm:$0xf]  ;;  %v3817_v16 = vld [vmem:[%s5026_s29 + $0x5c8] sm:$0xf] }
 0x159   : > { %v3585_v23 = vld [vmem:[%s5026_s29 + $0x400] sm:$0xf]  ;;  %v3330_v38 = vor.u32 %v4172_v20, %v3329_v19  ;;  %2293 = vmatpush.bf16.msra.mxu0 %v3074_v34  ;;  %v3238_v19 = vor.u32 %v4144_v9, %v3235_v10  ;;  %v715_v20 = vld [vmem:[%s5752_s0 + $0x28] sm:$0xff]  ;;  %v3939_v34 = vld [vmem:[%s5026_s29 + $0x6e0] sm:$0xf0] }
 0x15a   : > { %v4236_v24 = vld [vmem:[%s5026_s29 + $0x41c] sm:$0xf0]  ;;  %v988_v32 = vunpack.c.l.b16 %v715_v20  ;;  %v989_v36 = vunpack.c.h.b16 %v715_v20  ;;  %v3651_v46 = vld [vmem:[%s5026_s29 + $0x4a0] sm:$0xf0]  ;;  %v4293_v17 = vld [vmem:[%s5026_s29 + $0x5e4] sm:$0xf0] }
 0x15b   : > { %v3841_v25 = vld [vmem:[%s5026_s29 + $0x600] sm:$0xf]  ;;  %v3586_v39 = vor.u32 %v4236_v24, %v3585_v23  ;;  %2311 = vmatpush.bf16.msra.mxu1 %v3330_v38  ;;  %v4136_v23 = vld [vmem:[%s5026_s29 + $0x104] sm:$0xf]  ;;  %v4073_v20 = vld [vmem:[%s5026_s29 + $0x7c8] sm:$0xf] }
 0x15c   : > { %v4300_v27 = vld [vmem:[%s5026_s29 + $0x61c] sm:$0xf0]  ;;  %v3203_v24 = vld [vmem:[%s5026_s29 + $0x120] sm:$0xf0]  ;;  %v5184_v52 = vpack.c.b16 %v989_v36, %v989_v36 }
 0x15d   : > { %v3057_v28 = vld [vmem:[%s5752_s0] sm:$0xf]  ;;  %v3842_v43 = vor.u32 %v4300_v27, %v3841_v25  ;;  %2329 = vmatpush.bf16.msra.mxu2 %v3586_v39  ;;  %2358 = vmatpush.bf16.msrb.mxu0 %v3302_v58  ;;  %v4200_v25 = vld [vmem:[%s5026_s29 + $0x304] sm:$0xf]  ;;  %v3206_v35 = vor.u32 %v4136_v23, %v3203_v24  ;;  %v3654_v58 = vor.u32 %v4248_v45, %v3651_v46  ;;  %v4157_v45 = vld [vmem:[%s5026_s29 + $0x1a4] sm:$0xf0] }
 0x15e   : > { %v5123_v48 = vor.u32 %v4102_v29, %v3057_v28  ;;  %2312 = vmatmul.bf16.vlgmr.msra.gmra.mxu1 %v5128_v53  ;;  %v714_v18 = vld [vmem:[%s5752_s0 + $0x20] sm:$0xff]  ;;  %v3529_v46 = vld [vmem:[%s5026_s29 + $0x388] sm:$0xf] }
 0x15f   : > { %2347 = vmatpush.bf16.msra.mxu3 %v3842_v43  ;;  %2376 = vmatpush.bf16.msrb.mxu1 %v3558_v59  ;;  %v3459_v27 = vld [vmem:[%s5026_s29 + $0x320] sm:$0xf0]  ;;  %v986_v28 = vunpack.c.l.b16 %v714_v18  ;;  %v987_v31 = vunpack.c.h.b16 %v714_v18  ;;  %v3942_v43 = vor.u32 %v4320_v33, %v3939_v34  ;;  %v4229_v33 = vld [vmem:[%s5026_s29 + $0x3e4] sm:$0xf0] }
 0x160   : > { %2294 = vmatmul.bf16.vlgmr.msra.gmra.mxu0 %v5123_v48  ;;  %2330 = vmatmul.bf16.vlgmr.msra.gmra.mxu2 %v5130_v54  ;;  %v4256_v29 = vld [vmem:[%s5026_s29 + $0x4c4] sm:$0xf]  ;;  %v3462_v37 = vor.u32 %v4200_v25, %v3459_v27  ;;  %v3785_v34 = vld [vmem:[%s5026_s29 + $0x588] sm:$0xf] }
 0x161   : > { %2394 = vmatpush.bf16.msrb.mxu2 %v3814_v44  ;;  %2359 = vmatpush.bf16.msrb.mxu0 %v3270_v6  ;;  %v3686_v38 = vor.u32 %v4256_v29, %v3683_v30  ;;  %v4128_v39 = vld [vmem:[%s5026_s29 + $0xc4] sm:$0xf]  ;;  %v5173_v42 = vpack.c.b16 %v986_v28, %v986_v28  ;;  %v5178_v47 = vpack.c.b16 %v987_v31, %v987_v31  ;;  %v3305_v29 = vld [vmem:[%s5026_s29 + $0x1c8] sm:$0xf] }
 0x162   : > { %2348 = vmatmul.bf16.vlgmr.msra.gmra.mxu3 %v5134_v57  ;;  %v3427_v44 = vld [vmem:[%s5026_s29 + $0x2e0] sm:$0xf0]  ;;  %v3174_v55 = vor.u32 %v4128_v39, %v3171_v40  ;;  %v3818_v28 = vor.u32 %v4293_v17, %v3817_v16  ;;  %v4165_v30 = vld [vmem:[%s5026_s29 + $0x1e4] sm:$0xf0] }
 0x163   : > { %2412 = vmatpush.bf16.msrb.mxu3 %v4070_v49  ;;  %2377 = vmatpush.bf16.msrb.mxu1 %v3526_v7  ;;  %v5180_v49 = vpack.c.b16 %v988_v32, %v988_v32  ;;  %v4312_v50 = vld [vmem:[%s5026_s29 + $0x684] sm:$0xf]  ;;  %v3430_v56 = vor.u32 %v4192_v41, %v3427_v44  ;;  %v3561_v31 = vld [vmem:[%s5026_s29 + $0x3c8] sm:$0xf] }
 0x164   : > { %v3907_v51 = vld [vmem:[%s5026_s29 + $0x6a0] sm:$0xf0]  ;;  %v4041_v39 = vld [vmem:[%s5026_s29 + $0x788] sm:$0xf]  ;;  %v3562_v41 = vor.u32 %v4229_v33, %v3561_v31 }
 0x165   : > { %2395 = vmatpush.bf16.msrb.mxu2 %v3782_v60  ;;  %2360 = vmatpush.bf16.msrb.mxu0 %v3238_v19  ;;  %v4120_v59 = vld [vmem:[%s5026_s29 + $0x84] sm:$0xf]  ;;  %v3910_v62 = vor.u32 %v4312_v50, %v3907_v51  ;;  %v4349_v40 = vld [vmem:[%s5026_s29 + $0x7a4] sm:$0xf0] }
 0x166   : > { %v3139_v60 = vld [vmem:[%s5026_s29 + $0xa0] sm:$0xf0]  ;;  %v3273_v44 = vld [vmem:[%s5026_s29 + $0x188] sm:$0xf] }
 0x167   : > { %2413 = vmatpush.bf16.msrb.mxu3 %v4038_v0  ;;  %2378 = vmatpush.bf16.msrb.mxu1 %v3494_v21  ;;  %v4184_v61 = vld [vmem:[%s5026_s29 + $0x284] sm:$0xf]  ;;  %v3142_v4 = vor.u32 %v4120_v59, %v3139_v60  ;;  %v4357_v21 = vld [vmem:[%s5026_s29 + $0x7e4] sm:$0xf0] }
 0x168   : > { %v3395_v63 = vld [vmem:[%s5026_s29 + $0x2a0] sm:$0xf0]  ;;  %v4074_v32 = vor.u32 %v4357_v21, %v4073_v20  ;;  %v4221_v50 = vld [vmem:[%s5026_s29 + $0x3a4] sm:$0xf0] }
 0x169   : > { %2396 = vmatpush.bf16.msrb.mxu2 %v3750_v8  ;;  %2361 = vmatpush.bf16.msrb.mxu0 %v3206_v35  ;;  %v4240_v0 = vld [vmem:[%s5026_s29 + $0x444] sm:$0xf]  ;;  %v3398_v6 = vor.u32 %v4184_v61, %v3395_v63  ;;  %v4285_v35 = vld [vmem:[%s5026_s29 + $0x5a4] sm:$0xf0]  ;;  %v3530_v61 = vor.u32 %v4221_v50, %v3529_v46 }
 0x16a   : > { %v3619_v1 = vld [vmem:[%s5026_s29 + $0x460] sm:$0xf0]  ;;  %v3753_v51 = vld [vmem:[%s5026_s29 + $0x548] sm:$0xf] }
 0x16b   : > { %2414 = vmatpush.bf16.msrb.mxu3 %v4006_v12  ;;  %2379 = vmatpush.bf16.msrb.mxu1 %v3462_v37  ;;  %v4304_v2 = vld [vmem:[%s5026_s29 + $0x644] sm:$0xf]  ;;  %v3622_v7 = vor.u32 %v4240_v0, %v3619_v1  ;;  %v4009_v59 = vld [vmem:[%s5026_s29 + $0x748] sm:$0xf] }
 0x16c   : > { %v3875_v3 = vld [vmem:[%s5026_s29 + $0x660] sm:$0xf0]  ;;  %v4341_v60 = vld [vmem:[%s5026_s29 + $0x764] sm:$0xf0] }
 0x16d   : > { %2397 = vmatpush.bf16.msrb.mxu2 %v3718_v22  ;;  %2362 = vmatpush.bf16.msrb.mxu0 %v3174_v55  ;;  %v4112_v5 = vld [vmem:[%s5026_s29 + $0x44] sm:$0xf]  ;;  %v3878_v11 = vor.u32 %v4304_v2, %v3875_v3  ;;  %v4277_v55 = vld [vmem:[%s5026_s29 + $0x564] sm:$0xf0] }
 0x16e   : > { %2317 = vmatmul.bf16.gmra.mxu1 %v5178_v47  ;;  %v3107_v8 = vld [vmem:[%s5026_s29 + $0x60] sm:$0xf0]  ;;  %v3241_v63 = vld [vmem:[%s5026_s29 + $0x148] sm:$0xf] }
 0x16f   : > { %2415 = vmatpush.bf16.msrb.mxu3 %v3974_v26  ;;  %2380 = vmatpush.bf16.msrb.mxu1 %v3430_v56  ;;  %v4176_v9 = vld [vmem:[%s5026_s29 + $0x244] sm:$0xf]  ;;  %v3110_v18 = vor.u32 %v4112_v5, %v3107_v8  ;;  %v4042_v56 = vor.u32 %v4349_v40, %v4041_v39  ;;  %v4149_v0 = vld [vmem:[%s5026_s29 + $0x164] sm:$0xf0]  ;;  %v4010_v5 = vor.u32 %v4341_v60, %v4009_v59 }
 0x170   : > { %2299 = vmatmul.bf16.gmra.mxu0 %v5173_v42  ;;  %2335 = vmatmul.bf16.gmra.mxu2 %v5180_v49  ;;  %v3363_v10 = vld [vmem:[%s5026_s29 + $0x260] sm:$0xf0]  ;;  %v3497_v1 = vld [vmem:[%s5026_s29 + $0x348] sm:$0xf] }
 0x171   : > { %2398 = vmatpush.bf16.msrb.mxu2 %v3686_v38  ;;  %v4232_v12 = vld [vmem:[%s5026_s29 + $0x404] sm:$0xf]  ;;  %2363 = vmatpush.bf16.msrb.mxu0 %v3142_v4  ;;  %v3366_v22 = vor.u32 %v4176_v9, %v3363_v10  ;;  %v3306_v38 = vor.u32 %v4165_v30, %v3305_v29  ;;  %v4213_v2 = vld [vmem:[%s5026_s29 + $0x364] sm:$0xf0] }
 0x172   : > { %2353 = vmatmul.bf16.gmra.mxu3 %v5184_v52  ;;  %v3587_v13 = vld [vmem:[%s5026_s29 + $0x420] sm:$0xf0]  ;;  %v3721_v3 = vld [vmem:[%s5026_s29 + $0x508] sm:$0xf]  ;;  %v3498_v9 = vor.u32 %v4213_v2, %v3497_v1 }
 0x173   : > { %2416 = vmatpush.bf16.msrb.mxu3 %v3942_v43  ;;  %v4296_v14 = vld [vmem:[%s5026_s29 + $0x604] sm:$0xf]  ;;  %2381 = vmatpush.bf16.msrb.mxu1 %v3398_v6  ;;  %v3590_v23 = vor.u32 %v4232_v12, %v3587_v13  ;;  %v3786_v43 = vor.u32 %v4285_v35, %v3785_v34  ;;  %v4269_v4 = vld [vmem:[%s5026_s29 + $0x524] sm:$0xf0]  ;;  %v3242_v6 = vor.u32 %v4149_v0, %v3241_v63 }
 0x174   : > { %v3843_v15 = vld [vmem:[%s5026_s29 + $0x620] sm:$0xf0]  ;;  %v4333_v8 = vld [vmem:[%s5026_s29 + $0x724] sm:$0xf0]  ;;  %v3722_v10 = vor.u32 %v4269_v4, %v3721_v3 }
 0x175   : > { %2399 = vmatpush.bf16.msrb.mxu2 %v3654_v58  ;;  %v4104_v19 = vld [vmem:[%s5026_s29 + $0x4] sm:$0xf]  ;;  %v3846_v27 = vor.u32 %v4296_v14, %v3843_v15  ;;  %2364 = vmatpush.bf16.msrb.mxu0 %v3110_v18  ;;  %v3274_v58 = vor.u32 %v4157_v45, %v3273_v44  ;;  %v4141_v12 = vld [vmem:[%s5026_s29 + $0x124] sm:$0xf0] }
 0x176   : > { %v3075_v24 = vld [vmem:[%s5026_s29 + $0x20] sm:$0xf0]  ;;  %v3465_v13 = vld [vmem:[%s5026_s29 + $0x308] sm:$0xf] }
 0x177   : > { %2417 = vmatpush.bf16.msrb.mxu3 %v3910_v62  ;;  %v4168_v25 = vld [vmem:[%s5026_s29 + $0x204] sm:$0xf]  ;;  %v3078_v36 = vor.u32 %v4104_v19, %v3075_v24  ;;  %2382 = vmatpush.bf16.msrb.mxu1 %v3366_v22  ;;  %v3754_v62 = vor.u32 %v4277_v55, %v3753_v51  ;;  %v4205_v14 = vld [vmem:[%s5026_s29 + $0x324] sm:$0xf0] }
 0x178   : > { %v3331_v26 = vld [vmem:[%s5026_s29 + $0x220] sm:$0xf0]  ;;  %v3689_v15 = vld [vmem:[%s5026_s29 + $0x4c8] sm:$0xf]  ;;  %v3466_v21 = vor.u32 %v4205_v14, %v3465_v13  ;;  %v3307_v13 = vld [vmem:[%s5026_s29 + $0x1e8] sm:$0xf0] }
 0x179   : > { %2400 = vmatpush.bf16.msrb.mxu2 %v3622_v7  ;;  %v3334_v37 = vor.u32 %v4168_v25, %v3331_v26  ;;  %2365 = vmatpush.bf16.msrb.mxu0 %v3078_v36  ;;  %v3977_v7 = vld [vmem:[%s5026_s29 + $0x708] sm:$0xf]  ;;  %v4225_v14 = vld [vmem:[%s5026_s29 + $0x3cc] sm:$0xf] }
 0x17a   : > { %v4261_v16 = vld [vmem:[%s5026_s29 + $0x4e4] sm:$0xf0]  ;;  %v3978_v17 = vor.u32 %v4333_v8, %v3977_v7 }
 0x17b   : > { %2418 = vmatpush.bf16.msrb.mxu3 %v3878_v11  ;;  %2383 = vmatpush.bf16.msrb.mxu1 %v3334_v37  ;;  %v3209_v11 = vld [vmem:[%s5026_s29 + $0x108] sm:$0xf]  ;;  %v3690_v22 = vor.u32 %v4261_v16, %v3689_v15  ;;  %v3563_v15 = vld [vmem:[%s5026_s29 + $0x3e8] sm:$0xf0] }
 0x17c   : > { %v3210_v18 = vor.u32 %v4141_v12, %v3209_v11  ;;  %v3945_v19 = vld [vmem:[%s5026_s29 + $0x6c8] sm:$0xf]  ;;  %v4075_v11 = vld [vmem:[%s5026_s29 + $0x7e8] sm:$0xf0] }
 0x17d   : > { %2401 = vmatpush.bf16.msrb.mxu2 %v3590_v23  ;;  %2430 = vmatpush.bf16.msra.mxu0 %v3306_v38  ;;  %v4325_v20 = vld [vmem:[%s5026_s29 + $0x6e4] sm:$0xf0]  ;;  %v4161_v12 = vld [vmem:[%s5026_s29 + $0x1cc] sm:$0xf] }
 0x17e   : > { %2384 = vmatmul.bf16.vlgmr.msrb.gmra.mxu1 %v5128_v53  ;;  %v3177_v23 = vld [vmem:[%s5026_s29 + $0xc8] sm:$0xf]  ;;  %v3946_v29 = vor.u32 %v4325_v20, %v3945_v19  ;;  %v3787_v19 = vld [vmem:[%s5026_s29 + $0x5a8] sm:$0xf0] }
 0x17f   : > { %2419 = vmatpush.bf16.msrb.mxu3 %v3846_v27  ;;  %2448 = vmatpush.bf16.msra.mxu1 %v3562_v41  ;;  %v4133_v24 = vld [vmem:[%s5026_s29 + $0xe4] sm:$0xf0] }
 0x180   : > { %2366 = vmatmul.bf16.vlgmr.msrb.gmra.mxu0 %v5123_v48  ;;  %2402 = vmatmul.bf16.vlgmr.msrb.gmra.mxu2 %v5130_v54  ;;  %v3433_v25 = vld [vmem:[%s5026_s29 + $0x2c8] sm:$0xf]  ;;  %v3178_v30 = vor.u32 %v4133_v24, %v3177_v23  ;;  %v3566_v23 = vor.u32 %v4225_v14, %v3563_v15  ;;  %v4345_v24 = vld [vmem:[%s5026_s29 + $0x78c] sm:$0xf] }
 0x181   : > { %2466 = vmatpush.bf16.msra.mxu2 %v3818_v28  ;;  %2431 = vmatpush.bf16.msra.mxu0 %v3274_v58  ;;  %v4197_v26 = vld [vmem:[%s5026_s29 + $0x2e4] sm:$0xf0]  ;;  %v4313_v14 = vld [vmem:[%s5026_s29 + $0x68c] sm:$0xf] }
 0x182   : > { %2420 = vmatmul.bf16.vlgmr.msrb.gmra.mxu3 %v5134_v57  ;;  %v3657_v27 = vld [vmem:[%s5026_s29 + $0x488] sm:$0xf]  ;;  %v3434_v33 = vor.u32 %v4197_v26, %v3433_v25  ;;  %v4043_v25 = vld [vmem:[%s5026_s29 + $0x7a8] sm:$0xf0] }
 0x183   : > { %2484 = vmatpush.bf16.msra.mxu3 %v4074_v32  ;;  %2449 = vmatpush.bf16.msra.mxu1 %v3530_v61  ;;  %v4253_v28 = vld [vmem:[%s5026_s29 + $0x4a4] sm:$0xf0]  ;;  %v4289_v61 = vld [vmem:[%s5026_s29 + $0x5cc] sm:$0xf] }
 0x184   : > { %v3913_v31 = vld [vmem:[%s5026_s29 + $0x688] sm:$0xf]  ;;  %v3658_v34 = vor.u32 %v4253_v28, %v3657_v27  ;;  %v4153_v27 = vld [vmem:[%s5026_s29 + $0x18c] sm:$0xf] }
 0x185   : > { %2467 = vmatpush.bf16.msra.mxu2 %v3786_v43  ;;  %2432 = vmatpush.bf16.msra.mxu0 %v3242_v6  ;;  %v4317_v32 = vld [vmem:[%s5026_s29 + $0x6a4] sm:$0xf0]  ;;  %v3275_v28 = vld [vmem:[%s5026_s29 + $0x1a8] sm:$0xf0] }
 0x186   : > { %v3145_v35 = vld [vmem:[%s5026_s29 + $0x88] sm:$0xf]  ;;  %v3914_v41 = vor.u32 %v4317_v32, %v3913_v31  ;;  %v3531_v31 = vld [vmem:[%s5026_s29 + $0x3a8] sm:$0xf0] }
 0x187   : > { %2485 = vmatpush.bf16.msra.mxu3 %v4042_v56  ;;  %2450 = vmatpush.bf16.msra.mxu1 %v3498_v9  ;;  %v4125_v36 = vld [vmem:[%s5026_s29 + $0xa4] sm:$0xf0]  ;;  %v4273_v32 = vld [vmem:[%s5026_s29 + $0x54c] sm:$0xf] }
 0x188   : > { %v3401_v37 = vld [vmem:[%s5026_s29 + $0x288] sm:$0xf]  ;;  %v3146_v43 = vor.u32 %v4125_v36, %v3145_v35  ;;  %v4011_v35 = vld [vmem:[%s5026_s29 + $0x768] sm:$0xf0]  ;;  %v3278_v36 = vor.u32 %v4153_v27, %v3275_v28 }
 0x189   : > { %2468 = vmatpush.bf16.msra.mxu2 %v3754_v62  ;;  %2433 = vmatpush.bf16.msra.mxu0 %v3210_v18  ;;  %v4189_v38 = vld [vmem:[%s5026_s29 + $0x2a4] sm:$0xf0]  ;;  %v3819_v62 = vld [vmem:[%s5026_s29 + $0x5e8] sm:$0xf0] }
 0x18a   : > { %v3625_v39 = vld [vmem:[%s5026_s29 + $0x448] sm:$0xf]  ;;  %v3402_v46 = vor.u32 %v4189_v38, %v3401_v37  ;;  %v3822_v9 = vor.u32 %v4289_v61, %v3819_v62  ;;  %v4281_v18 = vld [vmem:[%s5026_s29 + $0x58c] sm:$0xf] }
 0x18b   : > { %2486 = vmatpush.bf16.msra.mxu3 %v4010_v5  ;;  %2451 = vmatpush.bf16.msra.mxu1 %v3466_v21  ;;  %v4245_v40 = vld [vmem:[%s5026_s29 + $0x464] sm:$0xf0]  ;;  %v3790_v26 = vor.u32 %v4281_v18, %v3787_v19  ;;  %v4145_v38 = vld [vmem:[%s5026_s29 + $0x14c] sm:$0xf] }
 0x18c   : > { %v3881_v44 = vld [vmem:[%s5026_s29 + $0x648] sm:$0xf]  ;;  %v3626_v50 = vor.u32 %v4245_v40, %v3625_v39  ;;  %v3243_v39 = vld [vmem:[%s5026_s29 + $0x168] sm:$0xf0] }
 0x18d   : > { %2469 = vmatpush.bf16.msra.mxu2 %v3722_v10  ;;  %2434 = vmatpush.bf16.msra.mxu0 %v3178_v30  ;;  %v4309_v45 = vld [vmem:[%s5026_s29 + $0x664] sm:$0xf0]  ;;  %v4353_v10 = vld [vmem:[%s5026_s29 + $0x7cc] sm:$0xf] }
 0x18e   : > { %v3113_v51 = vld [vmem:[%s5026_s29 + $0x48] sm:$0xf]  ;;  %2389 = vmatmul.bf16.gmra.mxu1 %v5178_v47  ;;  %v3882_v63 = vor.u32 %v4309_v45, %v3881_v44  ;;  %v4078_v21 = vor.u32 %v4353_v10, %v4075_v11  ;;  %v4217_v30 = vld [vmem:[%s5026_s29 + $0x38c] sm:$0xf] }
 0x18f   : > { %2487 = vmatpush.bf16.msra.mxu3 %v3978_v17  ;;  %2452 = vmatpush.bf16.msra.mxu1 %v3434_v33  ;;  %v4117_v55 = vld [vmem:[%s5026_s29 + $0x64] sm:$0xf0]  ;;  %v3755_v33 = vld [vmem:[%s5026_s29 + $0x568] sm:$0xf0]  ;;  %v3534_v37 = vor.u32 %v4217_v30, %v3531_v31 }
 0x190   : > { %v3369_v56 = vld [vmem:[%s5026_s29 + $0x248] sm:$0xf]  ;;  %2371 = vmatmul.bf16.gmra.mxu0 %v5173_v42  ;;  %2407 = vmatmul.bf16.gmra.mxu2 %v5180_v49  ;;  %v3114_v0 = vor.u32 %v4117_v55, %v3113_v51  ;;  %v3758_v40 = vor.u32 %v4273_v32, %v3755_v33  ;;  %v3499_v44 = vld [vmem:[%s5026_s29 + $0x368] sm:$0xf0]  ;;  %v3246_v55 = vor.u32 %v4145_v38, %v3243_v39 }
 0x191   : > { %2470 = vmatpush.bf16.msra.mxu2 %v3690_v22  ;;  %v4181_v58 = vld [vmem:[%s5026_s29 + $0x264] sm:$0xf0]  ;;  %2435 = vmatpush.bf16.msra.mxu0 %v3146_v43  ;;  %v3310_v22 = vor.u32 %v4161_v12, %v3307_v13  ;;  %v4209_v43 = vld [vmem:[%s5026_s29 + $0x34c] sm:$0xf] }
 0x192   : > { %v3593_v59 = vld [vmem:[%s5026_s29 + $0x408] sm:$0xf]  ;;  %2425 = vmatmul.bf16.gmra.mxu3 %v5184_v52  ;;  %v3370_v4 = vor.u32 %v4181_v58, %v3369_v56  ;;  %v4265_v45 = vld [vmem:[%s5026_s29 + $0x50c] sm:$0xf]  ;;  %v3502_v56 = vor.u32 %v4209_v43, %v3499_v44  ;;  %v4081_v43 = vld [vmem:[%s5026_s29 + $0x7d0] sm:$0xf] }
 0x193   : > { %2488 = vmatpush.bf16.msra.mxu3 %v3946_v29  ;;  %v4237_v60 = vld [vmem:[%s5026_s29 + $0x424] sm:$0xf0]  ;;  %2453 = vmatpush.bf16.msra.mxu1 %v3402_v46  ;;  %v4046_v29 = vor.u32 %v4345_v24, %v4043_v25  ;;  %v3723_v46 = vld [vmem:[%s5026_s29 + $0x528] sm:$0xf0]  ;;  %v4358_v44 = vld [vmem:[%s5026_s29 + $0x7ec] sm:$0xf0] }
 0x194   : > { %v3849_v1 = vld [vmem:[%s5026_s29 + $0x608] sm:$0xf]  ;;  %v3594_v5 = vor.u32 %v4237_v60, %v3593_v59  ;;  %v3979_v51 = vld [vmem:[%s5026_s29 + $0x728] sm:$0xf0]  ;;  %v3726_v60 = vor.u32 %v4265_v45, %v3723_v46 }
 0x195   : > { %2471 = vmatpush.bf16.msra.mxu2 %v3658_v34  ;;  %v4301_v2 = vld [vmem:[%s5026_s29 + $0x624] sm:$0xf0]  ;;  %2436 = vmatpush.bf16.msra.mxu0 %v3114_v0  ;;  %v4337_v34 = vld [vmem:[%s5026_s29 + $0x74c] sm:$0xf] }
 0x196   : > { %v3081_v3 = vld [vmem:[%s5026_s29 + $0x8] sm:$0xf]  ;;  %v3850_v16 = vor.u32 %v4301_v2, %v3849_v1  ;;  %v4137_v58 = vld [vmem:[%s5026_s29 + $0x10c] sm:$0xf] }
 0x197   : > { %2489 = vmatpush.bf16.msra.mxu3 %v3914_v41  ;;  %v4109_v6 = vld [vmem:[%s5026_s29 + $0x24] sm:$0xf0]  ;;  %2454 = vmatpush.bf16.msra.mxu1 %v3370_v4  ;;  %v4014_v41 = vor.u32 %v4337_v34, %v4011_v35  ;;  %v3211_v59 = vld [vmem:[%s5026_s29 + $0x128] sm:$0xf0] }
 0x198   : > { %v3337_v7 = vld [vmem:[%s5026_s29 + $0x208] sm:$0xf]  ;;  %v3082_v17 = vor.u32 %v4109_v6, %v3081_v3  ;;  %v4201_v62 = vld [vmem:[%s5026_s29 + $0x30c] sm:$0xf]  ;;  %v3214_v4 = vor.u32 %v4137_v58, %v3211_v59 }
 0x199   : > { %2472 = vmatpush.bf16.msra.mxu2 %v3626_v50  ;;  %v4173_v8 = vld [vmem:[%s5026_s29 + $0x224] sm:$0xf0]  ;;  %v4329_v50 = vld [vmem:[%s5026_s29 + $0x70c] sm:$0xf] }
 0x19a   : > { %v3338_v20 = vor.u32 %v4173_v8, %v3337_v7  ;;  %2437 = vmatpush.bf16.msra.mxu0 %v3082_v17  ;;  %v3982_v61 = vor.u32 %v4329_v50, %v3979_v51  ;;  %v4257_v0 = vld [vmem:[%s5026_s29 + $0x4cc] sm:$0xf] }
 0x19b   : > { %2490 = vmatpush.bf16.msra.mxu3 %v3882_v63  ;;  %v3467_v63 = vld [vmem:[%s5026_s29 + $0x328] sm:$0xf0] }
 0x19c   : > { %2455 = vmatpush.bf16.msra.mxu1 %v3338_v20  ;;  %v3691_v1 = vld [vmem:[%s5026_s29 + $0x4e8] sm:$0xf0] }
 0x19d   : > { %2473 = vmatpush.bf16.msra.mxu2 %v3594_v5  ;;  %v4321_v2 = vld [vmem:[%s5026_s29 + $0x6cc] sm:$0xf]  ;;  %v3470_v5 = vor.u32 %v4201_v62, %v3467_v63  ;;  %v3694_v8 = vor.u32 %v4257_v0, %v3691_v1  ;;  %v4082_v63 = vor.u32 %v4358_v44, %v4081_v43  ;;  %v3569_v0 = vld [vmem:[%s5026_s29 + $0x3d0] sm:$0xf] }
 0x19e   : > { %2502 = vmatpush.bf16.msrb.mxu0 %v3310_v22  ;;  %v3947_v3 = vld [vmem:[%s5026_s29 + $0x6e8] sm:$0xf0]  ;;  %v4230_v1 = vld [vmem:[%s5026_s29 + $0x3ec] sm:$0xf0] }
 0x19f   : > { %2491 = vmatpush.bf16.msra.mxu3 %v3850_v16  ;;  %2456 = vmatmul.bf16.vlgmr.msra.gmra.mxu1 %v5128_v53  ;;  %v4129_v6 = vld [vmem:[%s5026_s29 + $0xcc] sm:$0xf] }
 0x1a0   : > { %2520 = vmatpush.bf16.msrb.mxu1 %v3566_v23  ;;  %2438 = vmatmul.bf16.vlgmr.msra.gmra.mxu0 %v5123_v48  ;;  %v3179_v7 = vld [vmem:[%s5026_s29 + $0xe8] sm:$0xf0] }
 0x1a1   : > { %2538 = vmatpush.bf16.msrb.mxu2 %v3822_v9  ;;  %v3950_v9 = vor.u32 %v4321_v2, %v3947_v3  ;;  %v4193_v10 = vld [vmem:[%s5026_s29 + $0x2cc] sm:$0xf]  ;;  %v3182_v16 = vor.u32 %v4129_v6, %v3179_v7  ;;  %v3793_v2 = vld [vmem:[%s5026_s29 + $0x590] sm:$0xf] }
 0x1a2   : > { %2474 = vmatmul.bf16.vlgmr.msra.gmra.mxu2 %v5130_v54  ;;  %2492 = vmatmul.bf16.vlgmr.msra.gmra.mxu3 %v5134_v57  ;;  %v3435_v11 = vld [vmem:[%s5026_s29 + $0x2e8] sm:$0xf0]  ;;  %v4286_v3 = vld [vmem:[%s5026_s29 + $0x5ac] sm:$0xf0] }
 0x1a3   : > { %2556 = vmatpush.bf16.msrb.mxu3 %v4078_v21  ;;  %2503 = vmatpush.bf16.msrb.mxu0 %v3278_v36  ;;  %v4249_v12 = vld [vmem:[%s5026_s29 + $0x48c] sm:$0xf]  ;;  %v3438_v17 = vor.u32 %v4193_v10, %v3435_v11  ;;  %v3281_v10 = vld [vmem:[%s5026_s29 + $0x190] sm:$0xf]  ;;  %v3794_v11 = vor.u32 %v4286_v3, %v3793_v2 }
 0x1a4   : > { %2521 = vmatpush.bf16.msrb.mxu1 %v3534_v37  ;;  %v3659_v13 = vld [vmem:[%s5026_s29 + $0x4a8] sm:$0xf0]  ;;  %v3153_v2 = vld [vmem:[%s5026_s29 + $0x90] sm:$0xf] }
 0x1a5   : > { %2539 = vmatpush.bf16.msrb.mxu2 %v3790_v26  ;;  %v3915_v15 = vld [vmem:[%s5026_s29 + $0x6a8] sm:$0xf0]  ;;  %v3662_v20 = vor.u32 %v4249_v12, %v3659_v13  ;;  %v4158_v13 = vld [vmem:[%s5026_s29 + $0x1ac] sm:$0xf0] }
 0x1a6   : > { %v4121_v18 = vld [vmem:[%s5026_s29 + $0x8c] sm:$0xf]  ;;  %v3918_v21 = vor.u32 %v4313_v14, %v3915_v15  ;;  %v3537_v14 = vld [vmem:[%s5026_s29 + $0x390] sm:$0xf] }
 0x1a7   : > { %2557 = vmatpush.bf16.msrb.mxu3 %v4046_v29  ;;  %2504 = vmatpush.bf16.msrb.mxu0 %v3246_v55  ;;  %v3147_v19 = vld [vmem:[%s5026_s29 + $0xa8] sm:$0xf0]  ;;  %v4222_v15 = vld [vmem:[%s5026_s29 + $0x3ac] sm:$0xf0] }
 0x1a8   : > { %2522 = vmatpush.bf16.msrb.mxu1 %v3502_v56  ;;  %v4185_v22 = vld [vmem:[%s5026_s29 + $0x28c] sm:$0xf]  ;;  %v3150_v28 = vor.u32 %v4121_v18, %v3147_v19  ;;  %v3282_v18 = vor.u32 %v4158_v13, %v3281_v10  ;;  %v3538_v19 = vor.u32 %v4222_v15, %v3537_v14  ;;  %v4126_v3 = vld [vmem:[%s5026_s29 + $0xac] sm:$0xf0] }
 0x1a9   : > { %2540 = vmatpush.bf16.msrb.mxu2 %v3758_v40  ;;  %v3403_v23 = vld [vmem:[%s5026_s29 + $0x2a8] sm:$0xf0]  ;;  %v3825_v40 = vld [vmem:[%s5026_s29 + $0x5d0] sm:$0xf]  ;;  %v3154_v10 = vor.u32 %v4126_v3, %v3153_v2  ;;  %v4274_v2 = vld [vmem:[%s5026_s29 + $0x554] sm:$0xf] }
 0x1aa   : > { %v4241_v24 = vld [vmem:[%s5026_s29 + $0x44c] sm:$0xf]  ;;  %v3406_v29 = vor.u32 %v4185_v22, %v3403_v23  ;;  %v3249_v22 = vld [vmem:[%s5026_s29 + $0x150] sm:$0xf]  ;;  %v3763_v3 = vld [vmem:[%s5026_s29 + $0x570] sm:$0xf0] }
 0x1ab   : > { %2558 = vmatpush.bf16.msrb.mxu3 %v4014_v41  ;;  %2505 = vmatpush.bf16.msrb.mxu0 %v3214_v4  ;;  %v3627_v25 = vld [vmem:[%s5026_s29 + $0x468] sm:$0xf0]  ;;  %v4294_v41 = vld [vmem:[%s5026_s29 + $0x5ec] sm:$0xf0] }
 0x1ac   : > { %2523 = vmatpush.bf16.msrb.mxu1 %v3470_v5  ;;  %v4305_v26 = vld [vmem:[%s5026_s29 + $0x64c] sm:$0xf]  ;;  %v3630_v33 = vor.u32 %v4241_v24, %v3627_v25  ;;  %v3826_v62 = vor.u32 %v4294_v41, %v3825_v40  ;;  %v4049_v4 = vld [vmem:[%s5026_s29 + $0x790] sm:$0xf] }
 0x1ad   : > { %2541 = vmatpush.bf16.msrb.mxu2 %v3726_v60  ;;  %v3883_v27 = vld [vmem:[%s5026_s29 + $0x668] sm:$0xf0]  ;;  %v3313_v60 = vld [vmem:[%s5026_s29 + $0x1d0] sm:$0xf] }
 0x1ae   : > { %v4113_v30 = vld [vmem:[%s5026_s29 + $0x4c] sm:$0xf]  ;;  %v3886_v34 = vor.u32 %v4305_v26, %v3883_v27  ;;  %v4350_v5 = vld [vmem:[%s5026_s29 + $0x7ac] sm:$0xf0] }
 0x1af   : > { %2559 = vmatpush.bf16.msrb.mxu3 %v3982_v61  ;;  %2506 = vmatpush.bf16.msrb.mxu0 %v3182_v16  ;;  %v3115_v31 = vld [vmem:[%s5026_s29 + $0x68] sm:$0xf0]  ;;  %v4166_v61 = vld [vmem:[%s5026_s29 + $0x1ec] sm:$0xf0]  ;;  %v4050_v12 = vor.u32 %v4350_v5, %v4049_v4 }
 0x1b0   : > { %2524 = vmatpush.bf16.msrb.mxu1 %v3438_v17  ;;  %v4177_v32 = vld [vmem:[%s5026_s29 + $0x24c] sm:$0xf]  ;;  %2443 = vmatmul.bf16.gmra.mxu0 %v5173_v42  ;;  %v3118_v45 = vor.u32 %v4113_v30, %v3115_v31  ;;  %v3761_v16 = vld [vmem:[%s5026_s29 + $0x550] sm:$0xf] }
 0x1b1   : > { %2542 = vmatpush.bf16.msrb.mxu2 %v3694_v8  ;;  %v3371_v35 = vld [vmem:[%s5026_s29 + $0x268] sm:$0xf0]  ;;  %2461 = vmatmul.bf16.gmra.mxu1 %v5178_v47  ;;  %v3314_v8 = vor.u32 %v4166_v61, %v3313_v60  ;;  %v4278_v17 = vld [vmem:[%s5026_s29 + $0x56c] sm:$0xf0] }
 0x1b2   : > { %v4233_v36 = vld [vmem:[%s5026_s29 + $0x40c] sm:$0xf]  ;;  %2479 = vmatmul.bf16.gmra.mxu2 %v5180_v49  ;;  %2497 = vmatmul.bf16.gmra.mxu3 %v5184_v52  ;;  %v3374_v46 = vor.u32 %v4177_v32, %v3371_v35  ;;  %v4150_v23 = vld [vmem:[%s5026_s29 + $0x16c] sm:$0xf0]  ;;  %v3762_v26 = vor.u32 %v4278_v17, %v3761_v16 }
 0x1b3   : > { %2560 = vmatpush.bf16.msrb.mxu3 %v3950_v9  ;;  %v3595_v37 = vld [vmem:[%s5026_s29 + $0x428] sm:$0xf0]  ;;  %2507 = vmatpush.bf16.msrb.mxu0 %v3150_v28  ;;  %v3570_v9 = vor.u32 %v4230_v1, %v3569_v0  ;;  %v3505_v24 = vld [vmem:[%s5026_s29 + $0x350] sm:$0xf]  ;;  %v3250_v30 = vor.u32 %v4150_v23, %v3249_v22 }
 0x1b4   : > { %v4297_v38 = vld [vmem:[%s5026_s29 + $0x60c] sm:$0xf]  ;;  %2525 = vmatpush.bf16.msrb.mxu1 %v3406_v29  ;;  %v3598_v56 = vor.u32 %v4233_v36, %v3595_v37  ;;  %v4214_v25 = vld [vmem:[%s5026_s29 + $0x36c] sm:$0xf0] }
 0x1b5   : > { %2543 = vmatpush.bf16.msrb.mxu2 %v3662_v20  ;;  %v3851_v39 = vld [vmem:[%s5026_s29 + $0x628] sm:$0xf0]  ;;  %v4017_v20 = vld [vmem:[%s5026_s29 + $0x750] sm:$0xf]  ;;  %v3506_v31 = vor.u32 %v4214_v25, %v3505_v24 }
 0x1b6   : > { %v4105_v50 = vld [vmem:[%s5026_s29 + $0xc] sm:$0xf]  ;;  %v3854_v58 = vor.u32 %v4297_v38, %v3851_v39  ;;  %v3729_v28 = vld [vmem:[%s5026_s29 + $0x510] sm:$0xf] }
 0x1b7   : > { %2561 = vmatpush.bf16.msrb.mxu3 %v3918_v21  ;;  %v3083_v51 = vld [vmem:[%s5026_s29 + $0x28] sm:$0xf0]  ;;  %2508 = vmatpush.bf16.msrb.mxu0 %v3118_v45  ;;  %v4342_v21 = vld [vmem:[%s5026_s29 + $0x76c] sm:$0xf0] }
 0x1b8   : > { %v4169_v55 = vld [vmem:[%s5026_s29 + $0x20c] sm:$0xf]  ;;  %2526 = vmatpush.bf16.msrb.mxu1 %v3374_v46  ;;  %v3086_v6 = vor.u32 %v4105_v50, %v3083_v51  ;;  %v4018_v27 = vor.u32 %v4342_v21, %v4017_v20  ;;  %v4270_v29 = vld [vmem:[%s5026_s29 + $0x52c] sm:$0xf0] }
 0x1b9   : > { %2544 = vmatpush.bf16.msrb.mxu2 %v3630_v33  ;;  %v3339_v59 = vld [vmem:[%s5026_s29 + $0x228] sm:$0xf0]  ;;  %v3985_v32 = vld [vmem:[%s5026_s29 + $0x710] sm:$0xf]  ;;  %v3730_v38 = vor.u32 %v4270_v29, %v3729_v28 }
 0x1ba   : > { %v3342_v7 = vor.u32 %v4169_v55, %v3339_v59  ;;  %v4334_v33 = vld [vmem:[%s5026_s29 + $0x72c] sm:$0xf0] }
 0x1bb   : > { %2562 = vmatpush.bf16.msrb.mxu3 %v3886_v34  ;;  %2509 = vmatpush.bf16.msrb.mxu0 %v3086_v6  ;;  %v3217_v34 = vld [vmem:[%s5026_s29 + $0x110] sm:$0xf]  ;;  %v3986_v39 = vor.u32 %v4334_v33, %v3985_v32  ;;  %v4354_v32 = vld [vmem:[%s5026_s29 + $0x7d4] sm:$0xf] }
 0x1bc   : > { %2527 = vmatpush.bf16.msrb.mxu1 %v3342_v7  ;;  %v4142_v35 = vld [vmem:[%s5026_s29 + $0x12c] sm:$0xf0]  ;;  %v4083_v33 = vld [vmem:[%s5026_s29 + $0x7f0] sm:$0xf0] }
 0x1bd   : > { %2545 = vmatpush.bf16.msrb.mxu2 %v3598_v56  ;;  %v3473_v36 = vld [vmem:[%s5026_s29 + $0x310] sm:$0xf]  ;;  %v3218_v43 = vor.u32 %v4142_v35, %v3217_v34  ;;  %v4162_v34 = vld [vmem:[%s5026_s29 + $0x1d4] sm:$0xf] }
 0x1be   : > { %v4206_v37 = vld [vmem:[%s5026_s29 + $0x32c] sm:$0xf0] }
 0x1bf   : > { %2563 = vmatpush.bf16.msrb.mxu3 %v3854_v58  ;;  %2574 = vmatpush.bf16.msra.mxu0 %v3314_v8  ;;  %v3697_v40 = vld [vmem:[%s5026_s29 + $0x4d0] sm:$0xf]  ;;  %v3474_v44 = vor.u32 %v4206_v37, %v3473_v36  ;;  %v3315_v37 = vld [vmem:[%s5026_s29 + $0x1f0] sm:$0xf0] }
 0x1c0   : > { %2592 = vmatpush.bf16.msra.mxu1 %v3570_v9  ;;  %2510 = vmatmul.bf16.vlgmr.msrb.gmra.mxu0 %v5123_v48  ;;  %v4262_v41 = vld [vmem:[%s5026_s29 + $0x4ec] sm:$0xf0] }
 0x1c1   : > { %2610 = vmatpush.bf16.msra.mxu2 %v3826_v62  ;;  %2528 = vmatmul.bf16.vlgmr.msrb.gmra.mxu1 %v5128_v53  ;;  %v3953_v45 = vld [vmem:[%s5026_s29 + $0x6d0] sm:$0xf]  ;;  %v3698_v58 = vor.u32 %v4262_v41, %v3697_v40 }
 0x1c2   : > { %2546 = vmatmul.bf16.vlgmr.msrb.gmra.mxu2 %v5130_v54  ;;  %2564 = vmatmul.bf16.vlgmr.msrb.gmra.mxu3 %v5134_v57  ;;  %v4326_v46 = vld [vmem:[%s5026_s29 + $0x6ec] sm:$0xf0] }
 0x1c3   : > { %2628 = vmatpush.bf16.msra.mxu3 %v4082_v63  ;;  %2575 = vmatpush.bf16.msra.mxu0 %v3282_v18  ;;  %v3185_v50 = vld [vmem:[%s5026_s29 + $0xd0] sm:$0xf]  ;;  %v3954_v59 = vor.u32 %v4326_v46, %v3953_v45  ;;  %v4282_v45 = vld [vmem:[%s5026_s29 + $0x594] sm:$0xf] }
 0x1c4   : > { %2593 = vmatpush.bf16.msra.mxu1 %v3538_v19  ;;  %v4134_v51 = vld [vmem:[%s5026_s29 + $0xec] sm:$0xf0]  ;;  %v3795_v46 = vld [vmem:[%s5026_s29 + $0x5b0] sm:$0xf0] }
 0x1c5   : > { %2611 = vmatpush.bf16.msra.mxu2 %v3794_v11  ;;  %v3441_v55 = vld [vmem:[%s5026_s29 + $0x2d0] sm:$0xf]  ;;  %v3186_v62 = vor.u32 %v4134_v51, %v3185_v50  ;;  %v3318_v50 = vor.u32 %v4162_v34, %v3315_v37  ;;  %v4130_v34 = vld [vmem:[%s5026_s29 + $0xd4] sm:$0xf] }
 0x1c6   : > { %v4198_v56 = vld [vmem:[%s5026_s29 + $0x2ec] sm:$0xf0] }
 0x1c7   : > { %2629 = vmatpush.bf16.msra.mxu3 %v4050_v12  ;;  %2576 = vmatpush.bf16.msra.mxu0 %v3250_v30  ;;  %v3665_v60 = vld [vmem:[%s5026_s29 + $0x490] sm:$0xf]  ;;  %v3442_v63 = vor.u32 %v4198_v56, %v3441_v55  ;;  %v4290_v30 = vld [vmem:[%s5026_s29 + $0x5d4] sm:$0xf] }
 0x1c8   : > { %2594 = vmatpush.bf16.msra.mxu1 %v3506_v31  ;;  %v4254_v61 = vld [vmem:[%s5026_s29 + $0x4ac] sm:$0xf0]  ;;  %v3827_v31 = vld [vmem:[%s5026_s29 + $0x5f0] sm:$0xf0] }
 0x1c9   : > { %2612 = vmatpush.bf16.msra.mxu2 %v3762_v26  ;;  %v3921_v0 = vld [vmem:[%s5026_s29 + $0x690] sm:$0xf]  ;;  %v3666_v6 = vor.u32 %v4254_v61, %v3665_v60  ;;  %v4346_v55 = vld [vmem:[%s5026_s29 + $0x794] sm:$0xf] }
 0x1ca   : > { %v4318_v1 = vld [vmem:[%s5026_s29 + $0x6ac] sm:$0xf0]  ;;  %v4051_v56 = vld [vmem:[%s5026_s29 + $0x7b0] sm:$0xf0] }
 0x1cb   : > { %2630 = vmatpush.bf16.msra.mxu3 %v4018_v27  ;;  %2577 = vmatpush.bf16.msra.mxu0 %v3218_v43  ;;  %v3409_v4 = vld [vmem:[%s5026_s29 + $0x290] sm:$0xf]  ;;  %v3922_v7 = vor.u32 %v4318_v1, %v3921_v0  ;;  %v3830_v43 = vor.u32 %v4290_v30, %v3827_v31  ;;  %v4218_v60 = vld [vmem:[%s5026_s29 + $0x394] sm:$0xf] }
 0x1cc   : > { %2595 = vmatpush.bf16.msra.mxu1 %v3474_v44  ;;  %v4190_v5 = vld [vmem:[%s5026_s29 + $0x2ac] sm:$0xf0]  ;;  %v4086_v44 = vor.u32 %v4354_v32, %v4083_v33  ;;  %v3539_v61 = vld [vmem:[%s5026_s29 + $0x3b0] sm:$0xf0] }
 0x1cd   : > { %2613 = vmatpush.bf16.msra.mxu2 %v3730_v38  ;;  %v3633_v8 = vld [vmem:[%s5026_s29 + $0x450] sm:$0xf]  ;;  %v3410_v11 = vor.u32 %v4190_v5, %v3409_v4  ;;  %v4226_v38 = vld [vmem:[%s5026_s29 + $0x3d4] sm:$0xf]  ;;  %v3542_v1 = vor.u32 %v4218_v60, %v3539_v61 }
 0x1ce   : > { %v4246_v9 = vld [vmem:[%s5026_s29 + $0x46c] sm:$0xf0]  ;;  %v4338_v4 = vld [vmem:[%s5026_s29 + $0x754] sm:$0xf] }
 0x1cf   : > { %2631 = vmatpush.bf16.msra.mxu3 %v3986_v39  ;;  %2578 = vmatpush.bf16.msra.mxu0 %v3186_v62  ;;  %v3889_v12 = vld [vmem:[%s5026_s29 + $0x650] sm:$0xf]  ;;  %v3634_v19 = vor.u32 %v4246_v9, %v3633_v8  ;;  %v3571_v39 = vld [vmem:[%s5026_s29 + $0x3f0] sm:$0xf0]  ;;  %v3798_v62 = vor.u32 %v4282_v45, %v3795_v46 }
 0x1d0   : > { %2596 = vmatpush.bf16.msra.mxu1 %v3442_v63  ;;  %v4310_v13 = vld [vmem:[%s5026_s29 + $0x66c] sm:$0xf0]  ;;  %2515 = vmatmul.bf16.gmra.mxu0 %v5173_v42  ;;  %v3574_v51 = vor.u32 %v4226_v38, %v3571_v39  ;;  %v4054_v63 = vor.u32 %v4346_v55, %v4051_v56  ;;  %v4019_v5 = vld [vmem:[%s5026_s29 + $0x770] sm:$0xf0] }
 0x1d1   : > { %2614 = vmatpush.bf16.msra.mxu2 %v3698_v58  ;;  %v3121_v14 = vld [vmem:[%s5026_s29 + $0x50] sm:$0xf]  ;;  %v3890_v20 = vor.u32 %v4310_v13, %v3889_v12  ;;  %2533 = vmatmul.bf16.gmra.mxu1 %v5178_v47  ;;  %v4154_v58 = vld [vmem:[%s5026_s29 + $0x194] sm:$0xf]  ;;  %v3766_v12 = vor.u32 %v4274_v2, %v3763_v3  ;;  %v4022_v13 = vor.u32 %v4338_v4, %v4019_v5 }
 0x1d2   : > { %v4118_v15 = vld [vmem:[%s5026_s29 + $0x6c] sm:$0xf0]  ;;  %2551 = vmatmul.bf16.gmra.mxu2 %v5180_v49  ;;  %2569 = vmatmul.bf16.gmra.mxu3 %v5184_v52  ;;  %v3251_v8 = vld [vmem:[%s5026_s29 + $0x170] sm:$0xf0] }
 0x1d3   : > { %2632 = vmatpush.bf16.msra.mxu3 %v3954_v59  ;;  %v3377_v16 = vld [vmem:[%s5026_s29 + $0x250] sm:$0xf]  ;;  %2579 = vmatpush.bf16.msra.mxu0 %v3154_v10  ;;  %v3122_v24 = vor.u32 %v4118_v15, %v3121_v14  ;;  %v3283_v59 = vld [vmem:[%s5026_s29 + $0x1b0] sm:$0xf0] }
 0x1d4   : > { %v4182_v17 = vld [vmem:[%s5026_s29 + $0x26c] sm:$0xf0]  ;;  %2597 = vmatpush.bf16.msra.mxu1 %v3410_v11  ;;  %v3286_v0 = vor.u32 %v4154_v58, %v3283_v59  ;;  %v4210_v9 = vld [vmem:[%s5026_s29 + $0x354] sm:$0xf] }
 0x1d5   : > { %v3601_v18 = vld [vmem:[%s5026_s29 + $0x410] sm:$0xf]  ;;  %2615 = vmatpush.bf16.msra.mxu2 %v3666_v6  ;;  %v3378_v25 = vor.u32 %v4182_v17, %v3377_v16  ;;  %v4146_v6 = vld [vmem:[%s5026_s29 + $0x154] sm:$0xf] }
 0x1d6   : > { %v4238_v21 = vld [vmem:[%s5026_s29 + $0x42c] sm:$0xf0]  ;;  %v3507_v10 = vld [vmem:[%s5026_s29 + $0x370] sm:$0xf0]  ;;  %v3254_v16 = vor.u32 %v4146_v6, %v3251_v8 }
 0x1d7   : > { %2633 = vmatpush.bf16.msra.mxu3 %v3922_v7  ;;  %v3857_v22 = vld [vmem:[%s5026_s29 + $0x610] sm:$0xf]  ;;  %v3602_v35 = vor.u32 %v4238_v21, %v3601_v18  ;;  %2580 = vmatpush.bf16.msra.mxu0 %v3122_v24  ;;  %v4266_v14 = vld [vmem:[%s5026_s29 + $0x514] sm:$0xf]  ;;  %v3510_v17 = vor.u32 %v4210_v9, %v3507_v10 }
 0x1d8   : > { %v4302_v23 = vld [vmem:[%s5026_s29 + $0x62c] sm:$0xf0]  ;;  %2598 = vmatpush.bf16.msra.mxu1 %v3378_v25  ;;  %v3731_v15 = vld [vmem:[%s5026_s29 + $0x530] sm:$0xf0] }
 0x1d9   : > { %v3089_v26 = vld [vmem:[%s5026_s29 + $0x10] sm:$0xf]  ;;  %2616 = vmatpush.bf16.msra.mxu2 %v3634_v19  ;;  %v3858_v36 = vor.u32 %v4302_v23, %v3857_v22  ;;  %v4330_v18 = vld [vmem:[%s5026_s29 + $0x714] sm:$0xf]  ;;  %v3734_v25 = vor.u32 %v4266_v14, %v3731_v15 }
 0x1da   : > { %v4110_v27 = vld [vmem:[%s5026_s29 + $0x2c] sm:$0xf0]  ;;  %v3987_v19 = vld [vmem:[%s5026_s29 + $0x730] sm:$0xf0] }
 0x1db   : > { %v3345_v28 = vld [vmem:[%s5026_s29 + $0x210] sm:$0xf]  ;;  %2634 = vmatpush.bf16.msra.mxu3 %v3890_v20  ;;  %v3090_v40 = vor.u32 %v4110_v27, %v3089_v26  ;;  %v2313_v11 = vpop.f32.mrf.mxu1  ;;  %v4138_v20 = vld [vmem:[%s5026_s29 + $0x114] sm:$0xf]  ;;  %v3990_v26 = vor.u32 %v4330_v18, %v3987_v19 }
 0x1dc   : > { %v4174_v29 = vld [vmem:[%s5026_s29 + $0x22c] sm:$0xf0]  ;;  %v3219_v22 = vld [vmem:[%s5026_s29 + $0x130] sm:$0xf0] }
 0x1dd   : > { %v3346_v41 = vor.u32 %v4174_v29, %v3345_v28  ;;  %2617 = vmatpush.bf16.msra.mxu2 %v3602_v35  ;;  %2581 = vmatpush.bf16.msra.mxu0 %v3090_v40  ;;  %v2295_v7 = vpop.f32.mrf.mxu0  ;;  %v4202_v23 = vld [vmem:[%s5026_s29 + $0x314] sm:$0xf]  ;;  %v3222_v30 = vor.u32 %v4138_v20, %v3219_v22 }
 0x1de   : > { %v2314_v21 = vadd.f32 %v2313_v11, %v2295_v7  ;;  %v3475_v24 = vld [vmem:[%s5026_s29 + $0x330] sm:$0xf0] }
 0x1df   : > { %2635 = vmatpush.bf16.msra.mxu3 %v3858_v36  ;;  %2599 = vmatpush.bf16.msra.mxu1 %v3346_v41  ;;  %v4258_v27 = vld [vmem:[%s5026_s29 + $0x4d4] sm:$0xf]  ;;  %v3478_v31 = vor.u32 %v4202_v23, %v3475_v24 }
 0x1e0   : > { %2582 = vmatmul.bf16.vlgmr.msra.gmra.mxu0 %v5123_v48  ;;  %v3699_v28 = vld [vmem:[%s5026_s29 + $0x4f0] sm:$0xf0] }
 0x1e1   : > { %2682 = vmatpush.bf16.msrb.mxu2 %v3830_v43  ;;  %2646 = vmatpush.bf16.msrb.mxu0 %v3318_v50  ;;  %v4322_v32 = vld [vmem:[%s5026_s29 + $0x6d4] sm:$0xf] }
 0x1e2   : > { %2618 = vmatmul.bf16.vlgmr.msra.gmra.mxu2 %v5130_v54  ;;  %2600 = vmatmul.bf16.vlgmr.msra.gmra.mxu1 %v5128_v53  ;;  %v3955_v33 = vld [vmem:[%s5026_s29 + $0x6f0] sm:$0xf0] }
 0x1e3   : > { %2700 = vmatpush.bf16.msrb.mxu3 %v4086_v44  ;;  %2664 = vmatpush.bf16.msrb.mxu1 %v3574_v51  ;;  %v2331_v29 = vpop.f32.mrf.mxu2  ;;  %v3187_v38 = vld [vmem:[%s5026_s29 + $0xf0] sm:$0xf0]  ;;  %v2315_v41 = vpop.f32.mrf.mxu1  ;;  %v3702_v44 = vor.u32 %v4258_v27, %v3699_v28  ;;  %v3958_v45 = vor.u32 %v4322_v32, %v3955_v33  ;;  %v4295_v32 = vld [vmem:[%s5026_s29 + $0x5f4] sm:$0xf0] }
 0x1e4   : > { %2636 = vmatmul.bf16.vlgmr.msra.gmra.mxu3 %v5134_v57  ;;  %v2332_v35 = vadd.f32 %v2331_v29, %v2314_v21  ;;  %v4194_v39 = vld [vmem:[%s5026_s29 + $0x2d4] sm:$0xf]  ;;  %v3190_v51 = vor.u32 %v4130_v34, %v3187_v38  ;;  %v4089_v33 = vld [vmem:[%s5026_s29 + $0x7d8] sm:$0xf] }
 0x1e5   : > { %2683 = vmatpush.bf16.msrb.mxu2 %v3798_v62  ;;  %2647 = vmatpush.bf16.msrb.mxu0 %v3286_v0  ;;  %v2349_v36 = vpop.f32.mrf.mxu3  ;;  %v2297_v37 = vpop.f32.mrf.mxu0  ;;  %v3443_v40 = vld [vmem:[%s5026_s29 + $0x2f0] sm:$0xf0]  ;;  %v4359_v34 = vld [vmem:[%s5026_s29 + $0x7f4] sm:$0xf0] }
 0x1e6   : > { %v2350_v43 = vadd.f32 %v2349_v36, %v2332_v35  ;;  %v4250_v46 = vld [vmem:[%s5026_s29 + $0x494] sm:$0xf]  ;;  %v3446_v55 = vor.u32 %v4194_v39, %v3443_v40  ;;  %v3321_v35 = vld [vmem:[%s5026_s29 + $0x1d8] sm:$0xf] }
 0x1e7   : > { %2701 = vmatpush.bf16.msrb.mxu3 %v4054_v63  ;;  %2665 = vmatpush.bf16.msrb.mxu1 %v3542_v1  ;;  %v3667_v50 = vld [vmem:[%s5026_s29 + $0x4b0] sm:$0xf0]  ;;  %v2316_v63 = vadd.f32 %v2315_v41, %v2297_v37  ;;  %v4167_v38 = vld [vmem:[%s5026_s29 + $0x1f4] sm:$0xf0] }
 0x1e8   : > { %v4314_v56 = vld [vmem:[%s5026_s29 + $0x694] sm:$0xf]  ;;  %2862 = vst [vmem:[%s5480_s9] sm:$0xff] %v2350_v43  ;;  %v3670_v0 = vor.u32 %v4250_v46, %v3667_v50  ;;  %v3577_v39 = vld [vmem:[%s5026_s29 + $0x3d8] sm:$0xf] }
 0x1e9   : > { %2684 = vmatpush.bf16.msrb.mxu2 %v3766_v12  ;;  %2648 = vmatpush.bf16.msrb.mxu0 %v3254_v16  ;;  %v3923_v58 = vld [vmem:[%s5026_s29 + $0x6b0] sm:$0xf0]  ;;  %v4231_v40 = vld [vmem:[%s5026_s29 + $0x3f4] sm:$0xf0] }
 0x1ea   : > { %v4122_v59 = vld [vmem:[%s5026_s29 + $0x94] sm:$0xf]  ;;  %v3926_v1 = vor.u32 %v4314_v56, %v3923_v58  ;;  %v3801_v56 = vld [vmem:[%s5026_s29 + $0x598] sm:$0xf] }
 0x1eb   : > { %2702 = vmatpush.bf16.msrb.mxu3 %v4022_v13  ;;  %2666 = vmatpush.bf16.msrb.mxu1 %v3510_v17  ;;  %v3155_v60 = vld [vmem:[%s5026_s29 + $0xb0] sm:$0xf0]  ;;  %v2333_v4 = vpop.f32.mrf.mxu2  ;;  %v2318_v16 = vpop.f32.mrf.mxu1  ;;  %v4287_v58 = vld [vmem:[%s5026_s29 + $0x5b4] sm:$0xf0] }
 0x1ec   : > { %v4186_v61 = vld [vmem:[%s5026_s29 + $0x294] sm:$0xf]  ;;  %v3158_v5 = vor.u32 %v4122_v59, %v3155_v60  ;;  %v2334_v10 = vadd.f32 %v2333_v4, %v2316_v63  ;;  %v3322_v60 = vor.u32 %v4167_v38, %v3321_v35  ;;  %v4351_v63 = vld [vmem:[%s5026_s29 + $0x7b4] sm:$0xf0] }
 0x1ed   : > { %2685 = vmatpush.bf16.msrb.mxu2 %v3734_v25  ;;  %2649 = vmatpush.bf16.msrb.mxu0 %v3222_v30  ;;  %v3411_v62 = vld [vmem:[%s5026_s29 + $0x2b0] sm:$0xf0]  ;;  %v2351_v11 = vpop.f32.mrf.mxu3  ;;  %v2300_v12 = vpop.f32.mrf.mxu0  ;;  %v4223_v4 = vld [vmem:[%s5026_s29 + $0x3b4] sm:$0xf0] }
 0x1ee   : > { %v4242_v2 = vld [vmem:[%s5026_s29 + $0x454] sm:$0xf]  ;;  %v3414_v6 = vor.u32 %v4186_v61, %v3411_v62  ;;  %v2352_v19 = vadd.f32 %v2351_v11, %v2334_v10  ;;  %v2319_v30 = vadd.f32 %v2318_v16, %v2300_v12  ;;  %v3578_v61 = vor.u32 %v4231_v40, %v3577_v39  ;;  %v4057_v62 = vld [vmem:[%s5026_s29 + $0x798] sm:$0xf] }
 0x1ef   : > { %2703 = vmatpush.bf16.msrb.mxu3 %v3990_v26  ;;  %2667 = vmatpush.bf16.msrb.mxu1 %v3478_v31  ;;  %v3635_v3 = vld [vmem:[%s5026_s29 + $0x470] sm:$0xf0]  ;;  %v3833_v31 = vld [vmem:[%s5026_s29 + $0x5d8] sm:$0xf] }
 0x1f0   : > { %v4306_v7 = vld [vmem:[%s5026_s29 + $0x654] sm:$0xf]  ;;  %v3638_v20 = vor.u32 %v4242_v2, %v3635_v3  ;;  %2870 = vst [vmem:[%s5480_s9 + $0x40] sm:$0xff] %v2352_v19  ;;  %2587 = vmatmul.bf16.gmra.mxu0 %v5173_v42  ;;  %v4159_v2 = vld [vmem:[%s5026_s29 + $0x1b4] sm:$0xf0] }
 0x1f1   : > { %2686 = vmatpush.bf16.msrb.mxu2 %v3702_v44  ;;  %2650 = vmatpush.bf16.msrb.mxu0 %v3190_v51  ;;  %v3891_v8 = vld [vmem:[%s5026_s29 + $0x670] sm:$0xf0]  ;;  %v3834_v51 = vor.u32 %v4295_v32, %v3833_v31  ;;  %v3545_v3 = vld [vmem:[%s5026_s29 + $0x398] sm:$0xf] }
 0x1f2   : > { %v4114_v9 = vld [vmem:[%s5026_s29 + $0x54] sm:$0xf]  ;;  %v3894_v21 = vor.u32 %v4306_v7, %v3891_v8  ;;  %2623 = vmatmul.bf16.gmra.mxu2 %v5180_v49  ;;  %2605 = vmatmul.bf16.gmra.mxu1 %v5178_v47  ;;  %v3546_v8 = vor.u32 %v4223_v4, %v3545_v3  ;;  %v4279_v10 = vld [vmem:[%s5026_s29 + $0x574] sm:$0xf0] }
 0x1f3   : > { %2704 = vmatpush.bf16.msrb.mxu3 %v3958_v45  ;;  %2668 = vmatpush.bf16.msrb.mxu1 %v3446_v55  ;;  %v3123_v13 = vld [vmem:[%s5026_s29 + $0x70] sm:$0xf0]  ;;  %v2336_v41 = vpop.f32.mrf.mxu2  ;;  %v4090_v55 = vor.u32 %v4359_v34, %v4089_v33  ;;  %v2320_v59 = vpop.f32.mrf.mxu1  ;;  %v4025_v12 = vld [vmem:[%s5026_s29 + $0x758] sm:$0xf] }
 0x1f4   : > { %v4178_v14 = vld [vmem:[%s5026_s29 + $0x254] sm:$0xf]  ;;  %v3126_v25 = vor.u32 %v4114_v9, %v3123_v13  ;;  %2641 = vmatmul.bf16.gmra.mxu3 %v5184_v52  ;;  %v2337_v45 = vadd.f32 %v2336_v41, %v2319_v30  ;;  %v3769_v9 = vld [vmem:[%s5026_s29 + $0x558] sm:$0xf] }
 0x1f5   : > { %v3379_v15 = vld [vmem:[%s5026_s29 + $0x270] sm:$0xf0]  ;;  %2687 = vmatpush.bf16.msrb.mxu2 %v3670_v0  ;;  %2651 = vmatpush.bf16.msrb.mxu0 %v3158_v5  ;;  %v2354_v46 = vpop.f32.mrf.mxu3  ;;  %v2302_v50 = vpop.f32.mrf.mxu0  ;;  %v3289_v0 = vld [vmem:[%s5026_s29 + $0x198] sm:$0xf]  ;;  %v3802_v5 = vor.u32 %v4287_v58, %v3801_v56 }
 0x1f6   : > { %v4234_v17 = vld [vmem:[%s5026_s29 + $0x414] sm:$0xf]  ;;  %v3382_v26 = vor.u32 %v4178_v14, %v3379_v15  ;;  %v3290_v7 = vor.u32 %v4159_v2, %v3289_v0  ;;  %v4343_v13 = vld [vmem:[%s5026_s29 + $0x774] sm:$0xf0] }
 0x1f7   : > { %v3603_v18 = vld [vmem:[%s5026_s29 + $0x430] sm:$0xf0]  ;;  %2705 = vmatpush.bf16.msrb.mxu3 %v3926_v1  ;;  %2669 = vmatpush.bf16.msrb.mxu1 %v3414_v6  ;;  %v2355_v1 = vadd.f32 %v2354_v46, %v2337_v45  ;;  %v4058_v6 = vor.u32 %v4351_v63, %v4057_v62  ;;  %v3257_v14 = vld [vmem:[%s5026_s29 + $0x158] sm:$0xf] }
 0x1f8   : > { %v4298_v22 = vld [vmem:[%s5026_s29 + $0x614] sm:$0xf]  ;;  %v3606_v36 = vor.u32 %v4234_v17, %v3603_v18  ;;  %v4151_v16 = vld [vmem:[%s5026_s29 + $0x174] sm:$0xf0] }
 0x1f9   : > { %v3859_v23 = vld [vmem:[%s5026_s29 + $0x630] sm:$0xf0]  ;;  %2688 = vmatpush.bf16.msrb.mxu2 %v3638_v20  ;;  %2652 = vmatpush.bf16.msrb.mxu0 %v3126_v25  ;;  %2878 = vst [vmem:[%s5480_s9 + $0x80] sm:$0xff] %v2355_v1  ;;  %v3513_v17 = vld [vmem:[%s5026_s29 + $0x358] sm:$0xf]  ;;  %v3258_v25 = vor.u32 %v4151_v16, %v3257_v14 }
 0x1fa   : > { %v4106_v24 = vld [vmem:[%s5026_s29 + $0x14] sm:$0xf]  ;;  %v3862_v37 = vor.u32 %v4298_v22, %v3859_v23  ;;  %v4215_v18 = vld [vmem:[%s5026_s29 + $0x374] sm:$0xf0]  ;;  %v4026_v22 = vor.u32 %v4343_v13, %v4025_v12 }
 0x1fb   : > { %v3091_v27 = vld [vmem:[%s5026_s29 + $0x30] sm:$0xf0]  ;;  %2706 = vmatpush.bf16.msrb.mxu3 %v3894_v21  ;;  %2670 = vmatpush.bf16.msrb.mxu1 %v3382_v26  ;;  %v2338_v11 = vpop.f32.mrf.mxu2  ;;  %v2385_v20 = vpop.f32.mrf.mxu1  ;;  %v3770_v21 = vor.u32 %v4279_v10, %v3769_v9  ;;  %v3737_v23 = vld [vmem:[%s5026_s29 + $0x518] sm:$0xf]  ;;  %v3514_v26 = vor.u32 %v4215_v18, %v3513_v17 }
 0x1fc   : > { %v4170_v28 = vld [vmem:[%s5026_s29 + $0x214] sm:$0xf]  ;;  %v3094_v43 = vor.u32 %v4106_v24, %v3091_v27  ;;  %v4271_v24 = vld [vmem:[%s5026_s29 + $0x534] sm:$0xf0] }
 0x1fd   : > { %v3347_v29 = vld [vmem:[%s5026_s29 + $0x230] sm:$0xf0]  ;;  %2689 = vmatpush.bf16.msrb.mxu2 %v3606_v36  ;;  %v2356_v15 = vpop.f32.mrf.mxu3  ;;  %v2367_v19 = vpop.f32.mrf.mxu0  ;;  %v3993_v27 = vld [vmem:[%s5026_s29 + $0x718] sm:$0xf]  ;;  %v3738_v34 = vor.u32 %v4271_v24, %v3737_v23 }
 0x1fe   : > { %v3350_v44 = vor.u32 %v4170_v28, %v3347_v29  ;;  %2653 = vmatpush.bf16.msrb.mxu0 %v3094_v43  ;;  %v4335_v28 = vld [vmem:[%s5026_s29 + $0x734] sm:$0xf0]  ;;  %v2386_v30 = vadd.f32 %v2385_v20, %v2367_v19 }
 0x1ff   : > { %2707 = vmatpush.bf16.msrb.mxu3 %v3862_v37  ;;  %v3225_v29 = vld [vmem:[%s5026_s29 + $0x118] sm:$0xf]  ;;  %v3994_v35 = vor.u32 %v4335_v28, %v3993_v27 }
 0x200   : > { %2671 = vmatpush.bf16.msrb.mxu1 %v3350_v44  ;;  %v4143_v31 = vld [vmem:[%s5026_s29 + $0x134] sm:$0xf0] }
 0x201   : > { %2754 = vmatpush.bf16.msra.mxu2 %v3834_v51  ;;  %2654 = vmatmul.bf16.vlgmr.msrb.gmra.mxu0 %v5123_v48  ;;  %v3481_v32 = vld [vmem:[%s5026_s29 + $0x318] sm:$0xf]  ;;  %v3226_v39 = vor.u32 %v4143_v31, %v3225_v29 }
 0x202   : > { %2718 = vmatpush.bf16.msra.mxu0 %v3322_v60  ;;  %2690 = vmatmul.bf16.vlgmr.msrb.gmra.mxu2 %v5130_v54  ;;  %v4207_v33 = vld [vmem:[%s5026_s29 + $0x334] sm:$0xf0] }
 0x203   : > { %2772 = vmatpush.bf16.msra.mxu3 %v4090_v55  ;;  %2672 = vmatmul.bf16.vlgmr.msrb.gmra.mxu1 %v5128_v53  ;;  %v3705_v36 = vld [vmem:[%s5026_s29 + $0x4d8] sm:$0xf]  ;;  %v2403_v38 = vpop.f32.mrf.mxu2  ;;  %v3482_v40 = vor.u32 %v4207_v33, %v3481_v32  ;;  %v2387_v59 = vpop.f32.mrf.mxu1 }
 0x204   : > { %2736 = vmatpush.bf16.msra.mxu1 %v3578_v61  ;;  %2708 = vmatmul.bf16.vlgmr.msrb.gmra.mxu3 %v5134_v57  ;;  %v4263_v37 = vld [vmem:[%s5026_s29 + $0x4f4] sm:$0xf0]  ;;  %v2404_v45 = vadd.f32 %v2403_v38, %v2386_v30 }
 0x205   : > { %2755 = vmatpush.bf16.msra.mxu2 %v3802_v5  ;;  %v3961_v41 = vld [vmem:[%s5026_s29 + $0x6d8] sm:$0xf]  ;;  %v2421_v46 = vpop.f32.mrf.mxu3  ;;  %v2369_v56 = vpop.f32.mrf.mxu0  ;;  %v3706_v60 = vor.u32 %v4263_v37, %v3705_v36 }
 0x206   : > { %2719 = vmatpush.bf16.msra.mxu0 %v3290_v7  ;;  %v4327_v43 = vld [vmem:[%s5026_s29 + $0x6f4] sm:$0xf0]  ;;  %v2422_v58 = vadd.f32 %v2421_v46, %v2404_v45  ;;  %v4163_v45 = vld [vmem:[%s5026_s29 + $0x1dc] sm:$0xf] }
 0x207   : > { %2773 = vmatpush.bf16.msra.mxu3 %v4058_v6  ;;  %v3193_v44 = vld [vmem:[%s5026_s29 + $0xd8] sm:$0xf]  ;;  %v3962_v61 = vor.u32 %v4327_v43, %v3961_v41  ;;  %v3835_v41 = vld [vmem:[%s5026_s29 + $0x5f8] sm:$0xf0] }
 0x208   : > { %2737 = vmatpush.bf16.msra.mxu1 %v3546_v8  ;;  %v4135_v50 = vld [vmem:[%s5026_s29 + $0xf4] sm:$0xf0]  ;;  %2863 = vst [vmem:[%s5480_s9 + $0x8] sm:$0xff] %v2422_v58  ;;  %v2388_v8 = vadd.f32 %v2387_v59, %v2369_v56  ;;  %v4355_v43 = vld [vmem:[%s5026_s29 + $0x7dc] sm:$0xf] }
 0x209   : > { %2756 = vmatpush.bf16.msra.mxu2 %v3770_v21  ;;  %v3449_v51 = vld [vmem:[%s5026_s29 + $0x2d8] sm:$0xf]  ;;  %v3194_v1 = vor.u32 %v4135_v50, %v3193_v44  ;;  %v4091_v44 = vld [vmem:[%s5026_s29 + $0x7f8] sm:$0xf0] }
 0x20a   : > { %2720 = vmatpush.bf16.msra.mxu0 %v3258_v25  ;;  %v4199_v55 = vld [vmem:[%s5026_s29 + $0x2f4] sm:$0xf0]  ;;  %v3579_v56 = vld [vmem:[%s5026_s29 + $0x3f8] sm:$0xf0] }
 0x20b   : > { %2774 = vmatpush.bf16.msra.mxu3 %v4026_v22  ;;  %v3673_v62 = vld [vmem:[%s5026_s29 + $0x498] sm:$0xf]  ;;  %v3450_v2 = vor.u32 %v4199_v55, %v3449_v51  ;;  %v2405_v13 = vpop.f32.mrf.mxu2  ;;  %v2390_v28 = vpop.f32.mrf.mxu1  ;;  %v3323_v51 = vld [vmem:[%s5026_s29 + $0x1f8] sm:$0xf0] }
 0x20c   : > { %2738 = vmatpush.bf16.msra.mxu1 %v3514_v26  ;;  %v4255_v63 = vld [vmem:[%s5026_s29 + $0x4b4] sm:$0xf0]  ;;  %v2406_v19 = vadd.f32 %v2405_v13, %v2388_v8  ;;  %v4227_v55 = vld [vmem:[%s5026_s29 + $0x3dc] sm:$0xf] }
 0x20d   : > { %2757 = vmatpush.bf16.msra.mxu2 %v3738_v34  ;;  %v3929_v0 = vld [vmem:[%s5026_s29 + $0x698] sm:$0xf]  ;;  %v3674_v9 = vor.u32 %v4255_v63, %v3673_v62  ;;  %v2423_v20 = vpop.f32.mrf.mxu3  ;;  %v2372_v24 = vpop.f32.mrf.mxu0  ;;  %v4155_v8 = vld [vmem:[%s5026_s29 + $0x19c] sm:$0xf] }
 0x20e   : > { %2721 = vmatpush.bf16.msra.mxu0 %v3226_v39  ;;  %v4319_v3 = vld [vmem:[%s5026_s29 + $0x6b4] sm:$0xf0]  ;;  %v2424_v27 = vadd.f32 %v2423_v20, %v2406_v19  ;;  %v2391_v39 = vadd.f32 %v2390_v28, %v2372_v24  ;;  %v3547_v13 = vld [vmem:[%s5026_s29 + $0x3b8] sm:$0xf0] }
 0x20f   : > { %2775 = vmatpush.bf16.msra.mxu3 %v3994_v35  ;;  %v3161_v4 = vld [vmem:[%s5026_s29 + $0x98] sm:$0xf]  ;;  %v3930_v10 = vor.u32 %v4319_v3, %v3929_v0  ;;  %v4094_v0 = vor.u32 %v4355_v43, %v4091_v44  ;;  %v3771_v19 = vld [vmem:[%s5026_s29 + $0x578] sm:$0xf0] }
 0x210   : > { %2739 = vmatpush.bf16.msra.mxu1 %v3482_v40  ;;  %v4127_v5 = vld [vmem:[%s5026_s29 + $0xb4] sm:$0xf0]  ;;  %2871 = vst [vmem:[%s5480_s9 + $0x48] sm:$0xff] %v2424_v27  ;;  %v4291_v40 = vld [vmem:[%s5026_s29 + $0x5dc] sm:$0xf] }
 0x211   : > { %v3417_v6 = vld [vmem:[%s5026_s29 + $0x298] sm:$0xf]  ;;  %2758 = vmatpush.bf16.msra.mxu2 %v3706_v60  ;;  %v3162_v14 = vor.u32 %v4127_v5, %v3161_v4  ;;  %2659 = vmatmul.bf16.gmra.mxu0 %v5173_v42  ;;  %v3838_v63 = vor.u32 %v4291_v40, %v3835_v41  ;;  %v3326_v4 = vor.u32 %v4163_v45, %v3323_v51  ;;  %v3515_v27 = vld [vmem:[%s5026_s29 + $0x378] sm:$0xf0] }
 0x212   : > { %v4191_v7 = vld [vmem:[%s5026_s29 + $0x2b4] sm:$0xf0]  ;;  %2722 = vmatpush.bf16.msra.mxu0 %v3194_v1  ;;  %2695 = vmatmul.bf16.gmra.mxu2 %v5180_v49  ;;  %v4283_v1 = vld [vmem:[%s5026_s29 + $0x59c] sm:$0xf]  ;;  %v3582_v5 = vor.u32 %v4227_v55, %v3579_v56 }
 0x213   : > { %2776 = vmatpush.bf16.msra.mxu3 %v3962_v61  ;;  %v3641_v11 = vld [vmem:[%s5026_s29 + $0x458] sm:$0xf]  ;;  %v3418_v15 = vor.u32 %v4191_v7, %v3417_v6  ;;  %2677 = vmatmul.bf16.gmra.mxu1 %v5178_v47  ;;  %v2408_v58 = vpop.f32.mrf.mxu2  ;;  %v4347_v6 = vld [vmem:[%s5026_s29 + $0x79c] sm:$0xf] }
 0x214   : > { %v4247_v12 = vld [vmem:[%s5026_s29 + $0x474] sm:$0xf0]  ;;  %2740 = vmatpush.bf16.msra.mxu1 %v3450_v2  ;;  %2713 = vmatmul.bf16.gmra.mxu3 %v5184_v52  ;;  %v2409_v61 = vadd.f32 %v2408_v58, %v2391_v39  ;;  %v3803_v2 = vld [vmem:[%s5026_s29 + $0x5b8] sm:$0xf0] }
 0x215   : > { %v3897_v16 = vld [vmem:[%s5026_s29 + $0x658] sm:$0xf]  ;;  %2759 = vmatpush.bf16.msra.mxu2 %v3674_v9  ;;  %v3642_v29 = vor.u32 %v4247_v12, %v3641_v11  ;;  %v2426_v62 = vpop.f32.mrf.mxu3  ;;  %v2374_v3 = vpop.f32.mrf.mxu0  ;;  %v4059_v7 = vld [vmem:[%s5026_s29 + $0x7b8] sm:$0xf0] }
 0x216   : > { %v4311_v17 = vld [vmem:[%s5026_s29 + $0x674] sm:$0xf0]  ;;  %2723 = vmatpush.bf16.msra.mxu0 %v3162_v14  ;;  %v2427_v9 = vadd.f32 %v2426_v62, %v2409_v61  ;;  %v3291_v11 = vld [vmem:[%s5026_s29 + $0x1b8] sm:$0xf0]  ;;  %v3806_v14 = vor.u32 %v4283_v1, %v3803_v2 }
 0x217   : > { %v3129_v18 = vld [vmem:[%s5026_s29 + $0x58] sm:$0xf]  ;;  %2777 = vmatpush.bf16.msra.mxu3 %v3930_v10  ;;  %v3898_v30 = vor.u32 %v4311_v17, %v3897_v16  ;;  %v2392_v10 = vpop.f32.mrf.mxu1  ;;  %v4219_v12 = vld [vmem:[%s5026_s29 + $0x39c] sm:$0xf]  ;;  %v3294_v16 = vor.u32 %v4155_v8, %v3291_v11 }
 0x218   : > { %v4119_v21 = vld [vmem:[%s5026_s29 + $0x74] sm:$0xf0]  ;;  %2741 = vmatpush.bf16.msra.mxu1 %v3418_v15  ;;  %2879 = vst [vmem:[%s5480_s9 + $0x88] sm:$0xff] %v2427_v9  ;;  %v4062_v15 = vor.u32 %v4347_v6, %v4059_v7  ;;  %v3550_v17 = vor.u32 %v4219_v12, %v3547_v13  ;;  %v3227_v40 = vld [vmem:[%s5026_s29 + $0x138] sm:$0xf0] }
 0x219   : > { %v3385_v22 = vld [vmem:[%s5026_s29 + $0x258] sm:$0xf]  ;;  %v3130_v34 = vor.u32 %v4119_v21, %v3129_v18  ;;  %2760 = vmatpush.bf16.msra.mxu2 %v3642_v29  ;;  %v4275_v18 = vld [vmem:[%s5026_s29 + $0x55c] sm:$0xf] }
 0x21a   : > { %v4183_v23 = vld [vmem:[%s5026_s29 + $0x274] sm:$0xf0]  ;;  %v4339_v21 = vld [vmem:[%s5026_s29 + $0x75c] sm:$0xf] }
 0x21b   : > { %v3609_v25 = vld [vmem:[%s5026_s29 + $0x418] sm:$0xf]  ;;  %v3386_v35 = vor.u32 %v4183_v23, %v3385_v22  ;;  %2778 = vmatpush.bf16.msra.mxu3 %v3898_v30  ;;  %2724 = vmatpush.bf16.msra.mxu0 %v3130_v34  ;;  %v2410_v20 = vpop.f32.mrf.mxu2  ;;  %v4027_v22 = vld [vmem:[%s5026_s29 + $0x778] sm:$0xf0]  ;;  %v3774_v30 = vor.u32 %v4275_v18, %v3771_v19 }
 0x21c   : > { %v4239_v26 = vld [vmem:[%s5026_s29 + $0x434] sm:$0xf0]  ;;  %v4147_v23 = vld [vmem:[%s5026_s29 + $0x15c] sm:$0xf] }
 0x21d   : > { %v3865_v31 = vld [vmem:[%s5026_s29 + $0x618] sm:$0xf]  ;;  %v3610_v46 = vor.u32 %v4239_v26, %v3609_v25  ;;  %2742 = vmatpush.bf16.msra.mxu1 %v3386_v35  ;;  %v2428_v24 = vpop.f32.mrf.mxu3  ;;  %v3259_v25 = vld [vmem:[%s5026_s29 + $0x178] sm:$0xf0]  ;;  %v2439_v28 = vpop.f32.mrf.mxu0 }
 0x21e   : > { %v4303_v32 = vld [vmem:[%s5026_s29 + $0x634] sm:$0xf0]  ;;  %v4211_v26 = vld [vmem:[%s5026_s29 + $0x35c] sm:$0xf]  ;;  %v3262_v34 = vor.u32 %v4147_v23, %v3259_v25 }
 0x21f   : > { %v3097_v33 = vld [vmem:[%s5026_s29 + $0x18] sm:$0xf]  ;;  %v3866_v50 = vor.u32 %v4303_v32, %v3865_v31  ;;  %2761 = vmatpush.bf16.msra.mxu2 %v3610_v46  ;;  %v2457_v29 = vpop.f32.mrf.mxu1  ;;  %v4030_v31 = vor.u32 %v4339_v21, %v4027_v22  ;;  %v4267_v32 = vld [vmem:[%s5026_s29 + $0x51c] sm:$0xf]  ;;  %v3518_v35 = vor.u32 %v4211_v26, %v3515_v27 }
 0x220   : > { %v4111_v36 = vld [vmem:[%s5026_s29 + $0x34] sm:$0xf0]  ;;  %v2458_v39 = vadd.f32 %v2457_v29, %v2439_v28  ;;  %v4203_v41 = vld [vmem:[%s5026_s29 + $0x31c] sm:$0xf] }
 0x221   : > { %v3353_v37 = vld [vmem:[%s5026_s29 + $0x218] sm:$0xf]  ;;  %v3098_v59 = vor.u32 %v4111_v36, %v3097_v33  ;;  %2779 = vmatpush.bf16.msra.mxu3 %v3866_v50  ;;  %v3739_v33 = vld [vmem:[%s5026_s29 + $0x538] sm:$0xf0] }
 0x222   : > { %v4175_v38 = vld [vmem:[%s5026_s29 + $0x234] sm:$0xf0]  ;;  %v4331_v36 = vld [vmem:[%s5026_s29 + $0x71c] sm:$0xf]  ;;  %2762 = vmatmul.bf16.vlgmr.msra.gmra.mxu2 %v5130_v54  ;;  %v3742_v44 = vor.u32 %v4267_v32, %v3739_v33 }
 0x223   : > { %v3354_v60 = vor.u32 %v4175_v38, %v3353_v37  ;;  %2725 = vmatpush.bf16.msra.mxu0 %v3098_v59  ;;  %2826 = vmatpush.bf16.msrb.mxu2 %v3838_v63  ;;  %v3995_v37 = vld [vmem:[%s5026_s29 + $0x738] sm:$0xf0] }
 0x224   : > { %v4139_v38 = vld [vmem:[%s5026_s29 + $0x11c] sm:$0xf]  ;;  %2780 = vmatmul.bf16.vlgmr.msra.gmra.mxu3 %v5134_v57  ;;  %v3998_v45 = vor.u32 %v4331_v36, %v3995_v37 }
 0x225   : > { %2743 = vmatpush.bf16.msra.mxu1 %v3354_v60  ;;  %2844 = vmatpush.bf16.msrb.mxu3 %v4094_v0  ;;  %v3483_v43 = vld [vmem:[%s5026_s29 + $0x338] sm:$0xf0]  ;;  %v2475_v51 = vpop.f32.mrf.mxu2  ;;  %v3230_v55 = vor.u32 %v4139_v38, %v3227_v40  ;;  %v2493_v62 = vpop.f32.mrf.mxu3 }
 0x226   : > { %2726 = vmatmul.bf16.vlgmr.msra.gmra.mxu0 %v5123_v48  ;;  %v4259_v46 = vld [vmem:[%s5026_s29 + $0x4dc] sm:$0xf]  ;;  %v3486_v56 = vor.u32 %v4203_v41, %v3483_v43  ;;  %v2476_v61 = vadd.f32 %v2475_v51, %v2458_v39  ;;  %v2441_v2 = vpop.f32.mrf.mxu0 }
 0x227   : > { %2790 = vmatpush.bf16.msrb.mxu0 %v3326_v4  ;;  %2827 = vmatpush.bf16.msrb.mxu2 %v3806_v14  ;;  %v3707_v50 = vld [vmem:[%s5026_s29 + $0x4f8] sm:$0xf0]  ;;  %v2459_v4 = vpop.f32.mrf.mxu1 }
 0x228   : > { %2744 = vmatmul.bf16.vlgmr.msra.gmra.mxu1 %v5128_v53  ;;  %v4323_v58 = vld [vmem:[%s5026_s29 + $0x6dc] sm:$0xf]  ;;  %v2494_v3 = vadd.f32 %v2493_v62, %v2476_v61 }
 0x229   : > { %2808 = vmatpush.bf16.msrb.mxu1 %v3582_v5  ;;  %2845 = vmatpush.bf16.msrb.mxu3 %v4062_v15  ;;  %v3963_v59 = vld [vmem:[%s5026_s29 + $0x6f8] sm:$0xf0]  ;;  %v3710_v5 = vor.u32 %v4259_v46, %v3707_v50 }
 0x22a   : > { %v4131_v60 = vld [vmem:[%s5026_s29 + $0xdc] sm:$0xf]  ;;  %v3966_v6 = vor.u32 %v4323_v58, %v3963_v59  ;;  %2864 = vst [vmem:[%s5480_s9 + $0x10] sm:$0xff] %v2494_v3 }
 0x22b   : > { %2791 = vmatpush.bf16.msrb.mxu0 %v3294_v16  ;;  %2828 = vmatpush.bf16.msrb.mxu2 %v3774_v30  ;;  %v3195_v63 = vld [vmem:[%s5026_s29 + $0xf8] sm:$0xf0] }
 0x22c   : > { %v4195_v0 = vld [vmem:[%s5026_s29 + $0x2dc] sm:$0xf]  ;;  %v3198_v10 = vor.u32 %v4131_v60, %v3195_v63 }
 0x22d   : > { %2809 = vmatpush.bf16.msrb.mxu1 %v3550_v17  ;;  %2846 = vmatpush.bf16.msrb.mxu3 %v4030_v31  ;;  %v3451_v1 = vld [vmem:[%s5026_s29 + $0x2f8] sm:$0xf0]  ;;  %v2460_v17 = vadd.f32 %v2459_v4, %v2441_v2  ;;  %v2477_v22 = vpop.f32.mrf.mxu2  ;;  %v2495_v29 = vpop.f32.mrf.mxu3 }
 0x22e   : > { %v4251_v7 = vld [vmem:[%s5026_s29 + $0x49c] sm:$0xf]  ;;  %v3454_v11 = vor.u32 %v4195_v0, %v3451_v1  ;;  %v2444_v33 = vpop.f32.mrf.mxu0 }
 0x22f   : > { %2792 = vmatpush.bf16.msrb.mxu0 %v3262_v34  ;;  %2829 = vmatpush.bf16.msrb.mxu2 %v3742_v44  ;;  %v3675_v8 = vld [vmem:[%s5026_s29 + $0x4b8] sm:$0xf0]  ;;  %v2478_v28 = vadd.f32 %v2477_v22, %v2460_v17 }
 0x230   : > { %v4315_v9 = vld [vmem:[%s5026_s29 + $0x69c] sm:$0xf]  ;;  %v3678_v18 = vor.u32 %v4251_v7, %v3675_v8 }
 0x231   : > { %2810 = vmatpush.bf16.msrb.mxu1 %v3518_v35  ;;  %2847 = vmatpush.bf16.msrb.mxu3 %v3998_v45  ;;  %v3931_v12 = vld [vmem:[%s5026_s29 + $0x6b8] sm:$0xf0]  ;;  %v2496_v34 = vadd.f32 %v2495_v29, %v2478_v28  ;;  %v2462_v35 = vpop.f32.mrf.mxu1 }
 0x232   : > { %v4123_v13 = vld [vmem:[%s5026_s29 + $0x9c] sm:$0xf]  ;;  %v3934_v19 = vor.u32 %v4315_v9, %v3931_v12  ;;  %v2463_v50 = vadd.f32 %v2462_v35, %v2444_v33  ;;  %2767 = vmatmul.bf16.gmra.mxu2 %v5180_v49 }
 0x233   : > { %2793 = vmatpush.bf16.msrb.mxu0 %v3230_v55  ;;  %v3163_v14 = vld [vmem:[%s5026_s29 + $0xb8] sm:$0xf0]  ;;  %2830 = vmatpush.bf16.msrb.mxu2 %v3710_v5  ;;  %2872 = vst [vmem:[%s5480_s9 + $0x50] sm:$0xff] %v2496_v34 }
 0x234   : > { %v4187_v15 = vld [vmem:[%s5026_s29 + $0x29c] sm:$0xf]  ;;  %v3166_v23 = vor.u32 %v4123_v13, %v3163_v14  ;;  %2785 = vmatmul.bf16.gmra.mxu3 %v5184_v52 }
 0x235   : > { %2811 = vmatpush.bf16.msrb.mxu1 %v3486_v56  ;;  %v3419_v16 = vld [vmem:[%s5026_s29 + $0x2b8] sm:$0xf0]  ;;  %2848 = vmatpush.bf16.msrb.mxu3 %v3966_v6  ;;  %v2480_v59 = vpop.f32.mrf.mxu2  ;;  %v2498_v63 = vpop.f32.mrf.mxu3 }
 0x236   : > { %v4243_v20 = vld [vmem:[%s5026_s29 + $0x45c] sm:$0xf]  ;;  %v3422_v24 = vor.u32 %v4187_v15, %v3419_v16  ;;  %2731 = vmatmul.bf16.gmra.mxu0 %v5173_v42  ;;  %v2481_v62 = vadd.f32 %v2480_v59, %v2463_v50  ;;  %v2446_v0 = vpop.f32.mrf.mxu0 }
 0x237   : > { %v3643_v21 = vld [vmem:[%s5026_s29 + $0x478] sm:$0xf0]  ;;  %2794 = vmatpush.bf16.msrb.mxu0 %v3198_v10  ;;  %2831 = vmatpush.bf16.msrb.mxu2 %v3678_v18 }
 0x238   : > { %v4307_v25 = vld [vmem:[%s5026_s29 + $0x65c] sm:$0xf]  ;;  %v3646_v36 = vor.u32 %v4243_v20, %v3643_v21  ;;  %2749 = vmatmul.bf16.gmra.mxu1 %v5178_v47  ;;  %v2499_v1 = vadd.f32 %v2498_v63, %v2481_v62 }
 0x239   : > { %2812 = vmatpush.bf16.msrb.mxu1 %v3454_v11  ;;  %v3899_v26 = vld [vmem:[%s5026_s29 + $0x678] sm:$0xf0]  ;;  %2849 = vmatpush.bf16.msrb.mxu3 %v3934_v19  ;;  %v2464_v2 = vpop.f32.mrf.mxu1 }
 0x23a   : > { %v4115_v27 = vld [vmem:[%s5026_s29 + $0x5c] sm:$0xf]  ;;  %v3902_v37 = vor.u32 %v4307_v25, %v3899_v26  ;;  %2880 = vst [vmem:[%s5480_s9 + $0x90] sm:$0xff] %v2499_v1 }
 0x23b   : > { %v3131_v30 = vld [vmem:[%s5026_s29 + $0x78] sm:$0xf0]  ;;  %2795 = vmatpush.bf16.msrb.mxu0 %v3166_v23  ;;  %2832 = vmatpush.bf16.msrb.mxu2 %v3646_v36 }
 0x23c   : > { %v4179_v31 = vld [vmem:[%s5026_s29 + $0x25c] sm:$0xf]  ;;  %v3134_v41 = vor.u32 %v4115_v27, %v3131_v30 }
 0x23d   : > { %v3387_v32 = vld [vmem:[%s5026_s29 + $0x278] sm:$0xf0]  ;;  %2813 = vmatpush.bf16.msrb.mxu1 %v3422_v24  ;;  %2850 = vmatpush.bf16.msrb.mxu3 %v3902_v37  ;;  %v2482_v3 = vpop.f32.mrf.mxu2  ;;  %v2500_v4 = vpop.f32.mrf.mxu3 }
 0x23e   : > { %v4235_v38 = vld [vmem:[%s5026_s29 + $0x41c] sm:$0xf]  ;;  %v3390_v43 = vor.u32 %v4179_v31, %v3387_v32  ;;  %v2511_v5 = vpop.f32.mrf.mxu0 }
 0x23f   : > { %v3611_v39 = vld [vmem:[%s5026_s29 + $0x438] sm:$0xf0]  ;;  %2796 = vmatpush.bf16.msrb.mxu0 %v3134_v41 }
 0x240   : > { %v4299_v40 = vld [vmem:[%s5026_s29 + $0x61c] sm:$0xf]  ;;  %v3614_v56 = vor.u32 %v4235_v38, %v3611_v39 }
 0x241   : > { %v3867_v44 = vld [vmem:[%s5026_s29 + $0x638] sm:$0xf0]  ;;  %2814 = vmatpush.bf16.msrb.mxu1 %v3390_v43  ;;  %v2529_v6 = vpop.f32.mrf.mxu1 }
 0x242   : > { %v4107_v45 = vld [vmem:[%s5026_s29 + $0x1c] sm:$0xf]  ;;  %v3870_v58 = vor.u32 %v4299_v40, %v3867_v44  ;;  %2833 = vmatpush.bf16.msrb.mxu2 %v3614_v56  ;;  %v2530_v7 = vadd.f32 %v2529_v6, %v2511_v5 }
 0x243   : > { %v3099_v46 = vld [vmem:[%s5026_s29 + $0x38] sm:$0xf0] }
 0x244   : > { %v4171_v51 = vld [vmem:[%s5026_s29 + $0x21c] sm:$0xf]  ;;  %v3102_v60 = vor.u32 %v4107_v45, %v3099_v46  ;;  %2851 = vmatpush.bf16.msrb.mxu3 %v3870_v58 }
 0x245   : > { %v3355_v55 = vld [vmem:[%s5026_s29 + $0x238] sm:$0xf0]  ;;  %2834 = vmatmul.bf16.vlgmr.msrb.gmra.mxu2 %v5130_v54  ;;  %v2547_v8 = vpop.f32.mrf.mxu2  ;;  %v2565_v10 = vpop.f32.mrf.mxu3 }
 0x246   : > { %v3358_v61 = vor.u32 %v4171_v51, %v3355_v55  ;;  %2797 = vmatpush.bf16.msrb.mxu0 %v3102_v60  ;;  %v2548_v9 = vadd.f32 %v2547_v8, %v2530_v7  ;;  %v2513_v11 = vpop.f32.mrf.mxu0 }
 0x247   : > { %2852 = vmatmul.bf16.vlgmr.msrb.gmra.mxu3 %v5134_v57 }
 0x248   : > { %2815 = vmatpush.bf16.msrb.mxu1 %v3358_v61  ;;  %v2566_v12 = vadd.f32 %v2565_v10, %v2548_v9 }
 0x249   : > { %2798 = vmatmul.bf16.vlgmr.msrb.gmra.mxu0 %v5123_v48  ;;  %v2531_v13 = vpop.f32.mrf.mxu1 }
 0x24a   : > { %2865 = vst [vmem:[%s5480_s9 + $0x18] sm:$0xff] %v2566_v12  ;;  %v2532_v14 = vadd.f32 %v2531_v13, %v2513_v11 }
 0x24b   : > { %2816 = vmatmul.bf16.vlgmr.msrb.gmra.mxu1 %v5128_v53 }
 0x24d   : > { %v2549_v15 = vpop.f32.mrf.mxu2  ;;  %v2567_v17 = vpop.f32.mrf.mxu3 }
 0x24e   : > { %v2550_v16 = vadd.f32 %v2549_v15, %v2532_v14  ;;  %v2516_v48 = vpop.f32.mrf.mxu0 }
 0x250   : > { %v2568_v18 = vadd.f32 %v2567_v17, %v2550_v16 }
 0x251   : > { %v2534_v54 = vpop.f32.mrf.mxu1 }
 0x252   : > { %2873 = vst [vmem:[%s5480_s9 + $0x58] sm:$0xff] %v2568_v18  ;;  %v2535_v53 = vadd.f32 %v2534_v54, %v2516_v48 }
 0x255   : > { %2839 = vmatmul.bf16.gmra.mxu2 %v5180_v49  ;;  %v2552_v57 = vpop.f32.mrf.mxu2  ;;  %v2570_v20 = vpop.f32.mrf.mxu3 }
 0x256   : > { %v2553_v19 = vadd.f32 %v2552_v57, %v2535_v53  ;;  %v2518_v21 = vpop.f32.mrf.mxu0 }
 0x257   : > { %2857 = vmatmul.bf16.gmra.mxu3 %v5184_v52 }
 0x258   : > { %v2571_v22 = vadd.f32 %v2570_v20, %v2553_v19 }
 0x259   : > { %2803 = vmatmul.bf16.gmra.mxu0 %v5173_v42  ;;  %v2536_v23 = vpop.f32.mrf.mxu1 }
 0x25a   : > { %2881 = vst [vmem:[%s5480_s9 + $0x98] sm:$0xff] %v2571_v22 }
 0x25b   : > { %2821 = vmatmul.bf16.gmra.mxu1 %v5178_v47 }
 0x25d   : > { %v2554_v24 = vpop.f32.mrf.mxu2  ;;  %v2572_v25 = vpop.f32.mrf.mxu3 }
 0x25e   : > { %v2583_v26 = vpop.f32.mrf.mxu0 }
 0x261   : > { %v2601_v27 = vpop.f32.mrf.mxu1 }
 0x262   : > { %v2602_v42 = vadd.f32 %v2601_v27, %v2583_v26 }
 0x265   : > { %v2619_v28 = vpop.f32.mrf.mxu2 }
 0x266   : > { %v2620_v49 = vadd.f32 %v2619_v28, %v2602_v42  ;;  %v2585_v47 = vpop.f32.mrf.mxu0 }
 0x267   : > { %v2637_v29 = vpop.f32.mrf.mxu3 }
 0x268   : > { %v2638_v30 = vadd.f32 %v2637_v29, %v2620_v49 }
 0x269   : > { %v2603_v52 = vpop.f32.mrf.mxu1 }
 0x26a   : > { %2866 = vst [vmem:[%s5480_s9 + $0x20] sm:$0xff] %v2638_v30  ;;  %v2604_v31 = vadd.f32 %v2603_v52, %v2585_v47 }
 0x26d   : > { %v2621_v32 = vpop.f32.mrf.mxu2 }
 0x26e   : > { %v2622_v33 = vadd.f32 %v2621_v32, %v2604_v31  ;;  %v2588_v35 = vpop.f32.mrf.mxu0 }
 0x26f   : > { %v2639_v34 = vpop.f32.mrf.mxu3 }
 0x270   : > { %v2640_v36 = vadd.f32 %v2639_v34, %v2622_v33 }
 0x271   : > { %v2606_v37 = vpop.f32.mrf.mxu1 }
 0x272   : > { %2874 = vst [vmem:[%s5480_s9 + $0x60] sm:$0xff] %v2640_v36  ;;  %v2607_v38 = vadd.f32 %v2606_v37, %v2588_v35 }
 0x275   : > { %v2624_v39 = vpop.f32.mrf.mxu2 }
 0x276   : > { %v2625_v40 = vadd.f32 %v2624_v39, %v2607_v38  ;;  %v2590_v43 = vpop.f32.mrf.mxu0 }
 0x277   : > { %v2642_v41 = vpop.f32.mrf.mxu3 }
 0x278   : > { %v2643_v44 = vadd.f32 %v2642_v41, %v2625_v40 }
 0x279   : > { %v2608_v45 = vpop.f32.mrf.mxu1 }
 0x27a   : > { %2882 = vst [vmem:[%s5480_s9 + $0xa0] sm:$0xff] %v2643_v44 }
 0x27d   : > { %v2626_v46 = vpop.f32.mrf.mxu2 }
 0x27e   : > { %v2655_v51 = vpop.f32.mrf.mxu0 }
 0x27f   : > { %v2644_v50 = vpop.f32.mrf.mxu3 }
 0x281   : > { %v2673_v55 = vpop.f32.mrf.mxu1 }
 0x282   : > { %v2674_v56 = vadd.f32 %v2673_v55, %v2655_v51 }
 0x285   : > { %v2691_v58 = vpop.f32.mrf.mxu2 }
 0x286   : > { %v2692_v59 = vadd.f32 %v2691_v58, %v2674_v56  ;;  %v2657_v61 = vpop.f32.mrf.mxu0 }
 0x287   : > { %v2709_v60 = vpop.f32.mrf.mxu3 }
 0x288   : > { %v2710_v62 = vadd.f32 %v2709_v60, %v2692_v59 }
 0x289   : > { %v2675_v63 = vpop.f32.mrf.mxu1 }
 0x28a   : > { %2867 = vst [vmem:[%s5480_s9 + $0x28] sm:$0xff] %v2710_v62  ;;  %v2676_v0 = vadd.f32 %v2675_v63, %v2657_v61 }
 0x28d   : > { %v2693_v1 = vpop.f32.mrf.mxu2 }
 0x28e   : > { %v2694_v2 = vadd.f32 %v2693_v1, %v2676_v0  ;;  %v2660_v4 = vpop.f32.mrf.mxu0 }
 0x28f   : > { %v2711_v3 = vpop.f32.mrf.mxu3 }
 0x290   : > { %v2712_v5 = vadd.f32 %v2711_v3, %v2694_v2  ;;  %v2911_v2 = vld [vmem:[%s5480_s9] sm:$0xff] (%p4492_p6)  ;;  %v2913_v3 = vld [vmem:[%s5480_s9 + $0x8] sm:$0xff] (%p4492_p6) }
 0x291   : > { %v2678_v6 = vpop.f32.mrf.mxu1  ;;  %2912 = vst [vmem:[%s5689_s6] sm:$0xff] (%p4492_p6), %v2911_v2 }
 0x292   : > { %2875 = vst [vmem:[%s5480_s9 + $0x68] sm:$0xff] %v2712_v5  ;;  %v2679_v7 = vadd.f32 %v2678_v6, %v2660_v4  ;;  %v2915_v4 = vld [vmem:[%s5480_s9 + $0x10] sm:$0xff] (%p4492_p6)  ;;  %v2917_v5 = vld [vmem:[%s5480_s9 + $0x18] sm:$0xff] (%p4492_p6)  ;;  %v2919_v6 = vld [vmem:[%s5480_s9 + $0x20] sm:$0xff] (%p4492_p6) }
 0x293   : > { %2914 = vst [vmem:[%s5689_s6 + $0x8] sm:$0xff] (%p4492_p6), %v2913_v3 }
 0x294   : > { %2916 = vst [vmem:[%s5689_s6 + $0x10] sm:$0xff] (%p4492_p6), %v2915_v4 }
 0x295   : > { %v2696_v8 = vpop.f32.mrf.mxu2  ;;  %2918 = vst [vmem:[%s5689_s6 + $0x18] sm:$0xff] (%p4492_p6), %v2917_v5 }
 0x296   : > { %v2697_v9 = vadd.f32 %v2696_v8, %v2679_v7  ;;  %v2662_v11 = vpop.f32.mrf.mxu0  ;;  %v2921_v7 = vld [vmem:[%s5480_s9 + $0x28] sm:$0xff] (%p4492_p6)  ;;  %2920 = vst [vmem:[%s5689_s6 + $0x20] sm:$0xff] (%p4492_p6), %v2919_v6 }
 0x297   : > { %v2714_v10 = vpop.f32.mrf.mxu3  ;;  %2922 = vst [vmem:[%s5689_s6 + $0x28] sm:$0xff] (%p4492_p6), %v2921_v7  ;;  %v2929_v11 = vld [vmem:[%s5480_s9 + $0x48] sm:$0xff] (%p4492_p6) }
 0x298   : > { %v2715_v12 = vadd.f32 %v2714_v10, %v2697_v9  ;;  %v2927_v10 = vld [vmem:[%s5480_s9 + $0x40] sm:$0xff] (%p4492_p6)  ;;  %2930 = vst [vmem:[%s5689_s6 + $0x188] sm:$0xff] (%p4492_p6), %v2929_v11 }
 0x299   : > { %v2680_v13 = vpop.f32.mrf.mxu1  ;;  %2928 = vst [vmem:[%s5689_s6 + $0x180] sm:$0xff] (%p4492_p6), %v2927_v10 }
 0x29a   : > { %2883 = vst [vmem:[%s5480_s9 + $0xa8] sm:$0xff] %v2715_v12  ;;  %v2931_v12 = vld [vmem:[%s5480_s9 + $0x50] sm:$0xff] (%p4492_p6)  ;;  %v2933_v13 = vld [vmem:[%s5480_s9 + $0x58] sm:$0xff] (%p4492_p6) }
 0x29b   : > { %2932 = vst [vmem:[%s5689_s6 + $0x190] sm:$0xff] (%p4492_p6), %v2931_v12 }
 0x29c   : > { %2934 = vst [vmem:[%s5689_s6 + $0x198] sm:$0xff] (%p4492_p6), %v2933_v13 }
 0x29d   : > { %v2698_v14 = vpop.f32.mrf.mxu2 }
 0x29e   : > { %v2935_v14 = vld [vmem:[%s5480_s9 + $0x60] sm:$0xff] (%p4492_p6) }
 0x29f   : > { %v2716_v15 = vpop.f32.mrf.mxu3  ;;  %2936 = vst [vmem:[%s5689_s6 + $0x1a0] sm:$0xff] (%p4492_p6), %v2935_v14 }
 0x2a0   : > { %v2937_v15 = vld [vmem:[%s5480_s9 + $0x68] sm:$0xff] (%p4492_p6) }
 0x2a1   : > { %2938 = vst [vmem:[%s5689_s6 + $0x1a8] sm:$0xff] (%p4492_p6), %v2937_v15 }
 0x2a3   : > { %v2727_v16 = vpop.f32.mrf.mxu0 }
 0x2a5   : > { %v2745_v17 = vpop.f32.mrf.mxu1  ;;  %v2763_v18 = vpop.f32.mrf.mxu2 }
 0x2a6   : > { %v2746_v48 = vadd.f32 %v2745_v17, %v2727_v16 }
 0x2a7   : > { %v2781_v53 = vpop.f32.mrf.mxu3 }
 0x2a8   : > { %v2764_v54 = vadd.f32 %v2763_v18, %v2746_v48  ;;  %v2943_v48 = vld [vmem:[%s5480_s9 + $0x80] sm:$0xff] (%p4492_p6)  ;;  %v2945_v18 = vld [vmem:[%s5480_s9 + $0x88] sm:$0xff] (%p4492_p6) }
 0x2a9   : > { %2944 = vst [vmem:[%s5689_s6 + $0x300] sm:$0xff] (%p4492_p6), %v2943_v48 }
 0x2aa   : > { %v2782_v19 = vadd.f32 %v2781_v53, %v2764_v54  ;;  %v2947_v54 = vld [vmem:[%s5480_s9 + $0x90] sm:$0xff] (%p4492_p6)  ;;  %v2949_v53 = vld [vmem:[%s5480_s9 + $0x98] sm:$0xff] (%p4492_p6)  ;;  %2946 = vst [vmem:[%s5689_s6 + $0x308] sm:$0xff] (%p4492_p6), %v2945_v18 }
 0x2ab   : > { %v2729_v57 = vpop.f32.mrf.mxu0  ;;  %2948 = vst [vmem:[%s5689_s6 + $0x310] sm:$0xff] (%p4492_p6), %v2947_v54 }
 0x2ac   : > { %2868 = vst [vmem:[%s5480_s9 + $0x30] sm:$0xff] %v2782_v19  ;;  %v2953_v19 = vld [vmem:[%s5480_s9 + $0xa8] sm:$0xff] (%p4492_p6) }
 0x2ad   : > { %v2747_v20 = vpop.f32.mrf.mxu1  ;;  %v2765_v22 = vpop.f32.mrf.mxu2  ;;  %2950 = vst [vmem:[%s5689_s6 + $0x318] sm:$0xff] (%p4492_p6), %v2949_v53 }
 0x2ae   : > { %v2748_v21 = vadd.f32 %v2747_v20, %v2729_v57  ;;  %v2951_v57 = vld [vmem:[%s5480_s9 + $0xa0] sm:$0xff] (%p4492_p6)  ;;  %2954 = vst [vmem:[%s5689_s6 + $0x328] sm:$0xff] (%p4492_p6), %v2953_v19 }
 0x2af   : > { %v2783_v24 = vpop.f32.mrf.mxu3  ;;  %2952 = vst [vmem:[%s5689_s6 + $0x320] sm:$0xff] (%p4492_p6), %v2951_v57 }
 0x2b0   : > { %v2766_v23 = vadd.f32 %v2765_v22, %v2748_v21 }
 0x2b2   : > { %v2784_v26 = vadd.f32 %v2783_v24, %v2766_v23 }
 0x2b3   : > { %v2732_v25 = vpop.f32.mrf.mxu0  ;;  %v2923_v8 = vld [vmem:[%s5480_s9 + $0x30] sm:$0xff] (%p4492_p6) }
 0x2b4   : > { %2876 = vst [vmem:[%s5480_s9 + $0x70] sm:$0xff] %v2784_v26 }
 0x2b5   : > { %v2750_v27 = vpop.f32.mrf.mxu1  ;;  %v2768_v28 = vpop.f32.mrf.mxu2  ;;  %2924 = vst [vmem:[%s5689_s6 + $0x30] sm:$0xff] (%p4492_p6), %v2923_v8 }
 0x2b6   : > { %v2751_v42 = vadd.f32 %v2750_v27, %v2732_v25 }
 0x2b7   : > { %v2786_v29 = vpop.f32.mrf.mxu3 }
 0x2b8   : > { %v2769_v49 = vadd.f32 %v2768_v28, %v2751_v42 }
 0x2ba   : > { %v2787_v30 = vadd.f32 %v2786_v29, %v2769_v49 }
 0x2bb   : > { %v2734_v47 = vpop.f32.mrf.mxu0  ;;  %v2939_v16 = vld [vmem:[%s5480_s9 + $0x70] sm:$0xff] (%p4492_p6) }
 0x2bc   : > { %2884 = vst [vmem:[%s5480_s9 + $0xb0] sm:$0xff] %v2787_v30 }
 0x2bd   : > { %v2752_v52 = vpop.f32.mrf.mxu1  ;;  %v2770_v31 = vpop.f32.mrf.mxu2  ;;  %2940 = vst [vmem:[%s5689_s6 + $0x1b0] sm:$0xff] (%p4492_p6), %v2939_v16 }
 0x2bf   : > { %v2788_v32 = vpop.f32.mrf.mxu3 }
 0x2c3   : > { %v2955_v20 = vld [vmem:[%s5480_s9 + $0xb0] sm:$0xff] (%p4492_p6) }
 0x2c4   : > { %2956 = vst [vmem:[%s5689_s6 + $0x330] sm:$0xff] (%p4492_p6), %v2955_v20 }
 0x2c6   : > { %v2799_v33 = vpop.f32.mrf.mxu0 }
 0x2c8   : > { %v2817_v34 = vpop.f32.mrf.mxu1  ;;  %v2835_v36 = vpop.f32.mrf.mxu2 }
 0x2c9   : > { %v2818_v35 = vadd.f32 %v2817_v34, %v2799_v33 }
 0x2ca   : > { %v2853_v38 = vpop.f32.mrf.mxu3 }
 0x2cb   : > { %v2836_v37 = vadd.f32 %v2835_v36, %v2818_v35 }
 0x2cd   : > { %v2854_v40 = vadd.f32 %v2853_v38, %v2836_v37 }
 0x2ce   : > { %v2801_v39 = vpop.f32.mrf.mxu0 }
 0x2cf   : > { %2869 = vst [vmem:[%s5480_s9 + $0x38] sm:$0xff] %v2854_v40 }
 0x2d0   : > { %v2819_v41 = vpop.f32.mrf.mxu1  ;;  %v2837_v44 = vpop.f32.mrf.mxu2 }
 0x2d1   : > { %v2820_v43 = vadd.f32 %v2819_v41, %v2801_v39 }
 0x2d2   : > { %v2855_v46 = vpop.f32.mrf.mxu3 }
 0x2d3   : > { %v2838_v45 = vadd.f32 %v2837_v44, %v2820_v43 }
 0x2d5   : > { %v2856_v51 = vadd.f32 %v2855_v46, %v2838_v45 }
 0x2d6   : > { %v2804_v50 = vpop.f32.mrf.mxu0  ;;  %v2925_v9 = vld [vmem:[%s5480_s9 + $0x38] sm:$0xff] (%p4492_p6) }
 0x2d7   : > { %2877 = vst [vmem:[%s5480_s9 + $0x78] sm:$0xff] %v2856_v51 }
 0x2d8   : > { %v2822_v55 = vpop.f32.mrf.mxu1  ;;  %v2840_v58 = vpop.f32.mrf.mxu2  ;;  %2926 = vst [vmem:[%s5689_s6 + $0x38] sm:$0xff] (%p4492_p6), %v2925_v9 }
 0x2d9   : > { %v2823_v56 = vadd.f32 %v2822_v55, %v2804_v50 }
 0x2da   : > { %v2858_v60 = vpop.f32.mrf.mxu3 }
 0x2db   : > { %v2841_v59 = vadd.f32 %v2840_v58, %v2823_v56 }
 0x2dd   : > { %v2859_v62 = vadd.f32 %v2858_v60, %v2841_v59 }
 0x2de   : > { %v2806_v61 = vpop.f32.mrf.mxu0  ;;  %2892 = sbr.rel (!%p4492_p6) target bundleno = 744 (0x2e8), region = 55  ;;  %v2941_v17 = vld [vmem:[%s5480_s9 + $0x78] sm:$0xff] (%p4492_p6) }
 0x2df   : > { %2885 = vst [vmem:[%s5480_s9 + $0xb8] sm:$0xff] %v2859_v62 }
 0x2e0   : > { %v2824_v63 = vpop.f32.mrf.mxu1  ;;  %v2842_v0 = vpop.f32.mrf.mxu2  ;;  %2942 = vst [vmem:[%s5689_s6 + $0x1b8] sm:$0xff] (%p4492_p6), %v2941_v17 }
 0x2e2   : > { %v2860_v1 = vpop.f32.mrf.mxu3 }
 0x2e6   : > { %v2957_v21 = vld [vmem:[%s5480_s9 + $0xb8] sm:$0xff] }
 0x2e7   : > { %2958 = vst [vmem:[%s5689_s6 + $0x338] sm:$0xff] %v2957_v21 }
 0x2e8 PF: > { %s12_s13 = sadd.s32 1, %s4440_s13   ;;  %s5756_s9 = smov %s4428_s10 }
 0x2e9   : > { %p9_p11 = scmp.ge.s32.totalorder %s12_s13, 8   ;;  %s5757_s10 = smov %s4497_s19 }
 0x2ea   : > { %s5758_s11 = smov %s4436_s12  ;;  %s5759_s12 = smov %s5761_s14 }
 0x2eb   :  { %11 = sbr.rel (!%p9_p11) target bundleno = 3 (0x3), region = 112 }

</bundles_post_ra>
